<compile_context>
chip_gen: v7x
topology: tpu7x:2x2x1
jax: 0.10.0
libtpu: 0.0.40
codegen_flags: <defaults>
</compile_context>

<pallas_src>
import functools

import jax
import jax.numpy as jnp
from jax.experimental import pallas as pl
from jax.experimental.pallas import tpu as pltpu

# MLP dims matching the PyTorch module defaults.
IN_FEATURES = 50
HIDDEN = (512, 256, 128, 64, 32)
OUT_FEATURES = 3
LAYER_DIMS = (IN_FEATURES,) + HIDDEN + (OUT_FEATURES,)   # 50,512,256,128,64,32,3
MAX_BM = 1024   # per-core batch-tile cap (largest intermediate = bm x 512 f32)


def _round_up(n, m):
    return (n + m - 1) // m * m


def _num_tensorcores():
    """TensorCores per chip: 2 on v7x, 1 on v5e/v6e (fallback: 1)."""
    try:
        d = jax.devices()[0]
    except Exception:
        return 1
    n = getattr(d, "num_cores", None)
    if isinstance(n, int) and n > 0:
        return n
    kind = (getattr(d, "device_kind", "") or "").lower()
    return 2 if "v7" in kind else 1


def mlp_kernel(x_ref,
               w1, b1, w2, b2, w3, b3, w4, b4, w5, b5, w6, b6,
               o_ref):
    """Whole 6-layer MLP fused in one kernel; all weights resident in VMEM.

    Weights arrive as bf16 (MXU operands); dot accumulates in f32 and the
    bias-add / ReLU stay in f32 on the VPU.
    """
    def dense(h_f32, w_ref, b_ref, relu):
        y = jnp.dot(h_f32.astype(jnp.bfloat16), w_ref[...],
                    preferred_element_type=jnp.float32) + b_ref[...]
        return jnp.maximum(y, 0.0) if relu else y

    h = x_ref[...]
    h = dense(h, w1, b1, True)
    h = dense(h, w2, b2, True)
    h = dense(h, w3, b3, True)
    h = dense(h, w4, b4, True)
    h = dense(h, w5, b5, True)
    # Final linear (no activation); output block is (bm, OUT_FEATURES).
    o_ref[...] = dense(h, w6, b6, False).astype(o_ref.dtype)


def _param_spec(shape):
    # Weights/biases are grid-invariant (constant index_map): single-buffer
    # them so the pipeline doesn't allocate redundant second copies.
    try:
        return pl.BlockSpec(shape, lambda i: (0, 0),
                            pipeline_mode=pl.Buffered(1))
    except TypeError:  # older JAX without pipeline_mode kwarg
        return pl.BlockSpec(shape, lambda i: (0, 0))


@functools.partial(jax.jit, static_argnames=("bm",))
def _mlp_forward(x, params, bm):
    B, F = x.shape
    assert F == IN_FEATURES
    Bp = _round_up(B, bm)
    if Bp != B:
        x = jnp.pad(x, ((0, Bp - B), (0, 0)))

    x_spec = pl.BlockSpec((bm, IN_FEATURES), lambda i: (i, 0))
    # Output block's last dim equals the full array dim (3): no lane padding,
    # no wrapper lane-slice copy, minimal HBM writeback.
    o_spec = pl.BlockSpec((bm, OUT_FEATURES), lambda i: (i, 0))
    param_specs = [_param_spec(p.shape) for p in params]

    out = pl.pallas_call(
        mlp_kernel,
        out_shape=jax.ShapeDtypeStruct((Bp, OUT_FEATURES), jnp.float32),
        grid_spec=pltpu.PrefetchScalarGridSpec(
            num_scalar_prefetch=0,
            grid=(Bp // bm,),
            in_specs=[x_spec] + param_specs,
            out_specs=o_spec,
        ),
        compiler_params=pltpu.CompilerParams(
            dimension_semantics=("parallel",),
        ),
    )(x, *params)
    # Drop batch padding (no lane padding to drop anymore).
    if Bp != B:
        out = out[:B]
    return out


def mlp_forward(x, params, *, max_bm=MAX_BM):
    """x: [B, IN_FEATURES] f32.  params: flat tuple from prepare_params()."""
    B = x.shape[0]
    cores = _num_tensorcores()
    # One grid step per TensorCore: v5e/v6e -> single full-batch step (no serial
    # pipeline steps), v7x -> two parallel steps (one per TC). Cap the per-core
    # tile so intermediates stay a small fraction of VMEM for very large B.
    bm = min(max_bm, _round_up((B + cores - 1) // cores, 8))
    bm = max(8, bm)
    return _mlp_forward(x, params, bm=bm)


def init_params(key):
    """Deterministic f32 init mimicking nn.Linear's U(-1/sqrt(fan_in), +1/sqrt(fan_in))."""
    params = []
    for li in range(len(LAYER_DIMS) - 1):
        fan_in, fan_out = LAYER_DIMS[li], LAYER_DIMS[li + 1]
        key, kw, kb = jax.random.split(key, 3)
        bound = 1.0 / jnp.sqrt(jnp.float32(fan_in))
        w = jax.random.uniform(kw, (fan_in, fan_out), jnp.float32, -bound, bound)
        b = jax.random.uniform(kb, (1, fan_out), jnp.float32, -bound, bound)
        params += [w, b]
    return tuple(params)


def prepare_params(params_f32):
    """Cast weights to bf16 (MXU operands; f32 accumulation in-kernel).
    Biases stay f32. No output-lane padding needed anymore."""
    out = []
    n_layers = len(params_f32) // 2
    for li in range(n_layers):
        w = params_f32[2 * li]
        b = params_f32[2 * li + 1]
        out += [w.astype(jnp.bfloat16), b.astype(jnp.float32)]
    return tuple(out)


def reference_forward(x, params_f32):
    """Pure-JAX reference of the PyTorch forward pass, mimicking the kernel's
    bf16 matmul operands + f32 accumulation so tolerances stay tight."""
    h = x
    for li in range(5):
        w, b = params_f32[2 * li], params_f32[2 * li + 1]
        y = jnp.dot(h.astype(jnp.bfloat16), w.astype(jnp.bfloat16),
                    preferred_element_type=jnp.float32) + b
        h = jnp.maximum(y, 0.0)
    w, b = params_f32[10], params_f32[11]
    return jnp.dot(h.astype(jnp.bfloat16), w.astype(jnp.bfloat16),
                   preferred_element_type=jnp.float32) + b


if __name__ == "__main__":
    key = jax.random.PRNGKey(0)
    key, kx = jax.random.split(key)
    B = 512   # v5e/v6e: grid=(1,) full-batch step; v7x: grid=(2,), one per TC
    x = jax.random.normal(kx, (B, IN_FEATURES), jnp.float32)

    params_f32 = init_params(key)
    kernel_params = prepare_params(params_f32)

    out = mlp_forward(x, kernel_params)
    out = jax.block_until_ready(out)

    ref = reference_forward(x, params_f32)
    assert out.shape == (B, OUT_FEATURES)
    assert jnp.allclose(out, ref, atol=1e-2, rtol=1e-2), "mismatch vs reference"
    print("KERNEL_OK")
</pallas_src>

<mosaic_0001>
module attributes {stable_mosaic.version = 11 : i64} {
  func.func @mlp_kernel(%arg0: i32, %arg1: memref<512x50xf32, #tpu.memory_space<vmem>>, %arg2: memref<50x512xbf16, #tpu.memory_space<vmem>>, %arg3: memref<1x512xf32, #tpu.memory_space<vmem>>, %arg4: memref<512x256xbf16, #tpu.memory_space<vmem>>, %arg5: memref<1x256xf32, #tpu.memory_space<vmem>>, %arg6: memref<256x128xbf16, #tpu.memory_space<vmem>>, %arg7: memref<1x128xf32, #tpu.memory_space<vmem>>, %arg8: memref<128x64xbf16, #tpu.memory_space<vmem>>, %arg9: memref<1x64xf32, #tpu.memory_space<vmem>>, %arg10: memref<64x32xbf16, #tpu.memory_space<vmem>>, %arg11: memref<1x32xf32, #tpu.memory_space<vmem>>, %arg12: memref<32x3xbf16, #tpu.memory_space<vmem>>, %arg13: memref<1x3xf32, #tpu.memory_space<vmem>>, %arg14: memref<512x3xf32, #tpu.memory_space<vmem>>) attributes {dimension_semantics = [#tpu.dimension_semantics<parallel>], iteration_bounds = array<i64: 1>, scalar_prefetch = 0 : i64, scratch_operands = 0 : i64, tpu.core_type = #tpu.core_type<tc>, window_params = [{transform_indices = @transform_0, window_bounds = array<i64: 512, 50>}, {pipeline_mode = #tpu.pipeline_mode<synchronous>, transform_indices = @transform_1, window_bounds = array<i64: 50, 512>}, {pipeline_mode = #tpu.pipeline_mode<synchronous>, transform_indices = @transform_2, window_bounds = array<i64: 1, 512>}, {pipeline_mode = #tpu.pipeline_mode<synchronous>, transform_indices = @transform_3, window_bounds = array<i64: 512, 256>}, {pipeline_mode = #tpu.pipeline_mode<synchronous>, transform_indices = @transform_4, window_bounds = array<i64: 1, 256>}, {pipeline_mode = #tpu.pipeline_mode<synchronous>, transform_indices = @transform_5, window_bounds = array<i64: 256, 128>}, {pipeline_mode = #tpu.pipeline_mode<synchronous>, transform_indices = @transform_6, window_bounds = array<i64: 1, 128>}, {pipeline_mode = #tpu.pipeline_mode<synchronous>, transform_indices = @transform_7, window_bounds = array<i64: 128, 64>}, {pipeline_mode = #tpu.pipeline_mode<synchronous>, transform_indices = @transform_8, window_bounds = array<i64: 1, 64>}, {pipeline_mode = #tpu.pipeline_mode<synchronous>, transform_indices = @transform_9, window_bounds = array<i64: 64, 32>}, {pipeline_mode = #tpu.pipeline_mode<synchronous>, transform_indices = @transform_10, window_bounds = array<i64: 1, 32>}, {pipeline_mode = #tpu.pipeline_mode<synchronous>, transform_indices = @transform_11, window_bounds = array<i64: 32, 3>}, {pipeline_mode = #tpu.pipeline_mode<synchronous>, transform_indices = @transform_12, window_bounds = array<i64: 1, 3>}, {transform_indices = @transform_13, window_bounds = array<i64: 512, 3>}]} {
    %c0 = arith.constant 0 : index
    %c0_0 = arith.constant 0 : index
    %0 = vector.load %arg1[%c0, %c0_0] : memref<512x50xf32, #tpu.memory_space<vmem>>, vector<512x50xf32>
    %1 = arith.truncf %0 : vector<512x50xf32> to vector<512x50xbf16>
    %c0_1 = arith.constant 0 : index
    %c0_2 = arith.constant 0 : index
    %2 = vector.load %arg2[%c0_1, %c0_2] : memref<50x512xbf16, #tpu.memory_space<vmem>>, vector<50x512xbf16>
    %cst = arith.constant dense<0.000000e+00> : vector<512x512xf32>
    %3 = tpu.matmul %1, %2, %cst {dimension_numbers = #tpu.dot_dimension_numbers<[1], [0], [0], [1], [0, 0, 1, 1], [], []>} : vector<512x50xbf16>, vector<50x512xbf16>, vector<512x512xf32> -> vector<512x512xf32>
    %c0_3 = arith.constant 0 : index
    %c0_4 = arith.constant 0 : index
    %4 = vector.load %arg3[%c0_3, %c0_4] : memref<1x512xf32, #tpu.memory_space<vmem>>, vector<1x512xf32>
    %5 = vector.broadcast %4 : vector<1x512xf32> to vector<512x512xf32>
    %6 = arith.addf %3, %5 : vector<512x512xf32>
    %cst_5 = arith.constant 0.000000e+00 : f32
    %7 = vector.broadcast %cst_5 : f32 to vector<512x512xf32>
    %8 = arith.maximumf %6, %7 : vector<512x512xf32>
    %9 = arith.truncf %8 : vector<512x512xf32> to vector<512x512xbf16>
    %c0_6 = arith.constant 0 : index
    %c0_7 = arith.constant 0 : index
    %10 = vector.load %arg4[%c0_6, %c0_7] : memref<512x256xbf16, #tpu.memory_space<vmem>>, vector<512x256xbf16>
    %cst_8 = arith.constant dense<0.000000e+00> : vector<512x256xf32>
    %11 = tpu.matmul %9, %10, %cst_8 {dimension_numbers = #tpu.dot_dimension_numbers<[1], [0], [0], [1], [0, 0, 1, 1], [], []>} : vector<512x512xbf16>, vector<512x256xbf16>, vector<512x256xf32> -> vector<512x256xf32>
    %c0_9 = arith.constant 0 : index
    %c0_10 = arith.constant 0 : index
    %12 = vector.load %arg5[%c0_9, %c0_10] : memref<1x256xf32, #tpu.memory_space<vmem>>, vector<1x256xf32>
    %13 = vector.broadcast %12 : vector<1x256xf32> to vector<512x256xf32>
    %14 = arith.addf %11, %13 : vector<512x256xf32>
    %cst_11 = arith.constant 0.000000e+00 : f32
    %15 = vector.broadcast %cst_11 : f32 to vector<512x256xf32>
    %16 = arith.maximumf %14, %15 : vector<512x256xf32>
    %17 = arith.truncf %16 : vector<512x256xf32> to vector<512x256xbf16>
    %c0_12 = arith.constant 0 : index
    %c0_13 = arith.constant 0 : index
    %18 = vector.load %arg6[%c0_12, %c0_13] : memref<256x128xbf16, #tpu.memory_space<vmem>>, vector<256x128xbf16>
    %cst_14 = arith.constant dense<0.000000e+00> : vector<512x128xf32>
    %19 = tpu.matmul %17, %18, %cst_14 {dimension_numbers = #tpu.dot_dimension_numbers<[1], [0], [0], [1], [0, 0, 1, 1], [], []>} : vector<512x256xbf16>, vector<256x128xbf16>, vector<512x128xf32> -> vector<512x128xf32>
    %c0_15 = arith.constant 0 : index
    %c0_16 = arith.constant 0 : index
    %20 = vector.load %arg7[%c0_15, %c0_16] : memref<1x128xf32, #tpu.memory_space<vmem>>, vector<1x128xf32>
    %21 = vector.broadcast %20 : vector<1x128xf32> to vector<512x128xf32>
    %22 = arith.addf %19, %21 : vector<512x128xf32>
    %cst_17 = arith.constant 0.000000e+00 : f32
    %23 = vector.broadcast %cst_17 : f32 to vector<512x128xf32>
    %24 = arith.maximumf %22, %23 : vector<512x128xf32>
    %25 = arith.truncf %24 : vector<512x128xf32> to vector<512x128xbf16>
    %c0_18 = arith.constant 0 : index
    %c0_19 = arith.constant 0 : index
    %26 = vector.load %arg8[%c0_18, %c0_19] : memref<128x64xbf16, #tpu.memory_space<vmem>>, vector<128x64xbf16>
    %cst_20 = arith.constant dense<0.000000e+00> : vector<512x64xf32>
    %27 = tpu.matmul %25, %26, %cst_20 {dimension_numbers = #tpu.dot_dimension_numbers<[1], [0], [0], [1], [0, 0, 1, 1], [], []>} : vector<512x128xbf16>, vector<128x64xbf16>, vector<512x64xf32> -> vector<512x64xf32>
    %c0_21 = arith.constant 0 : index
    %c0_22 = arith.constant 0 : index
    %28 = vector.load %arg9[%c0_21, %c0_22] : memref<1x64xf32, #tpu.memory_space<vmem>>, vector<1x64xf32>
    %29 = vector.broadcast %28 : vector<1x64xf32> to vector<512x64xf32>
    %30 = arith.addf %27, %29 : vector<512x64xf32>
    %cst_23 = arith.constant 0.000000e+00 : f32
    %31 = vector.broadcast %cst_23 : f32 to vector<512x64xf32>
    %32 = arith.maximumf %30, %31 : vector<512x64xf32>
    %33 = arith.truncf %32 : vector<512x64xf32> to vector<512x64xbf16>
    %c0_24 = arith.constant 0 : index
    %c0_25 = arith.constant 0 : index
    %34 = vector.load %arg10[%c0_24, %c0_25] : memref<64x32xbf16, #tpu.memory_space<vmem>>, vector<64x32xbf16>
    %cst_26 = arith.constant dense<0.000000e+00> : vector<512x32xf32>
    %35 = tpu.matmul %33, %34, %cst_26 {dimension_numbers = #tpu.dot_dimension_numbers<[1], [0], [0], [1], [0, 0, 1, 1], [], []>} : vector<512x64xbf16>, vector<64x32xbf16>, vector<512x32xf32> -> vector<512x32xf32>
    %c0_27 = arith.constant 0 : index
    %c0_28 = arith.constant 0 : index
    %36 = vector.load %arg11[%c0_27, %c0_28] : memref<1x32xf32, #tpu.memory_space<vmem>>, vector<1x32xf32>
    %37 = vector.broadcast %36 : vector<1x32xf32> to vector<512x32xf32>
    %38 = arith.addf %35, %37 : vector<512x32xf32>
    %cst_29 = arith.constant 0.000000e+00 : f32
    %39 = vector.broadcast %cst_29 : f32 to vector<512x32xf32>
    %40 = arith.maximumf %38, %39 : vector<512x32xf32>
    %41 = arith.truncf %40 : vector<512x32xf32> to vector<512x32xbf16>
    %c0_30 = arith.constant 0 : index
    %c0_31 = arith.constant 0 : index
    %42 = vector.load %arg12[%c0_30, %c0_31] : memref<32x3xbf16, #tpu.memory_space<vmem>>, vector<32x3xbf16>
    %cst_32 = arith.constant dense<0.000000e+00> : vector<512x3xf32>
    %43 = tpu.matmul %41, %42, %cst_32 {dimension_numbers = #tpu.dot_dimension_numbers<[1], [0], [0], [1], [0, 0, 1, 1], [], []>} : vector<512x32xbf16>, vector<32x3xbf16>, vector<512x3xf32> -> vector<512x3xf32>
    %c0_33 = arith.constant 0 : index
    %c0_34 = arith.constant 0 : index
    %44 = vector.load %arg13[%c0_33, %c0_34] : memref<1x3xf32, #tpu.memory_space<vmem>>, vector<1x3xf32>
    %45 = vector.broadcast %44 : vector<1x3xf32> to vector<512x3xf32>
    %46 = arith.addf %43, %45 : vector<512x3xf32>
    %c0_35 = arith.constant 0 : index
    %c0_36 = arith.constant 0 : index
    %47 = vector.load %arg14[%c0_35, %c0_36] : memref<512x3xf32, #tpu.memory_space<vmem>>, vector<512x3xf32>
    tpu.vector_store %arg14[%c0_35, %c0_36], %46 {strides = array<i32>} : memref<512x3xf32, #tpu.memory_space<vmem>>, vector<512x3xf32>,
    return
  }
  func.func @transform_0(%arg0: i32) -> (i32, i32) {
    %c0_i32 = arith.constant 0 : i32
    %c0_i32_0 = arith.constant 0 : i32
    return %arg0, %c0_i32 : i32, i32
  }
  func.func @transform_1(%arg0: i32) -> (i32, i32) {
    %c0_i32 = arith.constant 0 : i32
    %c0_i32_0 = arith.constant 0 : i32
    %c0_i32_1 = arith.constant 0 : i32
    return %c0_i32, %c0_i32_0 : i32, i32
  }
  func.func @transform_2(%arg0: i32) -> (i32, i32) {
    %c0_i32 = arith.constant 0 : i32
    %c0_i32_0 = arith.constant 0 : i32
    %c0_i32_1 = arith.constant 0 : i32
    return %c0_i32, %c0_i32_0 : i32, i32
  }
  func.func @transform_3(%arg0: i32) -> (i32, i32) {
    %c0_i32 = arith.constant 0 : i32
    %c0_i32_0 = arith.constant 0 : i32
    %c0_i32_1 = arith.constant 0 : i32
    return %c0_i32, %c0_i32_0 : i32, i32
  }
  func.func @transform_4(%arg0: i32) -> (i32, i32) {
    %c0_i32 = arith.constant 0 : i32
    %c0_i32_0 = arith.constant 0 : i32
    %c0_i32_1 = arith.constant 0 : i32
    return %c0_i32, %c0_i32_0 : i32, i32
  }
  func.func @transform_5(%arg0: i32) -> (i32, i32) {
    %c0_i32 = arith.constant 0 : i32
    %c0_i32_0 = arith.constant 0 : i32
    %c0_i32_1 = arith.constant 0 : i32
    return %c0_i32, %c0_i32_0 : i32, i32
  }
  func.func @transform_6(%arg0: i32) -> (i32, i32) {
    %c0_i32 = arith.constant 0 : i32
    %c0_i32_0 = arith.constant 0 : i32
    %c0_i32_1 = arith.constant 0 : i32
    return %c0_i32, %c0_i32_0 : i32, i32
  }
  func.func @transform_7(%arg0: i32) -> (i32, i32) {
    %c0_i32 = arith.constant 0 : i32
    %c0_i32_0 = arith.constant 0 : i32
    %c0_i32_1 = arith.constant 0 : i32
    return %c0_i32, %c0_i32_0 : i32, i32
  }
  func.func @transform_8(%arg0: i32) -> (i32, i32) {
    %c0_i32 = arith.constant 0 : i32
    %c0_i32_0 = arith.constant 0 : i32
    %c0_i32_1 = arith.constant 0 : i32
    return %c0_i32, %c0_i32_0 : i32, i32
  }
  func.func @transform_9(%arg0: i32) -> (i32, i32) {
    %c0_i32 = arith.constant 0 : i32
    %c0_i32_0 = arith.constant 0 : i32
    %c0_i32_1 = arith.constant 0 : i32
    return %c0_i32, %c0_i32_0 : i32, i32
  }
  func.func @transform_10(%arg0: i32) -> (i32, i32) {
    %c0_i32 = arith.constant 0 : i32
    %c0_i32_0 = arith.constant 0 : i32
    %c0_i32_1 = arith.constant 0 : i32
    return %c0_i32, %c0_i32_0 : i32, i32
  }
  func.func @transform_11(%arg0: i32) -> (i32, i32) {
    %c0_i32 = arith.constant 0 : i32
    %c0_i32_0 = arith.constant 0 : i32
    %c0_i32_1 = arith.constant 0 : i32
    return %c0_i32, %c0_i32_0 : i32, i32
  }
  func.func @transform_12(%arg0: i32) -> (i32, i32) {
    %c0_i32 = arith.constant 0 : i32
    %c0_i32_0 = arith.constant 0 : i32
    %c0_i32_1 = arith.constant 0 : i32
    return %c0_i32, %c0_i32_0 : i32, i32
  }
  func.func @transform_13(%arg0: i32) -> (i32, i32) {
    %c0_i32 = arith.constant 0 : i32
    %c0_i32_0 = arith.constant 0 : i32
    return %arg0, %c0_i32 : i32, i32
  }
}

</mosaic_0001>

<bundles_post_ra>
// kernel: _mlp_forward.1
= control target key start
LH: loop header
LB: loop body
LE: loop exit
PB: predicated region body
PF: predicated region fallthrough
CT: control target
= control target key end

     0   :  { %v5703_v1 = vmov 0   ;;  %vm344_vm0 = vcmask 1040384   ;;  %vm247_vm1 = vcmask 408576   ;;  %vm3756_vm2 = vcmask 523264   ;;  %s7831_s1 = inlined_call_operand.vmem [shape: bf16[50,512], index: 1, kind: input, shape index: {}]   ;;  %s7832_s3 = inlined_call_operand.vmem [shape: bf16[512,256], index: 3, kind: input, shape index: {}]   ;;  %s7833_s0 = inlined_call_operand.vmem [shape: f32[512,50], index: 0, kind: input, shape index: {}]   ;;  %s7834_s2 = inlined_call_operand.vmem [shape: f32[1,512], index: 2, kind: input, shape index: {}]   ;;  %s7835_s5 = inlined_call_operand.vmem [shape: bf16[256,128], index: 5, kind: input, shape index: {}]   ;;  %s7836_s7 = inlined_call_operand.vmem [shape: bf16[128,64], index: 7, kind: input, shape index: {}]   ;;  %s7837_s4 = inlined_call_operand.vmem [shape: f32[1,256], index: 4, kind: input, shape index: {}]   ;;  %s7838_s6 = inlined_call_operand.vmem [shape: f32[1,128], index: 6, kind: input, shape index: {}]   ;;  %s7839_s9 = inlined_call_operand.vmem [shape: bf16[64,32], index: 9, kind: input, shape index: {}]   ;;  %s7840_s11 = inlined_call_operand.vmem [shape: bf16[32,3], index: 11, kind: input, shape index: {}]   ;;  %s7841_s8 = inlined_call_operand.vmem [shape: f32[1,64], index: 8, kind: input, shape index: {}]   ;;  %s7842_s10 = inlined_call_operand.vmem [shape: f32[1,32], index: 10, kind: input, shape index: {}]   ;;  %s7843_s12 = inlined_call_operand.vmem [shape: f32[1,3], index: 12, kind: input, shape index: {}]   ;;  %s7844_s13 = inlined_call_operand.vmem [shape: f32[512,3], index: 13, kind: output, shape index: {}]  }
   0x1   :  { %v5555_v0 = vld [vmem:[%s7831_s1 + $0x4] ss:$16 sps:$4 sm:$0xff]   ;;  %389 = vmatprep.mubr.bf16.mxu0 %v5703_v1  ;;  %629 = vmatprep.mubr.bf16.mxu1 %v5703_v1  ;;  %v5557_v2 = vld [vmem:[%s7831_s1] ss:$16 sps:$4 sm:$0xff]   ;;  %v46_v11 = vld [vmem:[%s7833_s0 + $0x8] sm:$0xff]  ;;  %vm4261_vm3 = vcmask 261120  }
   0x2   :  { %357 = vmatprep.subr.bf16.mxu0 %v5555_v0  ;;  %v5558_v3 = vld [vmem:[%s7831_s1 + $0x24] ss:$16 sps:$4 sm:$0xff]   ;;  %5290 = vmatprep.subr.bf16.mxu1 %v5555_v0  ;;  %v5560_v4 = vld [vmem:[%s7831_s1 + $0x20] ss:$16 sps:$4 sm:$0xff]   ;;  %v48_v18 = vld [vmem:[%s7833_s0 + $0x18] sm:$0xff]  ;;  %vm4647_vm4 = vcmask 23552  }
   0x3   :  { %358 = vmatpush1.bf16.msra.mxu0 %v5557_v2  ;;  %5294 = vmatpush1.bf16.msra.mxu1 %v5557_v2  ;;  %v5561_v5 = vld [vmem:[%s7831_s1 + $0x44] ss:$16 sps:$4 sm:$0xff]   ;;  %v5563_v7 = vld [vmem:[%s7831_s1 + $0x40] ss:$16 sps:$4 sm:$0xff]   ;;  %v50_v25 = vld [vmem:[%s7833_s0 + $0x28] sm:$0xff] }
   0x4   :  { %359 = vmatprep.subr.bf16.mxu0 %v5558_v3  ;;  %5291 = vmatprep.subr.bf16.mxu1 %v5558_v3  ;;  %v153_v6 = vld [vmem:[%s7831_s1 + $0x60] sm:$0x11]  ;;  %v5571_v16 = vld [vmem:[%s7832_s3 + $0x14] ss:$8 sps:$4 sm:$0xff]   ;;  %v5569_v19 = vld [vmem:[%s7832_s3 + $0x10] ss:$8 sps:$4 sm:$0xff]  }
   0x5   :  { %v4729_v8 = vcombine.high %v153_v6, %v153_v6  ;;  %v4728_v9 = vcombine.low %v153_v6, %v153_v6  ;;  %v45_v10 = vld [vmem:[%s7833_s0] sm:$0xff]  ;;  %v47_v17 = vld [vmem:[%s7833_s0 + $0x10] sm:$0xff]  ;;  %v52_v32 = vld [vmem:[%s7833_s0 + $0x38] sm:$0xff] }
   0x6   :  { %v5568_v13 = vld [vmem:[%s7832_s3 + $0x4] ss:$8 sps:$4 sm:$0xff]   ;;  %v5809_v14 = vpack.c.bf16 %v46_v11, %v45_v10  ;;  %v5566_v15 = vld [vmem:[%s7832_s3] ss:$8 sps:$4 sm:$0xff]   ;;  %v5832_v21 = vpack.c.bf16 %v48_v18, %v47_v17  ;;  %v5577_v23 = vld [vmem:[%s7832_s3 + $0x34] ss:$8 sps:$4 sm:$0xff]  }
   0x7   :  { %360 = vmatpush1.bf16.msra.mxu0 %v5560_v4  ;;  %5295 = vmatpush1.bf16.msra.mxu1 %v5560_v4  ;;  %v346_v12 = vsel %vm344_vm0, %v4728_v9, 0  ;;  %v5574_v20 = vld [vmem:[%s7832_s3 + $0x24] ss:$8 sps:$4 sm:$0xff]   ;;  %v5572_v22 = vld [vmem:[%s7832_s3 + $0x20] ss:$8 sps:$4 sm:$0xff]   ;;  %v51_v31 = vld [vmem:[%s7833_s0 + $0x30] sm:$0xff] }
   0x8   :  { %361 = vmatprep.subr.bf16.mxu0 %v5561_v5  ;;  %5292 = vmatprep.subr.bf16.mxu1 %v5561_v5  ;;  %v49_v24 = vld [vmem:[%s7833_s0 + $0x20] sm:$0xff]  ;;  %v5575_v26 = vld [vmem:[%s7832_s3 + $0x30] ss:$8 sps:$4 sm:$0xff]   ;;  %v5583_v30 = vld [vmem:[%s7832_s3 + $0x54] ss:$8 sps:$4 sm:$0xff]   ;;  %v5881_v36 = vpack.c.bf16 %v52_v32, %v51_v31 }
   0x9   :  { %v5580_v27 = vld [vmem:[%s7832_s3 + $0x44] ss:$8 sps:$4 sm:$0xff]   ;;  %v5578_v28 = vld [vmem:[%s7832_s3 + $0x40] ss:$8 sps:$4 sm:$0xff]   ;;  %v5858_v29 = vpack.c.bf16 %v50_v25, %v49_v24  ;;  %v5581_v33 = vld [vmem:[%s7832_s3 + $0x50] ss:$8 sps:$4 sm:$0xff]  }
   0xa   :  { %v5586_v34 = vld [vmem:[%s7832_s3 + $0x64] ss:$8 sps:$4 sm:$0xff]   ;;  %v5584_v35 = vld [vmem:[%s7832_s3 + $0x60] ss:$8 sps:$4 sm:$0xff]   ;;  %v5589_v37 = vld [vmem:[%s7832_s3 + $0x74] ss:$8 sps:$4 sm:$0xff]  }
   0xb   :  { %362 = vmatpush1.bf16.msra.mxu0 %v5563_v7  ;;  %5296 = vmatpush1.bf16.msra.mxu1 %v5563_v7  ;;  %v53_v38 = vld [vmem:[%s7833_s0 + $0x40] sm:$0xff]  ;;  %v54_v39 = vld [vmem:[%s7833_s0 + $0x48] sm:$0xff]  ;;  %v5587_v40 = vld [vmem:[%s7832_s3 + $0x70] ss:$8 sps:$4 sm:$0xff]  }
   0xc   :  { %4732 = vmatprep.subr.msk.bf16.mxu0 %vm344_vm0, %v4729_v8  ;;  %5293 = vmatprep.subr.msk.bf16.mxu1 %vm344_vm0, %v4729_v8  ;;  %v5592_v41 = vld [vmem:[%s7832_s3 + $0x84] ss:$8 sps:$4 sm:$0xff]   ;;  %v5590_v42 = vld [vmem:[%s7832_s3 + $0x80] ss:$8 sps:$4 sm:$0xff]   ;;  %v5904_v43 = vpack.c.bf16 %v54_v39, %v53_v38  ;;  %v5595_v44 = vld [vmem:[%s7832_s3 + $0x94] ss:$8 sps:$4 sm:$0xff]  }
   0xd   :  { %v55_v45 = vld [vmem:[%s7833_s0 + $0x50] sm:$0xff]  ;;  %v56_v46 = vld [vmem:[%s7833_s0 + $0x58] sm:$0xff]  ;;  %v5598_v48 = vld [vmem:[%s7832_s3 + $0xa4] ss:$8 sps:$4 sm:$0xff]  }
   0xe   :  { %v5593_v47 = vld [vmem:[%s7832_s3 + $0x90] ss:$8 sps:$4 sm:$0xff]   ;;  %v5924_v49 = vpack.c.bf16 %v56_v46, %v55_v45  ;;  %v5596_v50 = vld [vmem:[%s7832_s3 + $0xa0] ss:$8 sps:$4 sm:$0xff]   ;;  %v5601_v51 = vld [vmem:[%s7832_s3 + $0xb4] ss:$8 sps:$4 sm:$0xff]  }
   0xf   :  { %364 = vmatpush1.bf16.msra.mxu0 %v346_v12  ;;  %5297 = vmatpush1.bf16.msra.mxu1 %v346_v12  ;;  %v57_v52 = vld [vmem:[%s7833_s0 + $0x60] sm:$0xff]  ;;  %v58_v53 = vld [vmem:[%s7833_s0 + $0x68] sm:$0xff]  ;;  %v5599_v54 = vld [vmem:[%s7832_s3 + $0xb0] ss:$8 sps:$4 sm:$0xff]  }
  0x10   :  { %1843 = vmatprep.subr.bf16.mxu0 %v5568_v13  ;;  %v5604_v55 = vld [vmem:[%s7832_s3 + $0xc4] ss:$8 sps:$4 sm:$0xff]   ;;  %v5947_v56 = vpack.c.bf16 %v58_v53, %v57_v52  ;;  %v5602_v57 = vld [vmem:[%s7832_s3 + $0xc0] ss:$8 sps:$4 sm:$0xff]   ;;  %v59_v58 = vld [vmem:[%s7833_s0 + $0x70] sm:$0xff] }
  0x11   :  { %v60_v59 = vld [vmem:[%s7833_s0 + $0x78] sm:$0xff]  ;;  %v61_v61 = vld [vmem:[%s7833_s0 + $0x80] sm:$0xff]  ;;  %v62_v62 = vld [vmem:[%s7833_s0 + $0x88] sm:$0xff] }
  0x12   :  { %4733 = vmatmul.mubr.msk.bf16.vlgmr.msra.gmra.mrb[0].mxu0 %vm247_vm1, %v5809_v14  ;;  %v5961_v60 = vpack.c.bf16 %v60_v59, %v59_v58  ;;  %v5605_v63 = vld [vmem:[%s7832_s3 + $0xd0] ss:$8 sps:$4 sm:$0xff]   ;;  %v5607_v0 = vld [vmem:[%s7832_s3 + $0xd4] ss:$8 sps:$4 sm:$0xff]   ;;  %v93_v2 = vld [vmem:[%s7833_s0 + $0x180] sm:$0xff]  ;;  %v5998_v9 = vpack.c.bf16 %v62_v62, %v61_v61 }
  0x13   :  { %399 = vmatprep.mubr.bf16.mxu0 %v5703_v1  ;;  %1844 = vmatpush1.bf16.msra.mxu0 %v5566_v15  ;;  %v94_v3 = vld [vmem:[%s7833_s0 + $0x188] sm:$0xff]  ;;  %v95_v10 = vld [vmem:[%s7833_s0 + $0x190] sm:$0xff]  ;;  %v96_v12 = vld [vmem:[%s7833_s0 + $0x198] sm:$0xff] }
  0x14   :  { %1845 = vmatprep.subr.bf16.mxu0 %v5571_v16  ;;  %v5608_v4 = vld [vmem:[%s7831_s1 + $0x8] ss:$16 sps:$4 sm:$0xff]   ;;  %v5610_v5 = vld [vmem:[%s7831_s1 + $0xc] ss:$16 sps:$4 sm:$0xff]   ;;  %v5990_v6 = vpack.c.bf16 %v94_v3, %v93_v2  ;;  %v6023_v17 = vpack.c.bf16 %v96_v12, %v95_v10  ;;  %v63_v18 = vld [vmem:[%s7833_s0 + $0x90] sm:$0xff] }
  0x15   :  { %710 = vmatprep.subr.bf16.mxu1 %v5610_v5  ;;  %v5611_v7 = vld [vmem:[%s7832_s3 + $0xe0] ss:$8 sps:$4 sm:$0xff]   ;;  %v5613_v8 = vld [vmem:[%s7832_s3 + $0xe4] ss:$8 sps:$4 sm:$0xff]   ;;  %v5619_v15 = vld [vmem:[%s7832_s3 + $0xf4] ss:$8 sps:$4 sm:$0xff]  }
  0x16   :  { %4757 = vmatmul.mubr.msk.bf16.vlgmr.msra.gmra.mrb[0].mxu1 %vm247_vm1, %v5990_v6  ;;  %v5616_v11 = vld [vmem:[%s7831_s1 + $0x2c] ss:$16 sps:$4 sm:$0xff]   ;;  %v5614_v13 = vld [vmem:[%s7831_s1 + $0x28] ss:$16 sps:$4 sm:$0xff]   ;;  %v65_v25 = vld [vmem:[%s7833_s0 + $0xa0] sm:$0xff] }
  0x17   :  { %1846 = vmatpush1.bf16.msra.mxu0 %v5569_v19  ;;  %711 = vmatpush1.bf16.msra.mxu1 %v5608_v4  ;;  %v5617_v16 = vld [vmem:[%s7832_s3 + $0xf0] ss:$8 sps:$4 sm:$0xff]   ;;  %v101_v38 = vld [vmem:[%s7833_s0 + $0x1c0] sm:$0xff]  ;;  %v102_v39 = vld [vmem:[%s7833_s0 + $0x1c8] sm:$0xff] }
  0x18   :  { %1847 = vmatprep.subr.bf16.mxu0 %v5574_v20  ;;  %639 = vmatprep.mubr.bf16.mxu1 %v5703_v1  ;;  %v64_v19 = vld [vmem:[%s7833_s0 + $0x98] sm:$0xff]  ;;  %v99_v31 = vld [vmem:[%s7833_s0 + $0x1b0] sm:$0xff]  ;;  %v73_v53 = vld [vmem:[%s7833_s0 + $0xe0] sm:$0xff] }
  0x19   :  { %712 = vmatprep.subr.bf16.mxu1 %v5616_v11  ;;  %v6032_v20 = vpack.c.bf16 %v64_v19, %v63_v18  ;;  %v100_v32 = vld [vmem:[%s7833_s0 + $0x1b8] sm:$0xff]  ;;  %v75_v61 = vld [vmem:[%s7833_s0 + $0xf0] sm:$0xff]  ;;  %v77_v10 = vld [vmem:[%s7833_s0 + $0x100] sm:$0xff] }
  0x1a   :  { %4734 = vmatmul.mubr.msk.bf16.gmra.mrb[4].mxu0 %vm247_vm1, %v5832_v21  ;;  %v72_v45 = vld [vmem:[%s7833_s0 + $0xd8] sm:$0xff]  ;;  %v107_v3 = vld [vmem:[%s7833_s0 + $0x1f0] sm:$0xff]  ;;  %v78_v11 = vld [vmem:[%s7833_s0 + $0x108] sm:$0xff] }
  0x1b   :  { %409 = vmatprep.mubr.bf16.mxu0 %v5703_v1  ;;  %1848 = vmatpush1.bf16.msra.mxu0 %v5572_v22  ;;  %v97_v22 = vld [vmem:[%s7833_s0 + $0x1a0] sm:$0xff]  ;;  %v5623_v46 = vld [vmem:[%s7831_s1 + $0x48] ss:$16 sps:$4 sm:$0xff]   ;;  %v6193_v12 = vpack.c.bf16 %v78_v11, %v77_v10 }
  0x1c   :  { %1849 = vmatprep.subr.bf16.mxu0 %v5577_v23  ;;  %713 = vmatpush1.bf16.msra.mxu1 %v5614_v13  ;;  %v98_v23 = vld [vmem:[%s7833_s0 + $0x1a8] sm:$0xff]  ;;  %v76_v62 = vld [vmem:[%s7833_s0 + $0xf8] sm:$0xff]  ;;  %v79_v13 = vld [vmem:[%s7833_s0 + $0x110] sm:$0xff] }
  0x1d   :  { %v6045_v24 = vpack.c.bf16 %v98_v23, %v97_v22  ;;  %v108_v4 = vld [vmem:[%s7833_s0 + $0x1f8] sm:$0xff]  ;;  %v82_v18 = vld [vmem:[%s7833_s0 + $0x128] sm:$0xff] }
  0x1e   :  { %4758 = vmatmul.mubr.msk.bf16.gmra.mrb[4].mxu1 %vm247_vm1, %v6023_v17  ;;  %v6174_v5 = vpack.c.bf16 %v108_v4, %v107_v3  ;;  %v84_v22 = vld [vmem:[%s7833_s0 + $0x138] sm:$0xff] }
  0x1f   :  { %1850 = vmatpush1.bf16.msra.mxu0 %v5575_v26  ;;  %649 = vmatprep.mubr.bf16.mxu1 %v5703_v1  ;;  %v66_v26 = vld [vmem:[%s7833_s0 + $0xa8] sm:$0xff] }
  0x20   :  { %1851 = vmatprep.subr.bf16.mxu0 %v5580_v27  ;;  %v6054_v27 = vpack.c.bf16 %v66_v26, %v65_v25  ;;  %v86_v25 = vld [vmem:[%s7833_s0 + $0x148] sm:$0xff] }
  0x22   :  { %4735 = vmatmul.mubr.msk.bf16.gmra.mrb[8].mxu0 %vm247_vm1, %v5858_v29 }
  0x23   :  { %419 = vmatprep.mubr.bf16.mxu0 %v5703_v1  ;;  %1852 = vmatpush1.bf16.msra.mxu0 %v5578_v28  ;;  %v67_v28 = vld [vmem:[%s7833_s0 + $0xb0] sm:$0xff] }
  0x24   :  { %1853 = vmatprep.subr.bf16.mxu0 %v5583_v30  ;;  %v68_v30 = vld [vmem:[%s7833_s0 + $0xb8] sm:$0xff] }
  0x26   :  { %4759 = vmatmul.mubr.msk.bf16.gmra.mrb[8].mxu1 %vm247_vm1, %v6045_v24 }
  0x27   :  { %1854 = vmatpush1.bf16.msra.mxu0 %v5581_v33  ;;  %659 = vmatprep.mubr.bf16.mxu1 %v5703_v1  ;;  %v6074_v33 = vpack.c.bf16 %v100_v32, %v99_v31  ;;  %v90_v31 = vld [vmem:[%s7833_s0 + $0x168] sm:$0xff] }
  0x28   :  { %1855 = vmatprep.subr.bf16.mxu0 %v5586_v34  ;;  %v6076_v34 = vpack.c.bf16 %v68_v30, %v67_v28  ;;  %v88_v28 = vld [vmem:[%s7833_s0 + $0x158] sm:$0xff] }
  0x2a   :  { %4736 = vmatmul.mubr.msk.bf16.gmra.mrb[12].mxu0 %vm247_vm1, %v5881_v36 }
  0x2b   :  { %429 = vmatprep.mubr.bf16.mxu0 %v5703_v1  ;;  %1856 = vmatpush1.bf16.msra.mxu0 %v5584_v35  ;;  %v69_v35 = vld [vmem:[%s7833_s0 + $0xc0] sm:$0xff] }
  0x2c   :  { %1857 = vmatprep.subr.bf16.mxu0 %v5589_v37  ;;  %v70_v37 = vld [vmem:[%s7833_s0 + $0xc8] sm:$0xff] }
  0x2e   :  { %4760 = vmatmul.mubr.msk.bf16.gmra.mrb[12].mxu1 %vm247_vm1, %v6074_v33 }
  0x2f   :  { %1858 = vmatpush1.bf16.msra.mxu0 %v5587_v40  ;;  %669 = vmatprep.mubr.bf16.mxu1 %v5703_v1  ;;  %v6096_v40 = vpack.c.bf16 %v102_v39, %v101_v38  ;;  %v6310_v39 = vld [vmem:[%s7834_s2] sm:$0xf] }
  0x30   :  { %1859 = vmatprep.subr.bf16.mxu0 %v5592_v41  ;;  %v6098_v41 = vpack.c.bf16 %v70_v37, %v69_v35  ;;  %v92_v35 = vld [vmem:[%s7833_s0 + $0x178] sm:$0xff] }
  0x32   :  { %4737 = vmatmul.mubr.msk.bf16.gmra.mrb[16].mxu0 %vm247_vm1, %v5904_v43 }
  0x33   :  { %439 = vmatprep.mubr.bf16.mxu0 %v5703_v1  ;;  %1860 = vmatpush1.bf16.msra.mxu0 %v5590_v42  ;;  %v71_v42 = vld [vmem:[%s7833_s0 + $0xd0] sm:$0xff] }
  0x34   :  { %1861 = vmatprep.subr.bf16.mxu0 %v5595_v44  ;;  %v5622_v44 = vld [vmem:[%s7832_s3 + $0x104] ss:$8 sps:$4 sm:$0xff]   ;;  %v6129_v52 = vpack.c.bf16 %v72_v45, %v71_v42 }
  0x36   :  { %4761 = vmatmul.mubr.msk.bf16.gmra.mrb[16].mxu1 %vm247_vm1, %v6096_v40 }
  0x37   :  { %1862 = vmatpush1.bf16.msra.mxu0 %v5593_v47  ;;  %679 = vmatprep.mubr.bf16.mxu1 %v5703_v1  ;;  %v5625_v47 = vld [vmem:[%s7831_s1 + $0x4c] ss:$16 sps:$4 sm:$0xff]  }
  0x38   :  { %1863 = vmatprep.subr.bf16.mxu0 %v5598_v48  ;;  %v103_v48 = vld [vmem:[%s7833_s0 + $0x1d0] sm:$0xff]  ;;  %714 = vmatprep.subr.bf16.mxu1 %v5625_v47 }
  0x39   :  { %715 = vmatpush1.bf16.msra.mxu1 %v5623_v46 }
  0x3a   :  { %4738 = vmatmul.mubr.msk.bf16.gmra.mrb[20].mxu0 %vm247_vm1, %v5924_v49 }
  0x3b   :  { %449 = vmatprep.mubr.bf16.mxu0 %v5703_v1  ;;  %1864 = vmatpush1.bf16.msra.mxu0 %v5596_v50  ;;  %v104_v50 = vld [vmem:[%s7833_s0 + $0x1d8] sm:$0xff] }
  0x3c   :  { %1865 = vmatprep.subr.bf16.mxu0 %v5601_v51  ;;  %v6127_v51 = vpack.c.bf16 %v104_v50, %v103_v48 }
  0x3e   :  { %4762 = vmatmul.mubr.msk.bf16.gmra.mrb[20].mxu1 %vm247_vm1, %v6127_v51 }
  0x3f   :  { %1866 = vmatpush1.bf16.msra.mxu0 %v5599_v54  ;;  %689 = vmatprep.mubr.bf16.mxu1 %v5703_v1  ;;  %v74_v54 = vld [vmem:[%s7833_s0 + $0xe8] sm:$0xff] }
  0x40   :  { %1867 = vmatprep.subr.bf16.mxu0 %v5604_v55  ;;  %v105_v55 = vld [vmem:[%s7833_s0 + $0x1e0] sm:$0xff]  ;;  %v6151_v59 = vpack.c.bf16 %v74_v54, %v73_v53 }
  0x42   :  { %4739 = vmatmul.mubr.msk.bf16.gmra.mrb[24].mxu0 %vm247_vm1, %v5947_v56 }
  0x43   :  { %459 = vmatprep.mubr.bf16.mxu0 %v5703_v1  ;;  %1868 = vmatpush1.bf16.msra.mxu0 %v5602_v57  ;;  %v106_v57 = vld [vmem:[%s7833_s0 + $0x1e8] sm:$0xff] }
  0x44   :  { %1869 = vmatprep.subr.bf16.mxu0 %v5607_v0  ;;  %v6149_v58 = vpack.c.bf16 %v106_v57, %v105_v55 }
  0x46   :  { %4763 = vmatmul.mubr.msk.bf16.gmra.mrb[24].mxu1 %vm247_vm1, %v6149_v58 }
  0x47   :  { %1870 = vmatpush1.bf16.msra.mxu0 %v5605_v63  ;;  %699 = vmatprep.mubr.bf16.mxu1 %v5703_v1  ;;  %v154_v63 = vld [vmem:[%s7831_s1 + $0x68] sm:$0x11] }
  0x48   :  { %1871 = vmatprep.subr.bf16.mxu0 %v5613_v8  ;;  %v4731_v0 = vcombine.high %v154_v63, %v154_v63  ;;  %v4730_v2 = vcombine.low %v154_v63, %v154_v63 }
  0x4a   :  { %4740 = vmatmul.mubr.msk.bf16.gmra.mrb[28].mxu0 %vm247_vm1, %v5961_v60  ;;  %4765 = vmatprep.subr.msk.bf16.mxu1 %vm344_vm0, %v4731_v0  ;;  %v352_v8 = vsel %vm344_vm0, %v4730_v2, 0  ;;  %v5620_v2 = vld [vmem:[%s7832_s3 + $0x100] ss:$8 sps:$4 sm:$0xff]  }
  0x4b   :  { %469 = vmatprep.mubr.bf16.mxu0 %v5703_v1  ;;  %1872 = vmatpush1.bf16.msra.mxu0 %v5611_v7  ;;  %v6176_v7 = vpack.c.bf16 %v76_v62, %v75_v61 }
  0x4c   :  { %1873 = vmatprep.subr.bf16.mxu0 %v5619_v15  ;;  %717 = vmatpush1.bf16.msra.mxu1 %v352_v8  ;;  %v80_v15 = vld [vmem:[%s7833_s0 + $0x118] sm:$0xff] }
  0x4d   :  { %2876 = vmatprep.subr.bf16.mxu1 %v5703_v1 }
  0x4e   :  { %4764 = vmatmul.mubr.msk.bf16.gmra.mrb[28].mxu1 %vm247_vm1, %v6174_v5 }
  0x4f   :  { %1874 = vmatpush1.bf16.msra.mxu0 %v5617_v16  ;;  %742 = vmatprep.mubr.bf16.mxu1 %v5703_v1  ;;  %v6207_v16 = vpack.c.bf16 %v80_v15, %v79_v13 }
  0x50   :  { %2196 = vmatprep.subr.bf16.mxu0 %v5622_v44 }
  0x52   :  { %4741 = vmatmul.mubr.msk.bf16.gmra.mrb[32].mxu0 %vm247_vm1, %v5998_v9 }
  0x53   :  { %479 = vmatprep.mubr.bf16.mxu0 %v5703_v1 }
  0x56   :  { %4766 = vmatmul.mubr.msk.bf16.vlgmr.msra.gmra.mrb[32].mxu1 %vm247_vm1, %v5809_v14  ;;  %v81_v14 = vld [vmem:[%s7833_s0 + $0x120] sm:$0xff] }
  0x57   :  { %752 = vmatprep.mubr.bf16.mxu1 %v5703_v1  ;;  %v6221_v19 = vpack.c.bf16 %v82_v18, %v81_v14  ;;  %v5626_v14 = vld [vmem:[%s7832_s3 + $0x110] ss:$8 sps:$4 sm:$0xff]  }
  0x5a   :  { %4742 = vmatmul.mubr.msk.bf16.gmra.mrb[36].mxu0 %vm247_vm1, %v6032_v20 }
  0x5b   :  { %489 = vmatprep.mubr.bf16.mxu0 %v5703_v1 }
  0x5e   :  { %4767 = vmatmul.mubr.msk.bf16.gmra.mrb[36].mxu1 %vm247_vm1, %v5832_v21  ;;  %v83_v21 = vld [vmem:[%s7833_s0 + $0x130] sm:$0xff] }
  0x5f   :  { %762 = vmatprep.mubr.bf16.mxu1 %v5703_v1  ;;  %v6235_v23 = vpack.c.bf16 %v84_v22, %v83_v21  ;;  %v5633_v22 = vld [vmem:[%s7832_s3 + $0x124] ss:$8 sps:$4 sm:$0xff]  }
  0x62   :  { %4743 = vmatmul.mubr.msk.bf16.gmra.mrb[40].mxu0 %vm247_vm1, %v6054_v27 }
  0x63   :  { %499 = vmatprep.mubr.bf16.mxu0 %v5703_v1 }
  0x66   :  { %4768 = vmatmul.mubr.msk.bf16.gmra.mrb[40].mxu1 %vm247_vm1, %v5858_v29  ;;  %v85_v29 = vld [vmem:[%s7833_s0 + $0x140] sm:$0xff] }
  0x67   :  { %772 = vmatprep.mubr.bf16.mxu1 %v5703_v1  ;;  %v6249_v26 = vpack.c.bf16 %v86_v25, %v85_v29 }
  0x6a   :  { %4744 = vmatmul.mubr.msk.bf16.gmra.mrb[44].mxu0 %vm247_vm1, %v6076_v34 }
  0x6b   :  { %509 = vmatprep.mubr.bf16.mxu0 %v5703_v1 }
  0x6e   :  { %4769 = vmatmul.mubr.msk.bf16.gmra.mrb[44].mxu1 %vm247_vm1, %v5881_v36  ;;  %v87_v36 = vld [vmem:[%s7833_s0 + $0x150] sm:$0xff] }
  0x6f   :  { %782 = vmatprep.mubr.bf16.mxu1 %v5703_v1  ;;  %v6263_v30 = vpack.c.bf16 %v88_v28, %v87_v36 }
  0x72   :  { %4745 = vmatmul.mubr.msk.bf16.gmra.mrb[48].mxu0 %vm247_vm1, %v6098_v41 }
  0x73   :  { %519 = vmatprep.mubr.bf16.mxu0 %v5703_v1 }
  0x76   :  { %4770 = vmatmul.mubr.msk.bf16.gmra.mrb[48].mxu1 %vm247_vm1, %v5904_v43  ;;  %v89_v43 = vld [vmem:[%s7833_s0 + $0x160] sm:$0xff] }
  0x77   :  { %792 = vmatprep.mubr.bf16.mxu1 %v5703_v1  ;;  %v6277_v32 = vpack.c.bf16 %v90_v31, %v89_v43  ;;  %v5631_v43 = vld [vmem:[%s7832_s3 + $0x120] ss:$8 sps:$4 sm:$0xff]  }
  0x7a   :  { %4746 = vmatmul.mubr.msk.bf16.gmra.mrb[52].mxu0 %vm247_vm1, %v6129_v52 }
  0x7b   :  { %529 = vmatprep.mubr.bf16.mxu0 %v5703_v1 }
  0x7e   :  { %4771 = vmatmul.mubr.msk.bf16.gmra.mrb[52].mxu1 %vm247_vm1, %v5924_v49  ;;  %v91_v49 = vld [vmem:[%s7833_s0 + $0x170] sm:$0xff] }
  0x7f   :  { %802 = vmatprep.mubr.bf16.mxu1 %v5703_v1  ;;  %v6291_v37 = vpack.c.bf16 %v92_v35, %v91_v49  ;;  %v5636_v35 = vld [vmem:[%s7832_s3 + $0x134] ss:$8 sps:$4 sm:$0xff]  }
  0x82   :  { %4747 = vmatmul.mubr.msk.bf16.gmra.mrb[56].mxu0 %vm247_vm1, %v6151_v59 }
  0x83   :  { %539 = vmatprep.mubr.bf16.mxu0 %v5703_v1 }
  0x86   :  { %4772 = vmatmul.mubr.msk.bf16.gmra.mrb[56].mxu1 %vm247_vm1, %v5947_v56  ;;  %v157_v56 = vlaneseq }
  0x87   :  { %812 = vmatprep.mubr.bf16.mxu1 %v5703_v1 }
  0x88   :  { %v6304_v38 = vshrl.u32 %v157_v56, 7 }
  0x8a   :  { %4748 = vmatmul.mubr.msk.bf16.gmra.mrb[60].mxu0 %vm247_vm1, %v6176_v7  ;;  %v163_v42 = vsub.s32 1, %v6304_v38 }
  0x8b   :  { %549 = vmatprep.mubr.bf16.mxu0 %v5703_v1 }
  0x8e   :  { %4773 = vmatmul.mubr.msk.bf16.gmra.mrb[60].mxu1 %vm247_vm1, %v5961_v60  ;;  %v159_v60 = vsub.s32 0, %v6304_v38 }
  0x8f   :  { %822 = vmatprep.mubr.bf16.mxu1 %v5703_v1 }
  0x92   :  { %4749 = vmatmul.mubr.msk.bf16.gmra.mrb[64].mxu0 %vm247_vm1, %v6193_v12 }
  0x93   :  { %559 = vmatprep.mubr.bf16.mxu0 %v5703_v1 }
  0x96   :  { %4774 = vmatmul.mubr.msk.bf16.gmra.mrb[64].mxu1 %vm247_vm1, %v5998_v9  ;;  %v6319_v9 = vrot.slane %v6310_v39, %v159_v60 }
  0x97   :  { %832 = vmatprep.mubr.bf16.mxu1 %v5703_v1 }
  0x9a   :  { %4750 = vmatmul.mubr.msk.bf16.gmra.mrb[68].mxu0 %vm247_vm1, %v6207_v16 }
  0x9b   :  { %569 = vmatprep.mubr.bf16.mxu0 %v5703_v1 }
  0x9e   :  { %4775 = vmatmul.mubr.msk.bf16.gmra.mrb[68].mxu1 %vm247_vm1, %v6032_v20  ;;  %v6324_v20 = vrot.slane %v6310_v39, %v163_v42 }
  0x9f   :  { %842 = vmatprep.mubr.bf16.mxu1 %v5703_v1 }
  0xa2   :  { %4751 = vmatmul.mubr.msk.bf16.gmra.mrb[72].mxu0 %vm247_vm1, %v6221_v19 }
  0xa3   :  { %579 = vmatprep.mubr.bf16.mxu0 %v5703_v1 }
  0xa6   :  { %4776 = vmatmul.mubr.msk.bf16.gmra.mrb[72].mxu1 %vm247_vm1, %v6054_v27 }
  0xa7   :  { %852 = vmatprep.mubr.bf16.mxu1 %v5703_v1 }
  0xaa   :  { %4752 = vmatmul.mubr.msk.bf16.gmra.mrb[76].mxu0 %vm247_vm1, %v6235_v23 }
  0xab   :  { %589 = vmatprep.mubr.bf16.mxu0 %v5703_v1 }
  0xae   :  { %4777 = vmatmul.mubr.msk.bf16.gmra.mrb[76].mxu1 %vm247_vm1, %v6076_v34  ;;  %v5628_v34 = vld [vmem:[%s7832_s3 + $0x114] ss:$8 sps:$4 sm:$0xff]  }
  0xaf   :  { %862 = vmatprep.mubr.bf16.mxu1 %v5703_v1 }
  0xb2   :  { %4753 = vmatmul.mubr.msk.bf16.gmra.mrb[80].mxu0 %vm247_vm1, %v6249_v26 }
  0xb3   :  { %599 = vmatprep.mubr.bf16.mxu0 %v5703_v1 }
  0xb6   :  { %4778 = vmatmul.mubr.msk.bf16.gmra.mrb[80].mxu1 %vm247_vm1, %v6098_v41 }
  0xb7   :  { %872 = vmatprep.mubr.bf16.mxu1 %v5703_v1 }
  0xba   :  { %4754 = vmatmul.mubr.msk.bf16.gmra.mrb[84].mxu0 %vm247_vm1, %v6263_v30 }
  0xbb   :  { %609 = vmatprep.mubr.bf16.mxu0 %v5703_v1 }
  0xbe   :  { %4779 = vmatmul.mubr.msk.bf16.gmra.mrb[84].mxu1 %vm247_vm1, %v6129_v52 }
  0xbf   :  { %882 = vmatprep.mubr.bf16.mxu1 %v5703_v1 }
  0xc2   :  { %4755 = vmatmul.mubr.msk.bf16.gmra.mrb[88].mxu0 %vm247_vm1, %v6277_v32 }
  0xc3   :  { %619 = vmatprep.mubr.bf16.mxu0 %v5703_v1 }
  0xc6   :  { %4780 = vmatmul.mubr.msk.bf16.gmra.mrb[88].mxu1 %vm247_vm1, %v6151_v59 }
  0xc7   :  { %892 = vmatprep.mubr.bf16.mxu1 %v5703_v1 }
  0xca   :  { %4756 = vmatmul.mubr.msk.bf16.gmra.mrb[92].mxu0 %vm247_vm1, %v6291_v37 }
  0xce   :  { %4781 = vmatmul.mubr.msk.bf16.gmra.mrb[92].mxu1 %vm247_vm1, %v6176_v7 }
  0xcf   :  { %902 = vmatprep.mubr.bf16.mxu1 %v5703_v1 }
  0xd6   :  { %4782 = vmatmul.mubr.msk.bf16.gmra.mrb[96].mxu1 %vm247_vm1, %v6193_v12 }
  0xd7   :  { %912 = vmatprep.mubr.bf16.mxu1 %v5703_v1 }
  0xde   :  { %4783 = vmatmul.mubr.msk.bf16.gmra.mrb[100].mxu1 %vm247_vm1, %v6207_v16 }
  0xdf   :  { %922 = vmatprep.mubr.bf16.mxu1 %v5703_v1 }
  0xe5   :  { %v391_v44 = vpop.f32.mrb[0].mxu0 }
  0xe6   :  { %v392_v45 = vadd.f32 %v391_v44, %v6319_v9  ;;  %v393_v46 = vpop.f32.mrb[1].mxu0  ;;  %4784 = vmatmul.mubr.msk.bf16.gmra.mrb[104].mxu1 %vm247_vm1, %v6221_v19 }
  0xe7   :  { %v394_v47 = vadd.f32 %v393_v46, %v6324_v20  ;;  %v395_v48 = vpop.f32.mrb[2].mxu0  ;;  %932 = vmatprep.mubr.bf16.mxu1 %v5703_v1 }
  0xe8   :  { %v396_v27 = vadd.f32 %v395_v48, %v6319_v9  ;;  %v397_v50 = vpop.f32.mrb[3].mxu0  ;;  %v1063_v54 = vmax.f32 %v392_v45, 0.0  ;;  %v5634_v48 = vld [vmem:[%s7832_s3 + $0x130] ss:$8 sps:$4 sm:$0xff]  }
  0xe9   :  { %v398_v53 = vadd.f32 %v397_v50, %v6324_v20  ;;  %v1064_v57 = vmax.f32 %v394_v47, 0.0 }
  0xea   :  { %v1067_v55 = vmax.f32 %v396_v27, 0.0 }
  0xeb   :  { %v1068_v61 = vmax.f32 %v398_v53, 0.0  ;;  %v5639_v53 = vld [vmem:[%s7832_s3 + $0x144] ss:$8 sps:$4 sm:$0xff]  }
  0xec   :  { %v1319_v62 = vpack.c.bf16 %v1067_v55, %v1063_v54 }
  0xed   :  { %v401_v63 = vpop.f32.mrb[4].mxu0  ;;  %v1320_v0 = vpack.c.bf16 %v1068_v61, %v1064_v57 }
  0xee   :  { %v402_v3 = vadd.f32 %v401_v63, %v6319_v9  ;;  %v403_v4 = vpop.f32.mrb[5].mxu0  ;;  %4785 = vmatmul.mubr.msk.bf16.gmra.mrb[108].mxu1 %vm247_vm1, %v6235_v23 }
  0xef   :  { %v404_v8 = vadd.f32 %v403_v4, %v6324_v20  ;;  %v405_v10 = vpop.f32.mrb[6].mxu0  ;;  %1875 = vmatprep.mubr.bf16.mxu0 %v1320_v0  ;;  %942 = vmatprep.mubr.bf16.mxu1 %v5703_v1 }
  0xf0   :  { %v406_v11 = vadd.f32 %v405_v10, %v6319_v9  ;;  %v407_v13 = vpop.f32.mrb[7].mxu0  ;;  %1876 = vmatmul.mubr.bf16.vlgmr.msra.gmra.mrb[96].mxu0 %v1319_v62  ;;  %v1071_v18 = vmax.f32 %v402_v3, 0.0  ;;  %v5637_v62 = vld [vmem:[%s7832_s3 + $0x140] ss:$8 sps:$4 sm:$0xff]  }
  0xf1   :  { %v408_v15 = vadd.f32 %v407_v13, %v6324_v20  ;;  %2197 = vmatpush1.bf16.msra.mxu0 %v5620_v2  ;;  %v1072_v29 = vmax.f32 %v404_v8, 0.0  ;;  %v5642_v2 = vld [vmem:[%s7832_s3 + $0x154] ss:$8 sps:$4 sm:$0xff]  }
  0xf2   :  { %v1075_v21 = vmax.f32 %v406_v11, 0.0  ;;  %2198 = vmatprep.subr.bf16.mxu0 %v5628_v34  ;;  %v5640_v11 = vld [vmem:[%s7832_s3 + $0x150] ss:$8 sps:$4 sm:$0xff]  }
  0xf3   :  { %v1076_v25 = vmax.f32 %v408_v15, 0.0 }
  0xf4   :  { %v1323_v36 = vpack.c.bf16 %v1075_v21, %v1071_v18 }
  0xf5   :  { %v411_v41 = vpop.f32.mrb[8].mxu0  ;;  %v1324_v28 = vpack.c.bf16 %v1076_v25, %v1072_v29  ;;  %2199 = vmatpush1.bf16.msra.mxu0 %v5626_v14  ;;  %v5645_v14 = vld [vmem:[%s7832_s3 + $0x164] ss:$8 sps:$4 sm:$0xff]   ;;  %v5643_v25 = vld [vmem:[%s7832_s3 + $0x160] ss:$8 sps:$4 sm:$0xff]  }
  0xf6   :  { %v412_v31 = vadd.f32 %v411_v41, %v6319_v9  ;;  %v413_v49 = vpop.f32.mrb[9].mxu0  ;;  %2200 = vmatprep.subr.bf16.mxu0 %v5633_v22  ;;  %4786 = vmatmul.mubr.msk.bf16.gmra.mrb[112].mxu1 %vm247_vm1, %v6249_v26 }
  0xf7   :  { %v414_v56 = vadd.f32 %v413_v49, %v6324_v20  ;;  %v415_v44 = vpop.f32.mrb[10].mxu0  ;;  %1885 = vmatprep.mubr.bf16.mxu0 %v1324_v28  ;;  %v5648_v28 = vld [vmem:[%s7832_s3 + $0x174] ss:$8 sps:$4 sm:$0xff]   ;;  %952 = vmatprep.mubr.bf16.mxu1 %v5703_v1 }
  0xf8   :  { %v416_v45 = vadd.f32 %v415_v44, %v6319_v9  ;;  %v417_v46 = vpop.f32.mrb[11].mxu0  ;;  %1886 = vmatmul.mubr.bf16.gmra.mrb[100].mxu0 %v1323_v36  ;;  %v1079_v27 = vmax.f32 %v412_v31, 0.0  ;;  %v5646_v44 = vld [vmem:[%s7832_s3 + $0x170] ss:$8 sps:$4 sm:$0xff]  }
  0xf9   :  { %v418_v47 = vadd.f32 %v417_v46, %v6324_v20  ;;  %2201 = vmatpush1.bf16.msra.mxu0 %v5631_v43  ;;  %v1080_v54 = vmax.f32 %v414_v56, 0.0 }
  0xfa   :  { %v1083_v50 = vmax.f32 %v416_v45, 0.0  ;;  %2202 = vmatprep.subr.bf16.mxu0 %v5636_v35 }
  0xfb   :  { %v1084_v55 = vmax.f32 %v418_v47, 0.0  ;;  %v5651_v47 = vld [vmem:[%s7832_s3 + $0x184] ss:$8 sps:$4 sm:$0xff]  }
  0xfc   :  { %v1327_v57 = vpack.c.bf16 %v1083_v50, %v1079_v27 }
  0xfd   :  { %v421_v52 = vpop.f32.mrb[12].mxu0  ;;  %v1328_v61 = vpack.c.bf16 %v1084_v55, %v1080_v54  ;;  %2203 = vmatpush1.bf16.msra.mxu0 %v5634_v48  ;;  %v5649_v54 = vld [vmem:[%s7832_s3 + $0x180] ss:$8 sps:$4 sm:$0xff]  }
  0xfe   :  { %v422_v63 = vadd.f32 %v421_v52, %v6319_v9  ;;  %v423_v0 = vpop.f32.mrb[13].mxu0  ;;  %2204 = vmatprep.subr.bf16.mxu0 %v5639_v53  ;;  %v5654_v52 = vld [vmem:[%s7832_s3 + $0x194] ss:$8 sps:$4 sm:$0xff]   ;;  %4787 = vmatmul.mubr.msk.bf16.gmra.mrb[116].mxu1 %vm247_vm1, %v6263_v30 }
  0xff   :  { %v424_v3 = vadd.f32 %v423_v0, %v6324_v20  ;;  %v425_v4 = vpop.f32.mrb[14].mxu0  ;;  %1895 = vmatprep.mubr.bf16.mxu0 %v1328_v61  ;;  %962 = vmatprep.mubr.bf16.mxu1 %v5703_v1 }
 0x100   :  { %v426_v34 = vadd.f32 %v425_v4, %v6319_v9  ;;  %v427_v8 = vpop.f32.mrb[15].mxu0  ;;  %1896 = vmatmul.mubr.bf16.gmra.mrb[104].mxu0 %v1327_v57  ;;  %v1087_v13 = vmax.f32 %v422_v63, 0.0 }
 0x101   :  { %v428_v10 = vadd.f32 %v427_v8, %v6324_v20  ;;  %2205 = vmatpush1.bf16.msra.mxu0 %v5637_v62  ;;  %v1088_v18 = vmax.f32 %v424_v3, 0.0  ;;  %v5652_v3 = vld [vmem:[%s7832_s3 + $0x190] ss:$8 sps:$4 sm:$0xff]  }
 0x102   :  { %v1091_v15 = vmax.f32 %v426_v34, 0.0  ;;  %2206 = vmatprep.subr.bf16.mxu0 %v5642_v2 }
 0x103   :  { %v1092_v21 = vmax.f32 %v428_v10, 0.0 }
 0x104   :  { %v1331_v22 = vpack.c.bf16 %v1091_v15, %v1087_v13  ;;  %v5657_v13 = vld [vmem:[%s7832_s3 + $0x1a4] ss:$8 sps:$4 sm:$0xff]  }
 0x105   :  { %v431_v59 = vpop.f32.mrb[16].mxu0  ;;  %v1332_v29 = vpack.c.bf16 %v1092_v21, %v1088_v18  ;;  %2207 = vmatpush1.bf16.msra.mxu0 %v5640_v11 }
 0x106   :  { %v432_v36 = vadd.f32 %v431_v59, %v6319_v9  ;;  %v433_v41 = vpop.f32.mrb[17].mxu0  ;;  %2208 = vmatprep.subr.bf16.mxu0 %v5645_v14  ;;  %v5655_v14 = vld [vmem:[%s7832_s3 + $0x1a0] ss:$8 sps:$4 sm:$0xff]   ;;  %4788 = vmatmul.mubr.msk.bf16.gmra.mrb[120].mxu1 %vm247_vm1, %v6277_v32 }
 0x107   :  { %v434_v43 = vadd.f32 %v433_v41, %v6324_v20  ;;  %v435_v31 = vpop.f32.mrb[18].mxu0  ;;  %1905 = vmatprep.mubr.bf16.mxu0 %v1332_v29  ;;  %972 = vmatprep.mubr.bf16.mxu1 %v5703_v1 }
 0x108   :  { %v436_v49 = vadd.f32 %v435_v31, %v6319_v9  ;;  %v437_v35 = vpop.f32.mrb[19].mxu0  ;;  %1906 = vmatmul.mubr.bf16.gmra.mrb[108].mxu0 %v1331_v22  ;;  %v1095_v45 = vmax.f32 %v432_v36, 0.0 }
 0x109   :  { %v438_v56 = vadd.f32 %v437_v35, %v6324_v20  ;;  %2209 = vmatpush1.bf16.msra.mxu0 %v5643_v25  ;;  %v1096_v48 = vmax.f32 %v434_v43, 0.0 }
 0x10a   :  { %v1099_v46 = vmax.f32 %v436_v49, 0.0  ;;  %2210 = vmatprep.subr.bf16.mxu0 %v5648_v28 }
 0x10b   :  { %v1100_v27 = vmax.f32 %v438_v56, 0.0 }
 0x10c   :  { %v1335_v50 = vpack.c.bf16 %v1099_v46, %v1095_v45 }
 0x10d   :  { %v441_v7 = vpop.f32.mrb[20].mxu0  ;;  %v1336_v53 = vpack.c.bf16 %v1100_v27, %v1096_v48  ;;  %2211 = vmatpush1.bf16.msra.mxu0 %v5646_v44 }
 0x10e   :  { %v442_v55 = vadd.f32 %v441_v7, %v6319_v9  ;;  %v443_v57 = vpop.f32.mrb[21].mxu0  ;;  %2212 = vmatprep.subr.bf16.mxu0 %v5651_v47  ;;  %4789 = vmatmul.mubr.msk.bf16.gmra.mrb[124].mxu1 %vm247_vm1, %v6291_v37 }
 0x10f   :  { %v444_v61 = vadd.f32 %v443_v57, %v6324_v20  ;;  %v445_v62 = vpop.f32.mrb[22].mxu0  ;;  %1915 = vmatprep.mubr.bf16.mxu0 %v1336_v53  ;;  %v631_v53 = vpop.f32.mrb[0].mxu1  ;;  %982 = vmatprep.mubr.bf16.mxu1 %v5703_v1 }
 0x110   :  { %v446_v63 = vadd.f32 %v445_v62, %v6319_v9  ;;  %v447_v0 = vpop.f32.mrb[23].mxu0  ;;  %1916 = vmatmul.mubr.bf16.gmra.mrb[112].mxu0 %v1335_v50  ;;  %v1103_v4 = vmax.f32 %v442_v55, 0.0  ;;  %v633_v57 = vpop.f32.mrb[1].mxu1  ;;  %v5660_v62 = vld [vmem:[%s7832_s3 + $0x1b4] ss:$8 sps:$4 sm:$0xff]  }
 0x111   :  { %v448_v2 = vadd.f32 %v447_v0, %v6324_v20  ;;  %2213 = vmatpush1.bf16.msra.mxu0 %v5649_v54  ;;  %v1104_v8 = vmax.f32 %v444_v61, 0.0  ;;  %v5658_v61 = vld [vmem:[%s7832_s3 + $0x1b0] ss:$8 sps:$4 sm:$0xff]   ;;  %v635_v19 = vpop.f32.mrb[2].mxu1 }
 0x112   :  { %v1107_v34 = vmax.f32 %v446_v63, 0.0  ;;  %2214 = vmatprep.subr.bf16.mxu0 %v5654_v52 }
 0x113   :  { %v1108_v10 = vmax.f32 %v448_v2, 0.0  ;;  %v632_v2 = vadd.f32 %v631_v53, %v6319_v9 }
 0x114   :  { %v1339_v11 = vpack.c.bf16 %v1107_v34, %v1103_v4  ;;  %v636_v4 = vadd.f32 %v635_v19, %v6319_v9  ;;  %v637_v34 = vpop.f32.mrb[3].mxu1 }
 0x115   :  { %v451_v12 = vpop.f32.mrb[24].mxu0  ;;  %v1340_v15 = vpack.c.bf16 %v1108_v10, %v1104_v8  ;;  %2215 = vmatpush1.bf16.msra.mxu0 %v5652_v3  ;;  %v634_v3 = vadd.f32 %v633_v57, %v6324_v20 }
 0x116   :  { %v452_v18 = vadd.f32 %v451_v12, %v6319_v9  ;;  %v453_v21 = vpop.f32.mrb[25].mxu0  ;;  %2216 = vmatprep.subr.bf16.mxu0 %v5657_v13  ;;  %4790 = vmatmul.mubr.msk.bf16.gmra.mrb[128].mxu1 %vm247_vm1, %v5990_v6 }
 0x117   :  { %v454_v22 = vadd.f32 %v453_v21, %v6324_v20  ;;  %v455_v59 = vpop.f32.mrb[26].mxu0  ;;  %1925 = vmatprep.mubr.bf16.mxu0 %v1340_v15  ;;  %v1255_v15 = vmax.f32 %v632_v2, 0.0  ;;  %992 = vmatprep.mubr.bf16.mxu1 %v5703_v1 }
 0x118   :  { %v456_v29 = vadd.f32 %v455_v59, %v6319_v9  ;;  %v457_v25 = vpop.f32.mrb[27].mxu0  ;;  %1926 = vmatmul.mubr.bf16.gmra.mrb[116].mxu0 %v1339_v11  ;;  %v1111_v41 = vmax.f32 %v452_v18, 0.0  ;;  %v638_v11 = vadd.f32 %v637_v34, %v6324_v20  ;;  %v1259_v18 = vmax.f32 %v636_v4, 0.0 }
 0x119   :  { %v458_v36 = vadd.f32 %v457_v25, %v6324_v20  ;;  %2217 = vmatpush1.bf16.msra.mxu0 %v5655_v14  ;;  %v1112_v43 = vmax.f32 %v454_v22, 0.0  ;;  %v1256_v14 = vmax.f32 %v634_v3, 0.0  ;;  %v641_v25 = vpop.f32.mrb[4].mxu1 }
 0x11a   :  { %v1115_v28 = vmax.f32 %v456_v29, 0.0  ;;  %2218 = vmatprep.subr.bf16.mxu0 %v5660_v62  ;;  %v1260_v59 = vmax.f32 %v638_v11, 0.0  ;;  %v643_v23 = vpop.f32.mrb[5].mxu1 }
 0x11b   :  { %v1116_v31 = vmax.f32 %v458_v36, 0.0  ;;  %v5661_v36 = vld [vmem:[%s7832_s3 + $0x1c0] ss:$8 sps:$4 sm:$0xff]  }
 0x11c   :  { %v1343_v49 = vpack.c.bf16 %v1115_v28, %v1111_v41  ;;  %v5663_v41 = vld [vmem:[%s7832_s3 + $0x1c4] ss:$8 sps:$4 sm:$0xff]   ;;  %v6468_v28 = vpack.c.bf16 %v1259_v18, %v1255_v15 }
 0x11d   :  { %v461_v35 = vpop.f32.mrb[28].mxu0  ;;  %v1344_v56 = vpack.c.bf16 %v1116_v31, %v1112_v43  ;;  %2219 = vmatpush1.bf16.msra.mxu0 %v5658_v61 }
 0x11e   :  { %v462_v44 = vadd.f32 %v461_v35, %v6319_v9  ;;  %v463_v45 = vpop.f32.mrb[29].mxu0  ;;  %v6471_v35 = vpack.c.bf16 %v1260_v59, %v1256_v14  ;;  %2220 = vmatprep.subr.bf16.mxu0 %v5663_v41  ;;  %4791 = vmatmul.mubr.msk.bf16.gmra.mrb[132].mxu1 %vm247_vm1, %v6023_v17 }
 0x11f   :  { %v464_v46 = vadd.f32 %v463_v45, %v6324_v20  ;;  %v465_v47 = vpop.f32.mrb[30].mxu0  ;;  %1935 = vmatprep.mubr.bf16.mxu0 %v1344_v56  ;;  %v644_v45 = vadd.f32 %v643_v23, %v6324_v20  ;;  %1002 = vmatprep.mubr.bf16.mxu1 %v5703_v1 }
 0x120   :  { %v466_v16 = vadd.f32 %v465_v47, %v6319_v9  ;;  %v467_v48 = vpop.f32.mrb[31].mxu0  ;;  %1936 = vmatmul.mubr.bf16.gmra.mrb[120].mxu0 %v1343_v49  ;;  %v1119_v50 = vmax.f32 %v462_v44, 0.0  ;;  %v642_v49 = vadd.f32 %v641_v25, %v6319_v9 }
 0x121   :  { %v468_v27 = vadd.f32 %v467_v48, %v6324_v20  ;;  %v1120_v54 = vmax.f32 %v464_v46, 0.0  ;;  %v645_v46 = vpop.f32.mrb[6].mxu1  ;;  %2221 = vmatpush1.bf16.msra.mxu0 %v5661_v36  ;;  %v1264_v53 = vmax.f32 %v644_v45, 0.0 }
 0x122   :  { %v1123_v7 = vmax.f32 %v466_v16, 0.0  ;;  %v646_v16 = vadd.f32 %v645_v46, %v6319_v9  ;;  %v647_v48 = vpop.f32.mrb[7].mxu1 }
 0x123   :  { %v1124_v55 = vmax.f32 %v468_v27, 0.0  ;;  %v651_v3 = vpop.f32.mrb[8].mxu1 }
 0x124   :  { %v1347_v52 = vpack.c.bf16 %v1123_v7, %v1119_v50  ;;  %v1263_v7 = vmax.f32 %v642_v49, 0.0  ;;  %v652_v11 = vadd.f32 %v651_v3, %v6319_v9 }
 0x125   :  { %v471_v63 = vpop.f32.mrb[32].mxu0  ;;  %v1348_v0 = vpack.c.bf16 %v1124_v55, %v1120_v54  ;;  %v648_v54 = vadd.f32 %v647_v48, %v6324_v20  ;;  %v5664_v48 = vld [vmem:[%s7832_s3 + $0x1d0] ss:$8 sps:$4 sm:$0xff]  }
 0x126   :  { %v472_v8 = vadd.f32 %v471_v63, %v6319_v9  ;;  %v473_v10 = vpop.f32.mrb[33].mxu0  ;;  %v1271_v25 = vmax.f32 %v652_v11, 0.0  ;;  %4792 = vmatmul.mubr.msk.bf16.gmra.mrb[136].mxu1 %vm247_vm1, %v6045_v24 }
 0x127   :  { %v474_v13 = vadd.f32 %v473_v10, %v6324_v20  ;;  %v475_v12 = vpop.f32.mrb[34].mxu0  ;;  %1945 = vmatprep.mubr.bf16.mxu0 %v1348_v0  ;;  %v1268_v19 = vmax.f32 %v648_v54, 0.0  ;;  %1012 = vmatprep.mubr.bf16.mxu1 %v5703_v1 }
 0x128   :  { %v476_v21 = vadd.f32 %v475_v12, %v6319_v9  ;;  %v477_v22 = vpop.f32.mrb[35].mxu0  ;;  %1946 = vmatmul.mubr.bf16.gmra.mrb[124].mxu0 %v1347_v52  ;;  %v1127_v43 = vmax.f32 %v472_v8, 0.0  ;;  %v1267_v52 = vmax.f32 %v646_v16, 0.0 }
 0x129   :  { %v478_v29 = vadd.f32 %v477_v22, %v6324_v20  ;;  %v1128_v56 = vmax.f32 %v474_v13, 0.0  ;;  %v6482_v4 = vpack.c.bf16 %v1268_v19, %v1264_v53  ;;  %v653_v13 = vpop.f32.mrb[9].mxu1 }
 0x12a   :  { %v1131_v31 = vmax.f32 %v476_v21, 0.0  ;;  %v6485_v34 = vpack.c.bf16 %v1267_v52, %v1263_v7  ;;  %v654_v14 = vadd.f32 %v653_v13, %v6324_v20  ;;  %v655_v18 = vpop.f32.mrb[10].mxu1 }
 0x12b   :  { %v1132_v44 = vmax.f32 %v478_v29, 0.0  ;;  %v656_v21 = vadd.f32 %v655_v18, %v6319_v9  ;;  %v657_v22 = vpop.f32.mrb[11].mxu1 }
 0x12c   :  { %v1351_v47 = vpack.c.bf16 %v1131_v31, %v1127_v43  ;;  %v1272_v36 = vmax.f32 %v654_v14, 0.0  ;;  %v658_v41 = vadd.f32 %v657_v22, %v6324_v20  ;;  %v661_v54 = vpop.f32.mrb[12].mxu1 }
 0x12d   :  { %v1352_v27 = vpack.c.bf16 %v1132_v44, %v1128_v56  ;;  %v481_v50 = vpop.f32.mrb[36].mxu0  ;;  %v1275_v49 = vmax.f32 %v656_v21, 0.0  ;;  %v663_v52 = vpop.f32.mrb[13].mxu1 }
 0x12e   :  { %v482_v55 = vadd.f32 %v481_v50, %v6319_v9  ;;  %v483_v57 = vpop.f32.mrb[37].mxu0  ;;  %v1276_v44 = vmax.f32 %v658_v41, 0.0  ;;  %v665_v19 = vpop.f32.mrb[14].mxu1  ;;  %4793 = vmatmul.mubr.msk.bf16.gmra.mrb[140].mxu1 %vm247_vm1, %v6074_v33 }
 0x12f   :  { %v484_v61 = vadd.f32 %v483_v57, %v6324_v20  ;;  %v485_v62 = vpop.f32.mrb[38].mxu0  ;;  %1955 = vmatprep.mubr.bf16.mxu0 %v1352_v27  ;;  %v5666_v27 = vld [vmem:[%s7832_s3 + $0x1d4] ss:$8 sps:$4 sm:$0xff]   ;;  %v6506_v50 = vpack.c.bf16 %v1275_v49, %v1271_v25  ;;  %v662_v57 = vadd.f32 %v661_v54, %v6319_v9  ;;  %v666_v3 = vadd.f32 %v665_v19, %v6319_v9 }
 0x130   :  { %v486_v63 = vadd.f32 %v485_v62, %v6319_v9  ;;  %v487_v0 = vpop.f32.mrb[39].mxu0  ;;  %1956 = vmatmul.mubr.bf16.gmra.mrb[128].mxu0 %v1351_v47  ;;  %v1135_v8 = vmax.f32 %v482_v55, 0.0  ;;  %v6497_v16 = vpack.c.bf16 %v1276_v44, %v1272_v36  ;;  %2222 = vmatprep.subr.bf16.mxu0 %v5666_v27  ;;  %v664_v62 = vadd.f32 %v663_v52, %v6324_v20 }
 0x131   :  { %v488_v2 = vadd.f32 %v487_v0, %v6324_v20  ;;  %v1136_v12 = vmax.f32 %v484_v61, 0.0  ;;  %2223 = vmatpush1.bf16.msra.mxu0 %v5664_v48  ;;  %v1283_v18 = vmax.f32 %v666_v3, 0.0  ;;  %v5668_v3 = vld [vmem:[%s7832_s3 + $0x1e0] ss:$8 sps:$4 sm:$0xff]   ;;  %1022 = vmatprep.mubr.bf16.mxu1 %v5703_v1 }
 0x132   :  { %v1139_v10 = vmax.f32 %v486_v63, 0.0  ;;  %v1280_v13 = vmax.f32 %v664_v62, 0.0 }
 0x133   :  { %v1140_v15 = vmax.f32 %v488_v2, 0.0  ;;  %v1279_v2 = vmax.f32 %v662_v57, 0.0 }
 0x134   :  { %v1355_v26 = vpack.c.bf16 %v1139_v10, %v1135_v8  ;;  %v667_v8 = vpop.f32.mrb[15].mxu1 }
 0x135   :  { %v1356_v59 = vpack.c.bf16 %v1140_v15, %v1136_v12  ;;  %v491_v29 = vpop.f32.mrb[40].mxu0  ;;  %v668_v12 = vadd.f32 %v667_v8, %v6324_v20  ;;  %v671_v41 = vpop.f32.mrb[16].mxu1  ;;  %v5670_v8 = vld [vmem:[%s7832_s3 + $0x1e4] ss:$8 sps:$4 sm:$0xff]  }
 0x136   :  { %v492_v43 = vadd.f32 %v491_v29, %v6319_v9  ;;  %v493_v31 = vpop.f32.mrb[41].mxu0  ;;  %v6519_v29 = vpack.c.bf16 %v1283_v18, %v1279_v2  ;;  %2224 = vmatprep.subr.bf16.mxu0 %v5670_v8  ;;  %4794 = vmatmul.mubr.msk.bf16.gmra.mrb[144].mxu1 %vm247_vm1, %v6096_v40 }
 0x137   :  { %v494_v23 = vadd.f32 %v493_v31, %v6324_v20  ;;  %v495_v56 = vpop.f32.mrb[42].mxu0  ;;  %1965 = vmatprep.mubr.bf16.mxu0 %v1356_v59  ;;  %v1284_v22 = vmax.f32 %v668_v12, 0.0  ;;  %2225 = vmatpush1.bf16.msra.mxu0 %v5668_v3 }
 0x138   :  { %v496_v45 = vadd.f32 %v495_v56, %v6319_v9  ;;  %v497_v46 = vpop.f32.mrb[43].mxu0  ;;  %1966 = vmatmul.mubr.bf16.gmra.mrb[132].mxu0 %v1355_v26  ;;  %v1143_v7 = vmax.f32 %v492_v43, 0.0  ;;  %v673_v56 = vpop.f32.mrb[17].mxu1  ;;  %1032 = vmatprep.mubr.bf16.mxu1 %v5703_v1 }
 0x139   :  { %v498_v47 = vadd.f32 %v497_v46, %v6324_v20  ;;  %v1144_v30 = vmax.f32 %v494_v23, 0.0  ;;  %v6521_v43 = vpack.c.bf16 %v1284_v22, %v1280_v13  ;;  %v672_v23 = vadd.f32 %v671_v41, %v6319_v9  ;;  %v675_v32 = vpop.f32.mrb[18].mxu1 }
 0x13a   :  { %v1147_v53 = vmax.f32 %v496_v45, 0.0  ;;  %v674_v45 = vadd.f32 %v673_v56, %v6324_v20  ;;  %v676_v27 = vadd.f32 %v675_v32, %v6319_v9 }
 0x13b   :  { %v1148_v55 = vmax.f32 %v498_v47, 0.0  ;;  %v1287_v48 = vmax.f32 %v672_v23, 0.0 }
 0x13c   :  { %v1359_v61 = vpack.c.bf16 %v1147_v53, %v1143_v7  ;;  %v677_v7 = vpop.f32.mrb[19].mxu1 }
 0x13d   :  { %v1360_v63 = vpack.c.bf16 %v1148_v55, %v1144_v30  ;;  %v501_v0 = vpop.f32.mrb[44].mxu0  ;;  %v1288_v30 = vmax.f32 %v674_v45, 0.0  ;;  %v678_v55 = vadd.f32 %v677_v7, %v6324_v20  ;;  %v681_v13 = vpop.f32.mrb[20].mxu1 }
 0x13e   :  { %v502_v10 = vadd.f32 %v501_v0, %v6319_v9  ;;  %v503_v11 = vpop.f32.mrb[45].mxu0  ;;  %v683_v18 = vpop.f32.mrb[21].mxu1  ;;  %4795 = vmatmul.mubr.msk.bf16.gmra.mrb[148].mxu1 %vm247_vm1, %v6127_v51 }
 0x13f   :  { %v504_v15 = vadd.f32 %v503_v11, %v6324_v20  ;;  %v505_v14 = vpop.f32.mrb[46].mxu0  ;;  %1975 = vmatprep.mubr.bf16.mxu0 %v1360_v63  ;;  %v1292_v63 = vmax.f32 %v678_v55, 0.0  ;;  %v684_v22 = vadd.f32 %v683_v18, %v6324_v20  ;;  %1042 = vmatprep.mubr.bf16.mxu1 %v5703_v1 }
 0x140   :  { %v506_v26 = vadd.f32 %v505_v14, %v6319_v9  ;;  %v507_v21 = vpop.f32.mrb[47].mxu0  ;;  %1976 = vmatmul.mubr.bf16.gmra.mrb[136].mxu0 %v1359_v61  ;;  %v1151_v25 = vmax.f32 %v502_v10, 0.0  ;;  %v1291_v61 = vmax.f32 %v676_v27, 0.0  ;;  %v682_v14 = vadd.f32 %v681_v13, %v6319_v9 }
 0x141   :  { %v508_v59 = vadd.f32 %v507_v21, %v6324_v20  ;;  %v1152_v31 = vmax.f32 %v504_v15, 0.0  ;;  %v6542_v12 = vpack.c.bf16 %v1292_v63, %v1288_v30 }
 0x142   :  { %v1155_v36 = vmax.f32 %v506_v26, 0.0  ;;  %v6540_v10 = vpack.c.bf16 %v1291_v61, %v1287_v48  ;;  %v5667_v26 = vld [vmem:[%s7835_s5] sm:$0xff]   ;;  %v1295_v41 = vmax.f32 %v682_v14, 0.0 }
 0x143   :  { %v1156_v49 = vmax.f32 %v508_v59, 0.0  ;;  %v685_v59 = vpop.f32.mrb[22].mxu1  ;;  %2877 = vmatpush1.bf16.msra.mxu1 %v5667_v26 }
 0x144   :  { %v1363_v44 = vpack.c.bf16 %v1155_v36, %v1151_v25  ;;  %2878 = vmatprep.subr.bf16.mxu1 %v5703_v1 }
 0x145   :  { %v1364_v46 = vpack.c.bf16 %v1156_v49, %v1152_v31  ;;  %v511_v47 = vpop.f32.mrb[48].mxu0  ;;  %v686_v31 = vadd.f32 %v685_v59, %v6319_v9  ;;  %v687_v49 = vpop.f32.mrb[23].mxu1 }
 0x146   :  { %v512_v53 = vadd.f32 %v511_v47, %v6319_v9  ;;  %v513_v54 = vpop.f32.mrb[49].mxu0  ;;  %v688_v45 = vadd.f32 %v687_v49, %v6324_v20  ;;  %4796 = vmatmul.mubr.msk.bf16.gmra.mrb[152].mxu1 %vm247_vm1, %v6149_v58 }
 0x147   :  { %v514_v57 = vadd.f32 %v513_v54, %v6324_v20  ;;  %v515_v52 = vpop.f32.mrb[50].mxu0  ;;  %1985 = vmatprep.mubr.bf16.mxu0 %v1364_v46  ;;  %v1299_v47 = vmax.f32 %v686_v31, 0.0  ;;  %1052 = vmatprep.mubr.bf16.mxu1 %v5703_v1 }
 0x148   :  { %v516_v62 = vadd.f32 %v515_v52, %v6319_v9  ;;  %v517_v19 = vpop.f32.mrb[51].mxu0  ;;  %1986 = vmatmul.mubr.bf16.gmra.mrb[140].mxu0 %v1363_v44  ;;  %v1159_v0 = vmax.f32 %v512_v53, 0.0  ;;  %v1296_v44 = vmax.f32 %v684_v22, 0.0  ;;  %v1300_v7 = vmax.f32 %v688_v45, 0.0  ;;  %v691_v52 = vpop.f32.mrb[24].mxu1 }
 0x149   :  { %v518_v2 = vadd.f32 %v517_v19, %v6324_v20  ;;  %v1160_v37 = vmax.f32 %v514_v57, 0.0  ;;  %v6559_v55 = vpack.c.bf16 %v1299_v47, %v1295_v41  ;;  %v692_v19 = vadd.f32 %v691_v52, %v6319_v9  ;;  %v693_v63 = vpop.f32.mrb[25].mxu1 }
 0x14a   :  { %v1163_v11 = vmax.f32 %v516_v62, 0.0  ;;  %v6561_v61 = vpack.c.bf16 %v1300_v7, %v1296_v44  ;;  %v695_v6 = vpop.f32.mrb[26].mxu1  ;;  %v5674_v44 = vld [vmem:[%s7832_s3 + $0x1f4] ss:$8 sps:$4 sm:$0xff]  }
 0x14b   :  { %v1164_v15 = vmax.f32 %v518_v2, 0.0  ;;  %v694_v2 = vadd.f32 %v693_v63, %v6324_v20  ;;  %v696_v13 = vadd.f32 %v695_v6, %v6319_v9  ;;  %2226 = vmatprep.subr.bf16.mxu0 %v5674_v44 }
 0x14c   :  { %v1367_v21 = vpack.c.bf16 %v1163_v11, %v1159_v0  ;;  %v1303_v11 = vmax.f32 %v692_v19, 0.0 }
 0x14d   :  { %v1368_v25 = vpack.c.bf16 %v1164_v15, %v1160_v37  ;;  %v521_v36 = vpop.f32.mrb[52].mxu0  ;;  %v697_v37 = vpop.f32.mrb[27].mxu1  ;;  %v1304_v18 = vmax.f32 %v694_v2, 0.0  ;;  %v1307_v59 = vmax.f32 %v696_v13, 0.0 }
 0x14e   :  { %v522_v23 = vadd.f32 %v521_v36, %v6319_v9  ;;  %v523_v56 = vpop.f32.mrb[53].mxu0  ;;  %v698_v26 = vadd.f32 %v697_v37, %v6324_v20  ;;  %4797 = vmatmul.mubr.msk.bf16.gmra.mrb[156].mxu1 %vm247_vm1, %v6174_v5 }
 0x14f   :  { %v524_v32 = vadd.f32 %v523_v56, %v6324_v20  ;;  %v525_v46 = vpop.f32.mrb[54].mxu0  ;;  %1995 = vmatprep.mubr.bf16.mxu0 %v1368_v25  ;;  %v5672_v56 = vld [vmem:[%s7832_s3 + $0x1f0] ss:$8 sps:$4 sm:$0xff]   ;;  %v6583_v45 = vpack.c.bf16 %v1307_v59, %v1303_v11 }
 0x150   :  { %v526_v48 = vadd.f32 %v525_v46, %v6319_v9  ;;  %v527_v27 = vpop.f32.mrb[55].mxu0  ;;  %1996 = vmatmul.mubr.bf16.gmra.mrb[144].mxu0 %v1367_v21  ;;  %v1167_v53 = vmax.f32 %v522_v23, 0.0  ;;  %v1308_v41 = vmax.f32 %v698_v26, 0.0  ;;  %v5671_v23 = vld [vmem:[%s7835_s5 + $0x8] sm:$0xff]  }
 0x151   :  { %v1168_v54 = vmax.f32 %v524_v32, 0.0  ;;  %v528_v30 = vadd.f32 %v527_v27, %v6324_v20  ;;  %2879 = vmatpush1.bf16.msra.mxu1 %v5671_v23  ;;  %2227 = vmatpush1.bf16.msra.mxu0 %v5672_v56 }
 0x152   :  { %v1171_v57 = vmax.f32 %v526_v48, 0.0  ;;  %v6585_v46 = vpack.c.bf16 %v1308_v41, %v1304_v18  ;;  %v701_v48 = vpop.f32.mrb[28].mxu1  ;;  %2880 = vmatprep.subr.bf16.mxu1 %v5703_v1 }
 0x153   :  { %v1172_v62 = vmax.f32 %v528_v30, 0.0  ;;  %v702_v7 = vadd.f32 %v701_v48, %v6319_v9 }
 0x154   :  { %v1371_v0 = vpack.c.bf16 %v1171_v57, %v1167_v53  ;;  %v703_v53 = vpop.f32.mrb[29].mxu1 }
 0x155   :  { %v1372_v3 = vpack.c.bf16 %v1172_v62, %v1168_v54  ;;  %v531_v8 = vpop.f32.mrb[56].mxu0  ;;  %v704_v57 = vadd.f32 %v703_v53, %v6324_v20  ;;  %v705_v52 = vpop.f32.mrb[30].mxu1  ;;  %v1311_v63 = vmax.f32 %v702_v7, 0.0 }
 0x156   :  { %v532_v15 = vadd.f32 %v531_v8, %v6319_v9  ;;  %v533_v14 = vpop.f32.mrb[57].mxu0  ;;  %v707_v2 = vpop.f32.mrb[31].mxu1 }
 0x157   :  { %v534_v21 = vadd.f32 %v533_v14, %v6324_v20  ;;  %v535_v22 = vpop.f32.mrb[58].mxu0  ;;  %2005 = vmatprep.mubr.bf16.mxu0 %v1372_v3  ;;  %v1312_v8 = vmax.f32 %v704_v57, 0.0  ;;  %v708_v11 = vadd.f32 %v707_v2, %v6324_v20  ;;  %v167_v14 = vsub.s32 2, %v6304_v38 }
 0x158   :  { %v536_v25 = vadd.f32 %v535_v22, %v6319_v9  ;;  %v537_v36 = vpop.f32.mrb[59].mxu0  ;;  %2006 = vmatmul.mubr.bf16.gmra.mrb[148].mxu0 %v1371_v0  ;;  %v1175_v31 = vmax.f32 %v532_v15, 0.0  ;;  %v706_v0 = vadd.f32 %v705_v52, %v6319_v9 }
 0x159   :  { %v538_v49 = vadd.f32 %v537_v36, %v6324_v20  ;;  %v1176_v17 = vmax.f32 %v534_v21, 0.0  ;;  %v1316_v26 = vmax.f32 %v708_v11, 0.0  ;;  %v171_v21 = vsub.s32 3, %v6304_v38 }
 0x15a   :  { %v1179_v32 = vmax.f32 %v536_v25, 0.0  ;;  %v1315_v15 = vmax.f32 %v706_v0, 0.0  ;;  %v6602_v25 = vrot.slane %v6310_v39, %v167_v14 }
 0x15b   :  { %v1180_v47 = vmax.f32 %v538_v49, 0.0  ;;  %v744_v49 = vpop.f32.mrb[32].mxu1  ;;  %v6607_v24 = vrot.slane %v6310_v39, %v171_v21  ;;  %v6609_v23 = vpack.c.bf16 %v1316_v26, %v1312_v8  ;;  %v5675_v8 = vld [vmem:[%s7835_s5 + $0x10] sm:$0xff]  }
 0x15c   :  { %v1375_v27 = vpack.c.bf16 %v1179_v32, %v1175_v31  ;;  %v6604_v36 = vpack.c.bf16 %v1315_v15, %v1311_v63  ;;  %v745_v44 = vadd.f32 %v744_v49, %v6602_v25  ;;  %2881 = vmatpush1.bf16.msra.mxu1 %v5675_v8 }
 0x15d   :  { %v1376_v54 = vpack.c.bf16 %v1180_v47, %v1176_v17  ;;  %v541_v30 = vpop.f32.mrb[60].mxu0  ;;  %v746_v17 = vpop.f32.mrb[33].mxu1  ;;  %2882 = vmatprep.subr.bf16.mxu1 %v5703_v1 }
 0x15e   :  { %v542_v62 = vadd.f32 %v541_v30, %v6319_v9  ;;  %v543_v19 = vpop.f32.mrb[61].mxu0  ;;  %v747_v48 = vadd.f32 %v746_v17, %v6607_v24 }
 0x15f   :  { %v544_v6 = vadd.f32 %v543_v19, %v6324_v20  ;;  %v545_v3 = vpop.f32.mrb[62].mxu0  ;;  %2015 = vmatprep.mubr.bf16.mxu0 %v1376_v54  ;;  %v1065_v54 = vmax.f32 %v745_v44, 0.0 }
 0x160   :  { %v546_v13 = vadd.f32 %v545_v3, %v6319_v9  ;;  %v547_v37 = vpop.f32.mrb[63].mxu0  ;;  %2016 = vmatmul.mubr.bf16.gmra.mrb[152].mxu0 %v1375_v27  ;;  %v1183_v22 = vmax.f32 %v542_v62, 0.0  ;;  %v748_v27 = vpop.f32.mrb[34].mxu1  ;;  %v1066_v62 = vmax.f32 %v747_v48, 0.0 }
 0x161   :  { %v548_v18 = vadd.f32 %v547_v37, %v6324_v20  ;;  %v1184_v41 = vmax.f32 %v544_v6, 0.0  ;;  %v749_v30 = vadd.f32 %v748_v27, %v6602_v25  ;;  %v750_v57 = vpop.f32.mrb[35].mxu1 }
 0x162   :  { %v1187_v59 = vmax.f32 %v546_v13, 0.0  ;;  %v751_v19 = vadd.f32 %v750_v57, %v6607_v24 }
 0x163   :  { %v1188_v31 = vmax.f32 %v548_v18, 0.0  ;;  %v1069_v2 = vmax.f32 %v749_v30, 0.0  ;;  %v754_v18 = vpop.f32.mrb[36].mxu1 }
 0x164   :  { %v1379_v56 = vpack.c.bf16 %v1187_v59, %v1183_v22  ;;  %v1070_v3 = vmax.f32 %v751_v19, 0.0  ;;  %v755_v21 = vadd.f32 %v754_v18, %v6602_v25  ;;  %v756_v22 = vpop.f32.mrb[37].mxu1 }
 0x165   :  { %v1380_v32 = vpack.c.bf16 %v1188_v31, %v1184_v41  ;;  %v551_v47 = vpop.f32.mrb[64].mxu0  ;;  %v6625_v37 = vpack.c.bf16 %v1069_v2, %v1065_v54  ;;  %v757_v31 = vadd.f32 %v756_v22, %v6607_v24  ;;  %v758_v49 = vpop.f32.mrb[38].mxu1 }
 0x166   :  { %v552_v7 = vadd.f32 %v551_v47, %v6319_v9  ;;  %v553_v53 = vpop.f32.mrb[65].mxu0  ;;  %v6627_v26 = vpack.c.bf16 %v1070_v3, %v1066_v62  ;;  %v1073_v17 = vmax.f32 %v755_v21, 0.0  ;;  %v760_v47 = vpop.f32.mrb[39].mxu1 }
 0x167   :  { %v554_v39 = vadd.f32 %v553_v53, %v6324_v20  ;;  %v555_v52 = vpop.f32.mrb[66].mxu0  ;;  %2025 = vmatprep.mubr.bf16.mxu0 %v1380_v32  ;;  %v759_v32 = vadd.f32 %v758_v49, %v6602_v25  ;;  %v761_v53 = vadd.f32 %v760_v47, %v6607_v24 }
 0x168   :  { %v556_v63 = vadd.f32 %v555_v52, %v6319_v9  ;;  %v557_v0 = vpop.f32.mrb[67].mxu0  ;;  %2026 = vmatmul.mubr.bf16.gmra.mrb[156].mxu0 %v1379_v56  ;;  %v1191_v11 = vmax.f32 %v552_v7, 0.0  ;;  %v1074_v7 = vmax.f32 %v757_v31, 0.0 }
 0x169   :  { %v558_v6 = vadd.f32 %v557_v0, %v6324_v20  ;;  %v1192_v15 = vmax.f32 %v554_v39, 0.0  ;;  %v1077_v57 = vmax.f32 %v759_v32, 0.0  ;;  %v1078_v52 = vmax.f32 %v761_v53, 0.0 }
 0x16a   :  { %v1195_v13 = vmax.f32 %v556_v63, 0.0 }
 0x16b   :  { %v1196_v14 = vmax.f32 %v558_v6, 0.0  ;;  %v6641_v63 = vpack.c.bf16 %v1077_v57, %v1073_v17  ;;  %v764_v6 = vpop.f32.mrb[40].mxu1  ;;  %v6643_v3 = vpack.c.bf16 %v1078_v52, %v1074_v7  ;;  %v5676_v7 = vld [vmem:[%s7835_s5 + $0x18] sm:$0xff]  }
 0x16c   :  { %v1383_v33 = vpack.c.bf16 %v1195_v13, %v1191_v11  ;;  %v765_v11 = vadd.f32 %v764_v6, %v6602_v25  ;;  %v766_v13 = vpop.f32.mrb[41].mxu1  ;;  %2883 = vmatpush1.bf16.msra.mxu1 %v5676_v7 }
 0x16d   :  { %v1384_v59 = vpack.c.bf16 %v1196_v14, %v1192_v15  ;;  %v561_v41 = vpop.f32.mrb[68].mxu0  ;;  %v767_v14 = vadd.f32 %v766_v13, %v6607_v24  ;;  %v768_v18 = vpop.f32.mrb[42].mxu1  ;;  %2884 = vmatprep.subr.bf16.mxu1 %v5703_v1 }
 0x16e   :  { %v562_v56 = vadd.f32 %v561_v41, %v6319_v9  ;;  %v563_v44 = vpop.f32.mrb[69].mxu0  ;;  %v1081_v22 = vmax.f32 %v765_v11, 0.0  ;;  %v770_v41 = vpop.f32.mrb[43].mxu1 }
 0x16f   :  { %v564_v48 = vadd.f32 %v563_v44, %v6324_v20  ;;  %v565_v27 = vpop.f32.mrb[70].mxu0  ;;  %2035 = vmatprep.mubr.bf16.mxu0 %v1384_v59  ;;  %v769_v59 = vadd.f32 %v768_v18, %v6602_v25  ;;  %v771_v44 = vadd.f32 %v770_v41, %v6607_v24  ;;  %v774_v52 = vpop.f32.mrb[44].mxu1 }
 0x170   :  { %v566_v54 = vadd.f32 %v565_v27, %v6319_v9  ;;  %v567_v30 = vpop.f32.mrb[71].mxu0  ;;  %2036 = vmatmul.mubr.bf16.gmra.mrb[160].mxu0 %v1383_v33  ;;  %v1199_v62 = vmax.f32 %v562_v56, 0.0  ;;  %v1082_v56 = vmax.f32 %v767_v14, 0.0 }
 0x171   :  { %v568_v39 = vadd.f32 %v567_v30, %v6324_v20  ;;  %v1200_v0 = vmax.f32 %v564_v48, 0.0  ;;  %v1085_v47 = vmax.f32 %v769_v59, 0.0  ;;  %v1086_v27 = vmax.f32 %v771_v44, 0.0 }
 0x172   :  { %v1203_v19 = vmax.f32 %v566_v54, 0.0 }
 0x173   :  { %v1204_v2 = vmax.f32 %v568_v39, 0.0  ;;  %v6659_v30 = vpack.c.bf16 %v1085_v47, %v1081_v22 }
 0x174   :  { %v1387_v8 = vpack.c.bf16 %v1203_v19, %v1199_v62  ;;  %v6661_v62 = vpack.c.bf16 %v1086_v27, %v1082_v56  ;;  %v775_v19 = vadd.f32 %v774_v52, %v6602_v25 }
 0x175   :  { %v1388_v15 = vpack.c.bf16 %v1204_v2, %v1200_v0  ;;  %v571_v40 = vpop.f32.mrb[72].mxu0  ;;  %v776_v0 = vpop.f32.mrb[45].mxu1 }
 0x176   :  { %v572_v33 = vadd.f32 %v571_v40, %v6319_v9  ;;  %v573_v21 = vpop.f32.mrb[73].mxu0  ;;  %v778_v11 = vpop.f32.mrb[46].mxu1  ;;  %v1089_v40 = vmax.f32 %v775_v19, 0.0 }
 0x177   :  { %v574_v31 = vadd.f32 %v573_v21, %v6324_v20  ;;  %v575_v49 = vpop.f32.mrb[74].mxu0  ;;  %2045 = vmatprep.mubr.bf16.mxu0 %v1388_v15  ;;  %v779_v14 = vadd.f32 %v778_v11, %v6602_v25  ;;  %v780_v18 = vpop.f32.mrb[47].mxu1 }
 0x178   :  { %v576_v17 = vadd.f32 %v575_v49, %v6319_v9  ;;  %v577_v32 = vpop.f32.mrb[75].mxu0  ;;  %2046 = vmatmul.mubr.bf16.gmra.mrb[164].mxu0 %v1387_v8  ;;  %v1207_v53 = vmax.f32 %v572_v33, 0.0  ;;  %v777_v8 = vadd.f32 %v776_v0, %v6607_v24  ;;  %v781_v59 = vadd.f32 %v780_v18, %v6607_v24  ;;  %v784_v7 = vpop.f32.mrb[48].mxu1 }
 0x179   :  { %v578_v48 = vadd.f32 %v577_v32, %v6324_v20  ;;  %v1208_v57 = vmax.f32 %v574_v31, 0.0  ;;  %v1093_v49 = vmax.f32 %v779_v14, 0.0 }
 0x17a   :  { %v1211_v54 = vmax.f32 %v576_v17, 0.0  ;;  %v1090_v22 = vmax.f32 %v777_v8, 0.0  ;;  %v1094_v44 = vmax.f32 %v781_v59, 0.0 }
 0x17b   :  { %v1212_v39 = vmax.f32 %v578_v48, 0.0  ;;  %v6675_v47 = vpack.c.bf16 %v1093_v49, %v1089_v40 }
 0x17c   :  { %v1391_v51 = vpack.c.bf16 %v1211_v54, %v1207_v53  ;;  %v6677_v53 = vpack.c.bf16 %v1094_v44, %v1090_v22 }
 0x17d   :  { %v1392_v2 = vpack.c.bf16 %v1212_v39, %v1208_v57  ;;  %v581_v6 = vpop.f32.mrb[76].mxu0  ;;  %v785_v57 = vadd.f32 %v784_v7, %v6602_v25  ;;  %v786_v39 = vpop.f32.mrb[49].mxu1 }
 0x17e   :  { %v582_v13 = vadd.f32 %v581_v6, %v6319_v9  ;;  %v583_v15 = vpop.f32.mrb[77].mxu0  ;;  %v788_v19 = vpop.f32.mrb[50].mxu1 }
 0x17f   :  { %v584_v33 = vadd.f32 %v583_v15, %v6324_v20  ;;  %v585_v21 = vpop.f32.mrb[78].mxu0  ;;  %2055 = vmatprep.mubr.bf16.mxu0 %v1392_v2  ;;  %v1097_v6 = vmax.f32 %v785_v57, 0.0  ;;  %v789_v8 = vadd.f32 %v788_v19, %v6602_v25  ;;  %v790_v11 = vpop.f32.mrb[51].mxu1 }
 0x180   :  { %v586_v41 = vadd.f32 %v585_v21, %v6319_v9  ;;  %v587_v31 = vpop.f32.mrb[79].mxu0  ;;  %2056 = vmatmul.mubr.bf16.gmra.mrb[168].mxu0 %v1391_v51  ;;  %v1215_v17 = vmax.f32 %v582_v13, 0.0  ;;  %v787_v51 = vadd.f32 %v786_v39, %v6607_v24  ;;  %v791_v14 = vadd.f32 %v790_v11, %v6607_v24 }
 0x181   :  { %v588_v56 = vadd.f32 %v587_v31, %v6324_v20  ;;  %v1216_v48 = vmax.f32 %v584_v33, 0.0  ;;  %v1101_v21 = vmax.f32 %v789_v8, 0.0 }
 0x182   :  { %v1219_v32 = vmax.f32 %v586_v41, 0.0  ;;  %v1098_v40 = vmax.f32 %v787_v51, 0.0  ;;  %v1102_v59 = vmax.f32 %v791_v14, 0.0  ;;  %v5677_v41 = vld [vmem:[%s7835_s5 + $0x20] sm:$0xff]  }
 0x183   :  { %v1220_v27 = vmax.f32 %v588_v56, 0.0  ;;  %v6692_v56 = vpack.c.bf16 %v1101_v21, %v1097_v6  ;;  %2885 = vmatpush1.bf16.msra.mxu1 %v5677_v41 }
 0x184   :  { %v1395_v54 = vpack.c.bf16 %v1219_v32, %v1215_v17  ;;  %v794_v32 = vpop.f32.mrb[52].mxu1  ;;  %2886 = vmatprep.subr.bf16.mxu1 %v5703_v1 }
 0x185   :  { %v1396_v52 = vpack.c.bf16 %v1220_v27, %v1216_v48  ;;  %v591_v58 = vpop.f32.mrb[80].mxu0  ;;  %v6694_v48 = vpack.c.bf16 %v1102_v59, %v1098_v40  ;;  %v795_v5 = vadd.f32 %v794_v32, %v6602_v25  ;;  %v796_v7 = vpop.f32.mrb[53].mxu1 }
 0x186   :  { %v592_v0 = vadd.f32 %v591_v58, %v6319_v9  ;;  %v593_v2 = vpop.f32.mrb[81].mxu0  ;;  %v797_v39 = vadd.f32 %v796_v7, %v6607_v24 }
 0x187   :  { %v594_v13 = vadd.f32 %v593_v2, %v6324_v20  ;;  %v595_v15 = vpop.f32.mrb[82].mxu0  ;;  %2065 = vmatprep.mubr.bf16.mxu0 %v1396_v52  ;;  %v798_v52 = vpop.f32.mrb[54].mxu1  ;;  %v1105_v19 = vmax.f32 %v795_v5, 0.0 }
 0x188   :  { %v596_v18 = vadd.f32 %v595_v15, %v6319_v9  ;;  %v597_v33 = vpop.f32.mrb[83].mxu0  ;;  %2066 = vmatmul.mubr.bf16.gmra.mrb[172].mxu0 %v1395_v54  ;;  %v1223_v31 = vmax.f32 %v592_v0, 0.0  ;;  %v799_v0 = vadd.f32 %v798_v52, %v6602_v25  ;;  %v800_v2 = vpop.f32.mrb[55].mxu1  ;;  %v1106_v11 = vmax.f32 %v797_v39, 0.0 }
 0x189   :  { %v598_v22 = vadd.f32 %v597_v33, %v6324_v20  ;;  %v1224_v44 = vmax.f32 %v594_v13, 0.0  ;;  %v801_v13 = vadd.f32 %v800_v2, %v6607_v24 }
 0x18a   :  { %v1227_v49 = vmax.f32 %v596_v18, 0.0  ;;  %v1109_v14 = vmax.f32 %v799_v0, 0.0 }
 0x18b   :  { %v1228_v17 = vmax.f32 %v598_v22, 0.0  ;;  %v1110_v33 = vmax.f32 %v801_v13, 0.0 }
 0x18c   :  { %v1399_v27 = vpack.c.bf16 %v1227_v49, %v1223_v31  ;;  %v6705_v59 = vpack.c.bf16 %v1109_v14, %v1105_v19  ;;  %v804_v49 = vpop.f32.mrb[56].mxu1 }
 0x18d   :  { %v1400_v54 = vpack.c.bf16 %v1228_v17, %v1224_v44  ;;  %v601_v57 = vpop.f32.mrb[84].mxu0  ;;  %v6707_v44 = vpack.c.bf16 %v1110_v33, %v1106_v11  ;;  %v805_v32 = vadd.f32 %v804_v49, %v6602_v25  ;;  %v806_v5 = vpop.f32.mrb[57].mxu1 }
 0x18e   :  { %v602_v58 = vadd.f32 %v601_v57, %v6319_v9  ;;  %v603_v51 = vpop.f32.mrb[85].mxu0  ;;  %v808_v57 = vpop.f32.mrb[58].mxu1 }
 0x18f   :  { %v604_v6 = vadd.f32 %v603_v51, %v6324_v20  ;;  %v605_v8 = vpop.f32.mrb[86].mxu0  ;;  %2075 = vmatprep.mubr.bf16.mxu0 %v1400_v54  ;;  %v809_v51 = vadd.f32 %v808_v57, %v6602_v25  ;;  %v810_v19 = vpop.f32.mrb[59].mxu1 }
 0x190   :  { %v606_v15 = vadd.f32 %v605_v8, %v6319_v9  ;;  %v607_v40 = vpop.f32.mrb[87].mxu0  ;;  %2076 = vmatmul.mubr.bf16.gmra.mrb[176].mxu0 %v1399_v27  ;;  %v1231_v21 = vmax.f32 %v602_v58, 0.0  ;;  %v807_v27 = vadd.f32 %v806_v5, %v6607_v24  ;;  %v1113_v58 = vmax.f32 %v805_v32, 0.0  ;;  %v814_v49 = vpop.f32.mrb[60].mxu1 }
 0x191   :  { %v608_v18 = vadd.f32 %v607_v40, %v6324_v20  ;;  %v1232_v41 = vmax.f32 %v604_v6, 0.0  ;;  %v811_v8 = vadd.f32 %v810_v19, %v6607_v24 }
 0x192   :  { %v1235_v22 = vmax.f32 %v606_v15, 0.0  ;;  %v1114_v6 = vmax.f32 %v807_v27, 0.0  ;;  %v1117_v15 = vmax.f32 %v809_v51, 0.0 }
 0x193   :  { %v1236_v31 = vmax.f32 %v608_v18, 0.0  ;;  %v1118_v14 = vmax.f32 %v811_v8, 0.0  ;;  %v5678_v18 = vld [vmem:[%s7835_s5 + $0x28] sm:$0xff]  }
 0x194   :  { %v1403_v17 = vpack.c.bf16 %v1235_v22, %v1231_v21  ;;  %v6720_v22 = vpack.c.bf16 %v1117_v15, %v1113_v58  ;;  %2887 = vmatpush1.bf16.msra.mxu1 %v5678_v18 }
 0x195   :  { %v1404_v7 = vpack.c.bf16 %v1236_v31, %v1232_v41  ;;  %v611_v54 = vpop.f32.mrb[88].mxu0  ;;  %v6722_v32 = vpack.c.bf16 %v1118_v14, %v1114_v6  ;;  %2888 = vmatprep.subr.bf16.mxu1 %v5703_v1 }
 0x196   :  { %v612_v39 = vadd.f32 %v611_v54, %v6319_v9  ;;  %v613_v52 = vpop.f32.mrb[89].mxu0 }
 0x197   :  { %v614_v0 = vadd.f32 %v613_v52, %v6324_v20  ;;  %v615_v2 = vpop.f32.mrb[90].mxu0  ;;  %2085 = vmatprep.mubr.bf16.mxu0 %v1404_v7  ;;  %v816_v7 = vpop.f32.mrb[61].mxu1 }
 0x198   :  { %v616_v11 = vadd.f32 %v615_v2, %v6319_v9  ;;  %v617_v13 = vpop.f32.mrb[91].mxu0  ;;  %2086 = vmatmul.mubr.bf16.gmra.mrb[180].mxu0 %v1403_v17  ;;  %v1239_v33 = vmax.f32 %v612_v39, 0.0  ;;  %v815_v17 = vadd.f32 %v814_v49, %v6602_v25  ;;  %v817_v57 = vadd.f32 %v816_v7, %v6607_v24  ;;  %v818_v39 = vpop.f32.mrb[62].mxu1 }
 0x199   :  { %v618_v40 = vadd.f32 %v617_v13, %v6324_v20  ;;  %v1240_v41 = vmax.f32 %v614_v0, 0.0  ;;  %v819_v19 = vadd.f32 %v818_v39, %v6602_v25  ;;  %v820_v0 = vpop.f32.mrb[63].mxu1 }
 0x19a   :  { %v1243_v21 = vmax.f32 %v616_v11, 0.0  ;;  %v1121_v51 = vmax.f32 %v815_v17, 0.0  ;;  %v1122_v8 = vmax.f32 %v817_v57, 0.0  ;;  %v821_v11 = vadd.f32 %v820_v0, %v6607_v24  ;;  %v824_v17 = vpop.f32.mrb[64].mxu1 }
 0x19b   :  { %v1244_v31 = vmax.f32 %v618_v40, 0.0  ;;  %v1125_v40 = vmax.f32 %v819_v19, 0.0  ;;  %v826_v57 = vpop.f32.mrb[65].mxu1 }
 0x19c   :  { %v1407_v5 = vpack.c.bf16 %v1243_v21, %v1239_v33  ;;  %v1126_v18 = vmax.f32 %v821_v11, 0.0  ;;  %v828_v39 = vpop.f32.mrb[66].mxu1 }
 0x19d   :  { %v1408_v54 = vpack.c.bf16 %v1244_v31, %v1240_v41  ;;  %v621_v27 = vpop.f32.mrb[92].mxu0  ;;  %v6733_v41 = vpack.c.bf16 %v1125_v40, %v1121_v51 }
 0x19e   :  { %v622_v52 = vadd.f32 %v621_v27, %v6319_v9  ;;  %v623_v58 = vpop.f32.mrb[93].mxu0  ;;  %v6735_v7 = vpack.c.bf16 %v1126_v18, %v1122_v8  ;;  %v825_v27 = vadd.f32 %v824_v17, %v6602_v25 }
 0x19f   :  { %v624_v2 = vadd.f32 %v623_v58, %v6324_v20  ;;  %v625_v6 = vpop.f32.mrb[94].mxu0  ;;  %2095 = vmatprep.mubr.bf16.mxu0 %v1408_v54 }
 0x1a0   :  { %v626_v13 = vadd.f32 %v625_v6, %v6319_v9  ;;  %v627_v15 = vpop.f32.mrb[95].mxu0  ;;  %2096 = vmatmul.mubr.bf16.gmra.mrb[184].mxu0 %v1407_v5  ;;  %v1247_v33 = vmax.f32 %v622_v52, 0.0  ;;  %v827_v5 = vadd.f32 %v826_v57, %v6607_v24  ;;  %v1129_v58 = vmax.f32 %v825_v27, 0.0  ;;  %v830_v52 = vpop.f32.mrb[67].mxu1  ;;  %v5679_v6 = vld [vmem:[%s7835_s5 + $0x30] sm:$0xff]  }
 0x1a1   :  { %v628_v14 = vadd.f32 %v627_v15, %v6324_v20  ;;  %v1248_v31 = vmax.f32 %v624_v2, 0.0  ;;  %v829_v20 = vadd.f32 %v828_v39, %v6602_v25  ;;  %v831_v19 = vadd.f32 %v830_v52, %v6607_v24  ;;  %v834_v11 = vpop.f32.mrb[68].mxu1  ;;  %2889 = vmatpush1.bf16.msra.mxu1 %v5679_v6  ;;  %v5680_v6 = vld [vmem:[%s7835_s5 + $0x38] sm:$0xff]  }
 0x1a2   :  { %v1251_v21 = vmax.f32 %v626_v13, 0.0  ;;  %v1130_v51 = vmax.f32 %v827_v5, 0.0  ;;  %v835_v15 = vadd.f32 %v834_v11, %v6602_v25  ;;  %v836_v40 = vpop.f32.mrb[69].mxu1  ;;  %2890 = vmatprep.subr.bf16.mxu1 %v5703_v1 }
 0x1a3   :  { %v1252_v49 = vmax.f32 %v628_v14, 0.0  ;;  %v1133_v0 = vmax.f32 %v829_v20, 0.0  ;;  %v1134_v2 = vmax.f32 %v831_v19, 0.0  ;;  %v837_v14 = vadd.f32 %v836_v40, %v6607_v24  ;;  %v838_v18 = vpop.f32.mrb[70].mxu1 }
 0x1a4   :  { %v1411_v54 = vpack.c.bf16 %v1251_v21, %v1247_v33  ;;  %v839_v33 = vadd.f32 %v838_v18, %v6602_v25  ;;  %v840_v21 = vpop.f32.mrb[71].mxu1 }
 0x1a5   :  { %v1412_v9 = vpack.c.bf16 %v1252_v49, %v1248_v31  ;;  %v6745_v8 = vpack.c.bf16 %v1133_v0, %v1129_v58  ;;  %v6747_v13 = vpack.c.bf16 %v1134_v2, %v1130_v51  ;;  %v1138_v31 = vmax.f32 %v837_v14, 0.0  ;;  %v844_v57 = vpop.f32.mrb[72].mxu1  ;;  %2891 = vmatpush1.bf16.msra.mxu1 %v5680_v6  ;;  %v5681_v6 = vld [vmem:[%s7835_s5 + $0x40] sm:$0xff]  }
 0x1a6   :  { %v841_v49 = vadd.f32 %v840_v21, %v6607_v24  ;;  %v1141_v17 = vmax.f32 %v839_v33, 0.0  ;;  %v845_v5 = vadd.f32 %v844_v57, %v6602_v25  ;;  %v846_v39 = vpop.f32.mrb[73].mxu1  ;;  %2892 = vmatprep.subr.bf16.mxu1 %v5703_v1 }
 0x1a7   :  { %2105 = vmatprep.mubr.bf16.mxu0 %v1412_v9  ;;  %v847_v58 = vadd.f32 %v846_v39, %v6607_v24  ;;  %v848_v20 = vpop.f32.mrb[74].mxu1 }
 0x1a8   :  { %2106 = vmatmul.mubr.bf16.gmra.mrb[188].mxu0 %v1411_v54  ;;  %v1142_v54 = vmax.f32 %v841_v49, 0.0  ;;  %v1145_v52 = vmax.f32 %v845_v5, 0.0  ;;  %v849_v51 = vadd.f32 %v848_v20, %v6602_v25  ;;  %v850_v19 = vpop.f32.mrb[75].mxu1 }
 0x1a9   :  { %2115 = vmatprep.mubr.bf16.mxu0 %v6471_v35  ;;  %v1137_v35 = vmax.f32 %v835_v15, 0.0  ;;  %v851_v0 = vadd.f32 %v850_v19, %v6607_v24  ;;  %v854_v15 = vpop.f32.mrb[76].mxu1  ;;  %2893 = vmatpush1.bf16.msra.mxu1 %v5681_v6  ;;  %v5682_v6 = vld [vmem:[%s7835_s5 + $0x48] sm:$0xff]  }
 0x1aa   :  { %v6758_v9 = vpack.c.bf16 %v1142_v54, %v1138_v31  ;;  %v855_v14 = vadd.f32 %v854_v15, %v6602_v25  ;;  %v856_v18 = vpop.f32.mrb[77].mxu1  ;;  %2894 = vmatprep.subr.bf16.mxu1 %v5703_v1 }
 0x1ab   :  { %v6756_v27 = vpack.c.bf16 %v1141_v17, %v1137_v35  ;;  %v1150_v2 = vmax.f32 %v851_v0, 0.0  ;;  %v858_v35 = vpop.f32.mrb[78].mxu1 }
 0x1ac   :  { %v859_v33 = vadd.f32 %v858_v35, %v6602_v25  ;;  %v860_v21 = vpop.f32.mrb[79].mxu1 }
 0x1ad   :  { %v861_v49 = vadd.f32 %v860_v21, %v6607_v24  ;;  %v864_v5 = vpop.f32.mrb[80].mxu1  ;;  %2895 = vmatpush1.bf16.msra.mxu1 %v5682_v6  ;;  %v5683_v6 = vld [vmem:[%s7835_s5 + $0x50] sm:$0xff]  }
 0x1ae   :  { %v1157_v17 = vmax.f32 %v859_v33, 0.0  ;;  %v866_v20 = vpop.f32.mrb[81].mxu1  ;;  %2896 = vmatprep.subr.bf16.mxu1 %v5703_v1 }
 0x1af   :  { %v1158_v54 = vmax.f32 %v861_v49, 0.0 }
 0x1b0   :  { %2116 = vmatmul.mubr.bf16.gmra.mrb[192].mxu0 %v6468_v28  ;;  %v1146_v28 = vmax.f32 %v847_v58, 0.0  ;;  %v865_v58 = vadd.f32 %v864_v5, %v6602_v25 }
 0x1b1   :  { %2125 = vmatprep.mubr.bf16.mxu0 %v6482_v4  ;;  %v1149_v4 = vmax.f32 %v849_v51, 0.0  ;;  %v868_v51 = vpop.f32.mrb[82].mxu1  ;;  %2897 = vmatpush1.bf16.msra.mxu1 %v5683_v6  ;;  %v5684_v6 = vld [vmem:[%s7835_s5 + $0x58] sm:$0xff]  }
 0x1b2   :  { %v6771_v40 = vpack.c.bf16 %v1150_v2, %v1146_v28  ;;  %v1161_v19 = vmax.f32 %v865_v58, 0.0  ;;  %v869_v28 = vadd.f32 %v868_v51, %v6602_v25  ;;  %v870_v0 = vpop.f32.mrb[83].mxu1  ;;  %2898 = vmatprep.subr.bf16.mxu1 %v5703_v1 }
 0x1b3   :  { %v6769_v11 = vpack.c.bf16 %v1149_v4, %v1145_v52  ;;  %v867_v52 = vadd.f32 %v866_v20, %v6607_v24  ;;  %v871_v4 = vadd.f32 %v870_v0, %v6607_v24 }
 0x1b5   :  { %v1166_v2 = vmax.f32 %v871_v4, 0.0  ;;  %2899 = vmatpush1.bf16.msra.mxu1 %v5684_v6  ;;  %v5685_v6 = vld [vmem:[%s7835_s5 + $0x60] sm:$0xff]  }
 0x1b6   :  { %2900 = vmatprep.subr.bf16.mxu1 %v5703_v1 }
 0x1b8   :  { %2126 = vmatmul.mubr.bf16.gmra.mrb[196].mxu0 %v6485_v34  ;;  %v857_v34 = vadd.f32 %v856_v18, %v6607_v24 }
 0x1b9   :  { %2135 = vmatprep.mubr.bf16.mxu0 %v6497_v16  ;;  %v1153_v16 = vmax.f32 %v855_v14, 0.0  ;;  %v874_v14 = vpop.f32.mrb[84].mxu1  ;;  %2901 = vmatpush1.bf16.msra.mxu1 %v5685_v6  ;;  %v5686_v6 = vld [vmem:[%s7835_s5 + $0x68] sm:$0xff]  }
 0x1ba   :  { %v1154_v31 = vmax.f32 %v857_v34, 0.0  ;;  %v875_v34 = vadd.f32 %v874_v14, %v6602_v25  ;;  %v876_v35 = vpop.f32.mrb[85].mxu1  ;;  %2902 = vmatprep.subr.bf16.mxu1 %v5703_v1 }
 0x1bb   :  { %v6780_v57 = vpack.c.bf16 %v1157_v17, %v1153_v16  ;;  %v878_v16 = vpop.f32.mrb[86].mxu1 }
 0x1bc   :  { %v6782_v39 = vpack.c.bf16 %v1158_v54, %v1154_v31  ;;  %v879_v33 = vadd.f32 %v878_v16, %v6602_v25  ;;  %v880_v21 = vpop.f32.mrb[87].mxu1 }
 0x1bd   :  { %v881_v49 = vadd.f32 %v880_v21, %v6607_v24  ;;  %v884_v58 = vpop.f32.mrb[88].mxu1  ;;  %2903 = vmatpush1.bf16.msra.mxu1 %v5686_v6  ;;  %v5687_v6 = vld [vmem:[%s7835_s5 + $0x70] sm:$0xff]  }
 0x1be   :  { %v1173_v17 = vmax.f32 %v879_v33, 0.0  ;;  %v886_v51 = vpop.f32.mrb[89].mxu1  ;;  %2904 = vmatprep.subr.bf16.mxu1 %v5703_v1 }
 0x1bf   :  { %v1174_v54 = vmax.f32 %v881_v49, 0.0 }
 0x1c0   :  { %2136 = vmatmul.mubr.bf16.gmra.mrb[200].mxu0 %v6506_v50  ;;  %v1162_v50 = vmax.f32 %v867_v52, 0.0  ;;  %v885_v52 = vadd.f32 %v884_v58, %v6602_v25 }
 0x1c1   :  { %2145 = vmatprep.mubr.bf16.mxu0 %v6521_v43  ;;  %v1165_v43 = vmax.f32 %v869_v28, 0.0  ;;  %v888_v28 = vpop.f32.mrb[90].mxu1  ;;  %2905 = vmatpush1.bf16.msra.mxu1 %v5687_v6 }
 0x1c2   :  { %v6795_v18 = vpack.c.bf16 %v1166_v2, %v1162_v50  ;;  %v1177_v0 = vmax.f32 %v885_v52, 0.0  ;;  %v889_v50 = vadd.f32 %v888_v28, %v6602_v25  ;;  %v890_v4 = vpop.f32.mrb[91].mxu1  ;;  %2906 = vmatprep.subr.bf16.mxu1 %v5703_v1 }
 0x1c3   :  { %v6793_v15 = vpack.c.bf16 %v1165_v43, %v1161_v19  ;;  %v887_v19 = vadd.f32 %v886_v51, %v6607_v24  ;;  %v891_v43 = vadd.f32 %v890_v4, %v6607_v24 }
 0x1c5   :  { %v1182_v2 = vmax.f32 %v891_v43, 0.0 }
 0x1c8   :  { %2146 = vmatmul.mubr.bf16.gmra.mrb[204].mxu0 %v6519_v29  ;;  %v877_v29 = vadd.f32 %v876_v35, %v6607_v24 }
 0x1c9   :  { %2155 = vmatprep.mubr.bf16.mxu0 %v6542_v12  ;;  %v1169_v12 = vmax.f32 %v875_v34, 0.0  ;;  %v894_v34 = vpop.f32.mrb[92].mxu1 }
 0x1ca   :  { %v1170_v31 = vmax.f32 %v877_v29, 0.0  ;;  %v895_v29 = vadd.f32 %v894_v34, %v6602_v25  ;;  %v896_v16 = vpop.f32.mrb[93].mxu1 }
 0x1cb   :  { %v6804_v5 = vpack.c.bf16 %v1173_v17, %v1169_v12  ;;  %v898_v12 = vpop.f32.mrb[94].mxu1 }
 0x1cc   :  { %v6806_v20 = vpack.c.bf16 %v1174_v54, %v1170_v31  ;;  %v899_v33 = vadd.f32 %v898_v12, %v6602_v25  ;;  %v900_v21 = vpop.f32.mrb[95].mxu1 }
 0x1cd   :  { %v901_v49 = vadd.f32 %v900_v21, %v6607_v24  ;;  %v904_v52 = vpop.f32.mrb[96].mxu1 }
 0x1ce   :  { %v1189_v17 = vmax.f32 %v899_v33, 0.0  ;;  %v906_v28 = vpop.f32.mrb[97].mxu1 }
 0x1cf   :  { %v1190_v54 = vmax.f32 %v901_v49, 0.0 }
 0x1d0   :  { %2156 = vmatmul.mubr.bf16.gmra.mrb[208].mxu0 %v6540_v10  ;;  %v1178_v10 = vmax.f32 %v887_v19, 0.0  ;;  %v905_v19 = vadd.f32 %v904_v52, %v6602_v25 }
 0x1d1   :  { %2165 = vmatprep.mubr.bf16.mxu0 %v6561_v61  ;;  %v1181_v61 = vmax.f32 %v889_v50, 0.0  ;;  %v908_v50 = vpop.f32.mrb[98].mxu1 }
 0x1d2   :  { %v6819_v35 = vpack.c.bf16 %v1182_v2, %v1178_v10  ;;  %v1193_v4 = vmax.f32 %v905_v19, 0.0  ;;  %v909_v10 = vadd.f32 %v908_v50, %v6602_v25  ;;  %v910_v43 = vpop.f32.mrb[99].mxu1 }
 0x1d3   :  { %v6817_v14 = vpack.c.bf16 %v1181_v61, %v1177_v0  ;;  %v907_v0 = vadd.f32 %v906_v28, %v6607_v24  ;;  %v911_v61 = vadd.f32 %v910_v43, %v6607_v24 }
 0x1d5   :  { %v1198_v2 = vmax.f32 %v911_v61, 0.0 }
 0x1d8   :  { %2166 = vmatmul.mubr.bf16.gmra.mrb[212].mxu0 %v6559_v55  ;;  %v897_v55 = vadd.f32 %v896_v16, %v6607_v24 }
 0x1d9   :  { %2175 = vmatprep.mubr.bf16.mxu0 %v6585_v46  ;;  %v1185_v46 = vmax.f32 %v895_v29, 0.0  ;;  %v914_v29 = vpop.f32.mrb[100].mxu1 }
 0x1da   :  { %v1186_v31 = vmax.f32 %v897_v55, 0.0  ;;  %v915_v55 = vadd.f32 %v914_v29, %v6602_v25  ;;  %v916_v12 = vpop.f32.mrb[101].mxu1 }
 0x1db   :  { %v6828_v58 = vpack.c.bf16 %v1189_v17, %v1185_v46  ;;  %v918_v46 = vpop.f32.mrb[102].mxu1 }
 0x1dc   :  { %v6830_v51 = vpack.c.bf16 %v1190_v54, %v1186_v31  ;;  %v919_v33 = vadd.f32 %v918_v46, %v6602_v25  ;;  %v920_v21 = vpop.f32.mrb[103].mxu1 }
 0x1dd   :  { %v921_v49 = vadd.f32 %v920_v21, %v6607_v24  ;;  %v924_v19 = vpop.f32.mrb[104].mxu1 }
 0x1de   :  { %v1205_v17 = vmax.f32 %v919_v33, 0.0  ;;  %v926_v50 = vpop.f32.mrb[105].mxu1 }
 0x1df   :  { %v1206_v54 = vmax.f32 %v921_v49, 0.0 }
 0x1e0   :  { %2176 = vmatmul.mubr.bf16.gmra.mrb[216].mxu0 %v6583_v45  ;;  %v1194_v45 = vmax.f32 %v907_v0, 0.0  ;;  %v925_v0 = vadd.f32 %v924_v19, %v6602_v25 }
 0x1e1   :  { %2185 = vmatprep.mubr.bf16.mxu0 %v6609_v23  ;;  %v1197_v23 = vmax.f32 %v909_v10, 0.0  ;;  %v928_v10 = vpop.f32.mrb[106].mxu1 }
 0x1e2   :  { %v6843_v16 = vpack.c.bf16 %v1198_v2, %v1194_v45  ;;  %v1209_v43 = vmax.f32 %v925_v0, 0.0  ;;  %v929_v45 = vadd.f32 %v928_v10, %v6602_v25  ;;  %v930_v61 = vpop.f32.mrb[107].mxu1 }
 0x1e3   :  { %v6841_v34 = vpack.c.bf16 %v1197_v23, %v1193_v4  ;;  %v927_v4 = vadd.f32 %v926_v50, %v6607_v24  ;;  %v931_v23 = vadd.f32 %v930_v61, %v6607_v24 }
 0x1e5   :  { %v1214_v2 = vmax.f32 %v931_v23, 0.0 }
 0x1e8   :  { %2186 = vmatmul.mubr.bf16.gmra.mrb[220].mxu0 %v6604_v36  ;;  %v917_v36 = vadd.f32 %v916_v12, %v6607_v24 }
 0x1e9   :  { %2228 = vmatprep.mubr.bf16.mxu0 %v6627_v26  ;;  %v1201_v26 = vmax.f32 %v915_v55, 0.0  ;;  %v934_v55 = vpop.f32.mrb[108].mxu1 }
 0x1ea   :  { %v1202_v31 = vmax.f32 %v917_v36, 0.0  ;;  %v935_v36 = vadd.f32 %v934_v55, %v6602_v25  ;;  %v936_v46 = vpop.f32.mrb[109].mxu1 }
 0x1eb   :  { %v6852_v52 = vpack.c.bf16 %v1205_v17, %v1201_v26  ;;  %v938_v26 = vpop.f32.mrb[110].mxu1 }
 0x1ec   :  { %v6854_v28 = vpack.c.bf16 %v1206_v54, %v1202_v31  ;;  %v939_v33 = vadd.f32 %v938_v26, %v6602_v25  ;;  %v940_v21 = vpop.f32.mrb[111].mxu1 }
 0x1ed   :  { %v941_v49 = vadd.f32 %v940_v21, %v6607_v24  ;;  %v944_v0 = vpop.f32.mrb[112].mxu1 }
 0x1ee   :  { %v1221_v17 = vmax.f32 %v939_v33, 0.0  ;;  %v946_v10 = vpop.f32.mrb[113].mxu1 }
 0x1ef   :  { %v1222_v54 = vmax.f32 %v941_v49, 0.0 }
 0x1f0   :  { %2229 = vmatmul.mubr.bf16.vlgmr.msra.gmra.mrb[96].mxu0 %v6625_v37  ;;  %v1210_v37 = vmax.f32 %v927_v4, 0.0  ;;  %v945_v4 = vadd.f32 %v944_v0, %v6602_v25 }
 0x1f1   :  { %2238 = vmatprep.mubr.bf16.mxu0 %v6643_v3  ;;  %v1213_v3 = vmax.f32 %v929_v45, 0.0  ;;  %v948_v45 = vpop.f32.mrb[114].mxu1 }
 0x1f2   :  { %v6867_v12 = vpack.c.bf16 %v1214_v2, %v1210_v37  ;;  %v1225_v61 = vmax.f32 %v945_v4, 0.0  ;;  %v949_v37 = vadd.f32 %v948_v45, %v6602_v25  ;;  %v950_v23 = vpop.f32.mrb[115].mxu1 }
 0x1f3   :  { %v6865_v29 = vpack.c.bf16 %v1213_v3, %v1209_v43  ;;  %v947_v43 = vadd.f32 %v946_v10, %v6607_v24  ;;  %v951_v3 = vadd.f32 %v950_v23, %v6607_v24 }
 0x1f5   :  { %v1230_v2 = vmax.f32 %v951_v3, 0.0 }
 0x1f8   :  { %2239 = vmatmul.mubr.bf16.gmra.mrb[100].mxu0 %v6641_v63  ;;  %v937_v63 = vadd.f32 %v936_v46, %v6607_v24 }
 0x1f9   :  { %2248 = vmatprep.mubr.bf16.mxu0 %v6661_v62  ;;  %v1217_v62 = vmax.f32 %v935_v36, 0.0  ;;  %v954_v36 = vpop.f32.mrb[116].mxu1 }
 0x1fa   :  { %v1218_v31 = vmax.f32 %v937_v63, 0.0  ;;  %v955_v63 = vadd.f32 %v954_v36, %v6602_v25  ;;  %v956_v26 = vpop.f32.mrb[117].mxu1 }
 0x1fb   :  { %v6876_v19 = vpack.c.bf16 %v1221_v17, %v1217_v62  ;;  %v958_v62 = vpop.f32.mrb[118].mxu1 }
 0x1fc   :  { %v6878_v50 = vpack.c.bf16 %v1222_v54, %v1218_v31  ;;  %v959_v33 = vadd.f32 %v958_v62, %v6602_v25  ;;  %v960_v21 = vpop.f32.mrb[119].mxu1 }
 0x1fd   :  { %v961_v49 = vadd.f32 %v960_v21, %v6607_v24  ;;  %v964_v4 = vpop.f32.mrb[120].mxu1 }
 0x1fe   :  { %v1237_v17 = vmax.f32 %v959_v33, 0.0  ;;  %v966_v45 = vpop.f32.mrb[121].mxu1 }
 0x1ff   :  { %v1238_v54 = vmax.f32 %v961_v49, 0.0 }
 0x200   :  { %2249 = vmatmul.mubr.bf16.gmra.mrb[104].mxu0 %v6659_v30  ;;  %v1226_v30 = vmax.f32 %v947_v43, 0.0  ;;  %v965_v43 = vadd.f32 %v964_v4, %v6602_v25 }
 0x201   :  { %2258 = vmatprep.mubr.bf16.mxu0 %v6677_v53  ;;  %v1229_v53 = vmax.f32 %v949_v37, 0.0  ;;  %v968_v37 = vpop.f32.mrb[122].mxu1 }
 0x202   :  { %v6891_v46 = vpack.c.bf16 %v1230_v2, %v1226_v30  ;;  %v1241_v23 = vmax.f32 %v965_v43, 0.0  ;;  %v969_v30 = vadd.f32 %v968_v37, %v6602_v25  ;;  %v970_v3 = vpop.f32.mrb[123].mxu1 }
 0x203   :  { %v6889_v55 = vpack.c.bf16 %v1229_v53, %v1225_v61  ;;  %v967_v61 = vadd.f32 %v966_v45, %v6607_v24  ;;  %v971_v53 = vadd.f32 %v970_v3, %v6607_v24 }
 0x205   :  { %v1246_v2 = vmax.f32 %v971_v53, 0.0 }
 0x208   :  { %2259 = vmatmul.mubr.bf16.gmra.mrb[108].mxu0 %v6675_v47  ;;  %v957_v47 = vadd.f32 %v956_v26, %v6607_v24 }
 0x209   :  { %2268 = vmatprep.mubr.bf16.mxu0 %v6694_v48  ;;  %v1233_v48 = vmax.f32 %v955_v63, 0.0  ;;  %v974_v63 = vpop.f32.mrb[124].mxu1 }
 0x20a   :  { %v1234_v31 = vmax.f32 %v957_v47, 0.0  ;;  %v975_v47 = vadd.f32 %v974_v63, %v6602_v25  ;;  %v976_v62 = vpop.f32.mrb[125].mxu1 }
 0x20b   :  { %v6900_v0 = vpack.c.bf16 %v1237_v17, %v1233_v48  ;;  %v978_v48 = vpop.f32.mrb[126].mxu1 }
 0x20c   :  { %v6902_v10 = vpack.c.bf16 %v1238_v54, %v1234_v31  ;;  %v979_v33 = vadd.f32 %v978_v48, %v6602_v25  ;;  %v980_v21 = vpop.f32.mrb[127].mxu1 }
 0x20d   :  { %v981_v49 = vadd.f32 %v980_v21, %v6607_v24  ;;  %v984_v43 = vpop.f32.mrb[128].mxu1 }
 0x20e   :  { %v1253_v17 = vmax.f32 %v979_v33, 0.0  ;;  %v986_v37 = vpop.f32.mrb[129].mxu1 }
 0x20f   :  { %v1254_v54 = vmax.f32 %v981_v49, 0.0 }
 0x210   :  { %2269 = vmatmul.mubr.bf16.gmra.mrb[112].mxu0 %v6692_v56  ;;  %v1242_v56 = vmax.f32 %v967_v61, 0.0  ;;  %v985_v61 = vadd.f32 %v984_v43, %v6602_v25 }
 0x211   :  { %2278 = vmatprep.mubr.bf16.mxu0 %v6707_v44  ;;  %v1245_v44 = vmax.f32 %v969_v30, 0.0  ;;  %v988_v30 = vpop.f32.mrb[130].mxu1 }
 0x212   :  { %v6915_v26 = vpack.c.bf16 %v1246_v2, %v1242_v56  ;;  %v1257_v3 = vmax.f32 %v985_v61, 0.0  ;;  %v989_v56 = vadd.f32 %v988_v30, %v6602_v25  ;;  %v990_v53 = vpop.f32.mrb[131].mxu1 }
 0x213   :  { %v6913_v36 = vpack.c.bf16 %v1245_v44, %v1241_v23  ;;  %v987_v23 = vadd.f32 %v986_v37, %v6607_v24  ;;  %v991_v44 = vadd.f32 %v990_v53, %v6607_v24 }
 0x215   :  { %v1262_v2 = vmax.f32 %v991_v44, 0.0 }
 0x218   :  { %2279 = vmatmul.mubr.bf16.gmra.mrb[116].mxu0 %v6705_v59  ;;  %v977_v59 = vadd.f32 %v976_v62, %v6607_v24 }
 0x219   :  { %2288 = vmatprep.mubr.bf16.mxu0 %v6722_v32  ;;  %v1249_v32 = vmax.f32 %v975_v47, 0.0  ;;  %v994_v47 = vpop.f32.mrb[132].mxu1 }
 0x21a   :  { %v1250_v31 = vmax.f32 %v977_v59, 0.0  ;;  %v995_v59 = vadd.f32 %v994_v47, %v6602_v25  ;;  %v996_v48 = vpop.f32.mrb[133].mxu1 }
 0x21b   :  { %v6924_v4 = vpack.c.bf16 %v1253_v17, %v1249_v32  ;;  %v998_v32 = vpop.f32.mrb[134].mxu1 }
 0x21c   :  { %v6926_v45 = vpack.c.bf16 %v1254_v54, %v1250_v31  ;;  %v999_v33 = vadd.f32 %v998_v32, %v6602_v25  ;;  %v1000_v21 = vpop.f32.mrb[135].mxu1 }
 0x21d   :  { %v1001_v49 = vadd.f32 %v1000_v21, %v6607_v24  ;;  %v1004_v61 = vpop.f32.mrb[136].mxu1 }
 0x21e   :  { %v1269_v17 = vmax.f32 %v999_v33, 0.0  ;;  %v1005_v37 = vadd.f32 %v1004_v61, %v6602_v25 }
 0x21f   :  { %v1270_v54 = vmax.f32 %v1001_v49, 0.0 }
 0x220   :  { %2289 = vmatmul.mubr.bf16.gmra.mrb[120].mxu0 %v6720_v22  ;;  %v1258_v22 = vmax.f32 %v987_v23, 0.0  ;;  %v1006_v23 = vpop.f32.mrb[137].mxu1 }
 0x221   :  { %2298 = vmatprep.mubr.bf16.mxu0 %v6735_v7  ;;  %v1261_v7 = vmax.f32 %v989_v56, 0.0  ;;  %v1007_v30 = vadd.f32 %v1006_v23, %v6607_v24  ;;  %v1273_v56 = vmax.f32 %v1005_v37, 0.0 }
 0x222   :  { %v6939_v62 = vpack.c.bf16 %v1262_v2, %v1258_v22  ;;  %v5688_v2 = vld [vmem:[%s7835_s5 + $0x78] sm:$0xff]  }
 0x223   :  { %v6937_v63 = vpack.c.bf16 %v1261_v7, %v1257_v3  ;;  %v1008_v3 = vpop.f32.mrb[138].mxu1  ;;  %2907 = vmatpush1.bf16.msra.mxu1 %v5688_v2 }
 0x224   :  { %v1009_v53 = vadd.f32 %v1008_v3, %v6602_v25  ;;  %v1010_v22 = vpop.f32.mrb[139].mxu1 }
 0x225   :  { %v1011_v44 = vadd.f32 %v1010_v22, %v6607_v24  ;;  %v1014_v47 = vpop.f32.mrb[140].mxu1 }
 0x227   :  { %v1278_v7 = vmax.f32 %v1011_v44, 0.0 }
 0x228   :  { %2299 = vmatmul.mubr.bf16.gmra.mrb[124].mxu0 %v6733_v41  ;;  %v997_v41 = vadd.f32 %v996_v48, %v6607_v24  ;;  %v1015_v48 = vadd.f32 %v1014_v47, %v6602_v25 }
 0x229   :  { %2308 = vmatprep.mubr.bf16.mxu0 %v6747_v13  ;;  %v1265_v13 = vmax.f32 %v995_v59, 0.0 }
 0x22a   :  { %v1266_v31 = vmax.f32 %v997_v41, 0.0  ;;  %v1016_v41 = vpop.f32.mrb[141].mxu1 }
 0x22b   :  { %v6948_v43 = vpack.c.bf16 %v1269_v17, %v1265_v13  ;;  %v1017_v32 = vadd.f32 %v1016_v41, %v6607_v24  ;;  %v1281_v13 = vmax.f32 %v1015_v48, 0.0 }
 0x22c   :  { %v6950_v1 = vpack.c.bf16 %v1270_v54, %v1266_v31 }
 0x22d   :  { %v1282_v21 = vmax.f32 %v1017_v32, 0.0 }
 0x230   :  { %2309 = vmatmul.mubr.bf16.gmra.mrb[128].mxu0 %v6745_v8  ;;  %v1274_v8 = vmax.f32 %v1007_v30, 0.0 }
 0x231   :  { %2318 = vmatprep.mubr.bf16.mxu0 %v6758_v9  ;;  %v1277_v9 = vmax.f32 %v1009_v53, 0.0 }
 0x232   :  { %v6963_v59 = vpack.c.bf16 %v1278_v7, %v1274_v8 }
 0x233   :  { %v6961_v6 = vpack.c.bf16 %v1277_v9, %v1273_v56 }
 0x238   :  { %2319 = vmatmul.mubr.bf16.gmra.mrb[132].mxu0 %v6756_v27  ;;  %v1018_v27 = vpop.f32.mrb[142].mxu1 }
 0x239   :  { %2328 = vmatprep.mubr.bf16.mxu0 %v6771_v40  ;;  %v1019_v40 = vadd.f32 %v1018_v27, %v6602_v25  ;;  %v1020_v33 = vpop.f32.mrb[143].mxu1 }
 0x23a   :  { %v1021_v31 = vadd.f32 %v1020_v33, %v6607_v24  ;;  %v1024_v61 = vpop.f32.mrb[144].mxu1 }
 0x23b   :  { %v1285_v49 = vmax.f32 %v1019_v40, 0.0  ;;  %v1025_v23 = vadd.f32 %v1024_v61, %v6602_v25  ;;  %v1026_v30 = vpop.f32.mrb[145].mxu1 }
 0x23c   :  { %v1286_v17 = vmax.f32 %v1021_v31, 0.0  ;;  %v1027_v3 = vadd.f32 %v1026_v30, %v6607_v24  ;;  %v1028_v56 = vpop.f32.mrb[146].mxu1 }
 0x23d   :  { %v6971_v54 = vpack.c.bf16 %v1285_v49, %v1281_v13  ;;  %v1289_v53 = vmax.f32 %v1025_v23, 0.0  ;;  %v1029_v22 = vadd.f32 %v1028_v56, %v6602_v25  ;;  %v1030_v8 = vpop.f32.mrb[147].mxu1 }
 0x23e   :  { %v6973_v37 = vpack.c.bf16 %v1286_v17, %v1282_v21  ;;  %v1031_v44 = vadd.f32 %v1030_v8, %v6607_v24  ;;  %v1034_v2 = vpop.f32.mrb[148].mxu1 }
 0x23f   :  { %v1035_v48 = vadd.f32 %v1034_v2, %v6602_v25  ;;  %v1036_v41 = vpop.f32.mrb[149].mxu1 }
 0x240   :  { %2329 = vmatmul.mubr.bf16.gmra.mrb[136].mxu0 %v6769_v11  ;;  %v1290_v11 = vmax.f32 %v1027_v3, 0.0  ;;  %v1294_v9 = vmax.f32 %v1031_v44, 0.0  ;;  %v1037_v32 = vadd.f32 %v1036_v41, %v6607_v24  ;;  %v1038_v27 = vpop.f32.mrb[150].mxu1 }
 0x241   :  { %2338 = vmatprep.mubr.bf16.mxu0 %v6782_v39  ;;  %v1293_v39 = vmax.f32 %v1029_v22, 0.0  ;;  %v1297_v13 = vmax.f32 %v1035_v48, 0.0  ;;  %v1039_v40 = vadd.f32 %v1038_v27, %v6602_v25  ;;  %v1040_v33 = vpop.f32.mrb[151].mxu1 }
 0x242   :  { %v6983_v47 = vpack.c.bf16 %v1294_v9, %v1290_v11  ;;  %v1041_v21 = vadd.f32 %v1040_v33, %v6607_v24  ;;  %v1044_v17 = vpop.f32.mrb[152].mxu1 }
 0x243   :  { %v6981_v7 = vpack.c.bf16 %v1293_v39, %v1289_v53  ;;  %v1045_v23 = vadd.f32 %v1044_v17, %v6602_v25  ;;  %v1046_v30 = vpop.f32.mrb[153].mxu1 }
 0x244   :  { %v1302_v31 = vmax.f32 %v1041_v21, 0.0  ;;  %v1047_v3 = vadd.f32 %v1046_v30, %v6607_v24  ;;  %v1048_v56 = vpop.f32.mrb[154].mxu1 }
 0x245   :  { %v1305_v53 = vmax.f32 %v1045_v23, 0.0  ;;  %v1049_v22 = vadd.f32 %v1048_v56, %v6602_v25  ;;  %v1050_v8 = vpop.f32.mrb[155].mxu1 }
 0x246   :  { %v1051_v11 = vadd.f32 %v1050_v8, %v6607_v24  ;;  %v1054_v9 = vpop.f32.mrb[156].mxu1 }
 0x247   :  { %v1055_v48 = vadd.f32 %v1054_v9, %v6602_v25  ;;  %v1056_v41 = vpop.f32.mrb[157].mxu1 }
 0x248   :  { %2339 = vmatmul.mubr.bf16.gmra.mrb[140].mxu0 %v6780_v57  ;;  %v1298_v57 = vmax.f32 %v1037_v32, 0.0  ;;  %v1310_v44 = vmax.f32 %v1051_v11, 0.0  ;;  %v1057_v32 = vadd.f32 %v1056_v41, %v6607_v24  ;;  %v1058_v27 = vpop.f32.mrb[158].mxu1 }
 0x249   :  { %2348 = vmatprep.mubr.bf16.mxu0 %v6795_v18  ;;  %v1301_v18 = vmax.f32 %v1039_v40, 0.0  ;;  %v1059_v40 = vadd.f32 %v1058_v27, %v6602_v25  ;;  %v1060_v33 = vpop.f32.mrb[159].mxu1  ;;  %v5689_v25 = vld [vmem:[%s7836_s7] sm:$0xff]  }
 0x24a   :  { %v6993_v61 = vpack.c.bf16 %v1302_v31, %v1298_v57  ;;  %v1061_v57 = vadd.f32 %v1060_v33, %v6607_v24  ;;  %5070 = vmatprep.subr.bf16.mxu1 %v5689_v25  ;;  %v1511_v24 = vld [vmem:[%s7837_s4] sm:$0x3] }
 0x24b   :  { %v6991_v49 = vpack.c.bf16 %v1301_v18, %v1297_v13  ;;  %v1313_v13 = vmax.f32 %v1055_v48, 0.0 }
 0x24c   :  { %v1318_v21 = vmax.f32 %v1061_v57, 0.0 }
 0x250   :  { %2349 = vmatmul.mubr.bf16.gmra.mrb[144].mxu0 %v6793_v15  ;;  %v1306_v15 = vmax.f32 %v1047_v3, 0.0 }
 0x251   :  { %2358 = vmatprep.mubr.bf16.mxu0 %v6806_v20  ;;  %v1309_v20 = vmax.f32 %v1049_v22, 0.0 }
 0x252   :  { %v7003_v2 = vpack.c.bf16 %v1310_v44, %v1306_v15 }
 0x253   :  { %v7001_v39 = vpack.c.bf16 %v1309_v20, %v1305_v53 }
 0x258   :  { %2359 = vmatmul.mubr.bf16.gmra.mrb[148].mxu0 %v6804_v5  ;;  %v1314_v5 = vmax.f32 %v1057_v32, 0.0 }
 0x259   :  { %2368 = vmatprep.mubr.bf16.mxu0 %v6819_v35  ;;  %v1317_v35 = vmax.f32 %v1059_v40, 0.0 }
 0x25a   :  { %v7013_v31 = vpack.c.bf16 %v1318_v21, %v1314_v5 }
 0x25b   :  { %v7011_v18 = vpack.c.bf16 %v1317_v35, %v1313_v13 }
 0x260   :  { %2369 = vmatmul.mubr.bf16.gmra.mrb[152].mxu0 %v6817_v14  ;;  %v7046_v14 = vrot.slane %v1511_v24, %v159_v60 }
 0x261   :  { %2378 = vmatprep.mubr.bf16.mxu0 %v6830_v51 }
 0x268   :  { %2379 = vmatmul.mubr.bf16.gmra.mrb[156].mxu0 %v6828_v58  ;;  %v7050_v58 = vrot.slane %v1511_v24, %v163_v42 }
 0x269   :  { %2388 = vmatprep.mubr.bf16.mxu0 %v6843_v16 }
 0x270   :  { %2389 = vmatmul.mubr.bf16.gmra.mrb[160].mxu0 %v6841_v34 }
 0x271   :  { %2398 = vmatprep.mubr.bf16.mxu0 %v6854_v28 }
 0x278   :  { %2399 = vmatmul.mubr.bf16.gmra.mrb[164].mxu0 %v6852_v52 }
 0x279   :  { %2408 = vmatprep.mubr.bf16.mxu0 %v6867_v12 }
 0x280   :  { %2409 = vmatmul.mubr.bf16.gmra.mrb[168].mxu0 %v6865_v29 }
 0x281   :  { %2418 = vmatprep.mubr.bf16.mxu0 %v6878_v50 }
 0x288   :  { %2419 = vmatmul.mubr.bf16.gmra.mrb[172].mxu0 %v6876_v19 }
 0x289   :  { %2428 = vmatprep.mubr.bf16.mxu0 %v6891_v46 }
 0x290   :  { %2429 = vmatmul.mubr.bf16.gmra.mrb[176].mxu0 %v6889_v55 }
 0x291   :  { %2438 = vmatprep.mubr.bf16.mxu0 %v6902_v10 }
 0x298   :  { %2439 = vmatmul.mubr.bf16.gmra.mrb[180].mxu0 %v6900_v0 }
 0x299   :  { %2448 = vmatprep.mubr.bf16.mxu0 %v6915_v26  ;;  %v5690_v26 = vld [vmem:[%s7836_s7 + $0x8] sm:$0xff]  }
 0x2a0   :  { %2449 = vmatmul.mubr.bf16.gmra.mrb[184].mxu0 %v6913_v36 }
 0x2a1   :  { %2458 = vmatprep.mubr.bf16.mxu0 %v6926_v45 }
 0x2a8   :  { %2459 = vmatmul.mubr.bf16.gmra.mrb[188].mxu0 %v6924_v4 }
 0x2a9   :  { %2468 = vmatprep.mubr.bf16.mxu0 %v6939_v62 }
 0x2b0   :  { %2469 = vmatmul.mubr.bf16.gmra.mrb[192].mxu0 %v6937_v63 }
 0x2b1   :  { %2478 = vmatprep.mubr.bf16.mxu0 %v6950_v1 }
 0x2b8   :  { %2479 = vmatmul.mubr.bf16.gmra.mrb[196].mxu0 %v6948_v43 }
 0x2b9   :  { %2488 = vmatprep.mubr.bf16.mxu0 %v6963_v59 }
 0x2c0   :  { %2489 = vmatmul.mubr.bf16.gmra.mrb[200].mxu0 %v6961_v6 }
 0x2c1   :  { %2498 = vmatprep.mubr.bf16.mxu0 %v6973_v37 }
 0x2c3   :  { %v2230_v51 = vpop.f32.mrb[96].mxu0 }
 0x2c4   :  { %v5298_v34 = vadd.f32 %v2230_v51, %v7046_v14  ;;  %v2232_v16 = vpop.f32.mrb[97].mxu0 }
 0x2c5   :  { %v5299_v52 = vadd.f32 %v2232_v16, %v7050_v58  ;;  %v2234_v28 = vpop.f32.mrb[98].mxu0 }
 0x2c6   :  { %v5300_v29 = vadd.f32 %v2234_v28, %v7046_v14  ;;  %v2236_v12 = vpop.f32.mrb[99].mxu0  ;;  %v2549_v60 = vmax.f32 %v5298_v34, 0.0 }
 0x2c7   :  { %v5301_v19 = vadd.f32 %v2236_v12, %v7050_v58  ;;  %v2550_v38 = vmax.f32 %v5299_v52, 0.0 }
 0x2c8   :  { %v2551_v50 = vmax.f32 %v5300_v29, 0.0  ;;  %2499 = vmatmul.mubr.bf16.gmra.mrb[204].mxu0 %v6971_v54 }
 0x2c9   :  { %v2552_v42 = vmax.f32 %v5301_v19, 0.0  ;;  %2508 = vmatprep.mubr.bf16.mxu0 %v6983_v47 }
 0x2ca   :  { %v2677_v55 = vpack.c.bf16 %v2551_v50, %v2549_v60 }
 0x2cb   :  { %v2678_v46 = vpack.c.bf16 %v2552_v42, %v2550_v38  ;;  %v2240_v0 = vpop.f32.mrb[100].mxu0  ;;  %v5691_v42 = vld [vmem:[%s7836_s7 + $0x10] sm:$0xff]  }
 0x2cc   :  { %v5302_v10 = vadd.f32 %v2240_v0, %v7046_v14  ;;  %v2242_v36 = vpop.f32.mrb[101].mxu0 }
 0x2cd   :  { %v5303_v4 = vadd.f32 %v2242_v36, %v7050_v58  ;;  %v2244_v45 = vpop.f32.mrb[102].mxu0  ;;  %2908 = vmatprep.mubr.bf16.mxu1 %v2678_v46 }
 0x2ce   :  { %v5304_v63 = vadd.f32 %v2244_v45, %v7046_v14  ;;  %v2246_v62 = vpop.f32.mrb[103].mxu0  ;;  %2909 = vmatmul.mubr.bf16.vlgmr.msra.gmra.mrb[160].mxu1 %v2677_v55  ;;  %v2553_v1 = vmax.f32 %v5302_v10, 0.0 }
 0x2cf   :  { %v5305_v43 = vadd.f32 %v2246_v62, %v7050_v58  ;;  %5071 = vmatpush3.bf16.msra.mxu1 %v5689_v25  ;;  %v2554_v59 = vmax.f32 %v5303_v4, 0.0 }
 0x2d0   :  { %v2555_v6 = vmax.f32 %v5304_v63, 0.0  ;;  %2509 = vmatmul.mubr.bf16.gmra.mrb[208].mxu0 %v6981_v7  ;;  %5072 = vmatprep.subr.bf16.mxu1 %v5690_v26 }
 0x2d1   :  { %v2556_v54 = vmax.f32 %v5305_v43, 0.0  ;;  %2518 = vmatprep.mubr.bf16.mxu0 %v6993_v61 }
 0x2d2   :  { %v2679_v37 = vpack.c.bf16 %v2555_v6, %v2553_v1 }
 0x2d3   :  { %v2680_v47 = vpack.c.bf16 %v2556_v54, %v2554_v59  ;;  %v2250_v17 = vpop.f32.mrb[104].mxu0  ;;  %5073 = vmatpush3.bf16.msra.mxu1 %v5690_v26 }
 0x2d4   :  { %v5306_v23 = vadd.f32 %v2250_v17, %v7046_v14  ;;  %v2252_v30 = vpop.f32.mrb[105].mxu0  ;;  %5074 = vmatprep.subr.bf16.mxu1 %v5691_v42 }
 0x2d5   :  { %v5307_v3 = vadd.f32 %v2252_v30, %v7050_v58  ;;  %v2254_v56 = vpop.f32.mrb[106].mxu0  ;;  %2916 = vmatprep.mubr.bf16.mxu1 %v2680_v47 }
 0x2d6   :  { %v5308_v53 = vadd.f32 %v2254_v56, %v7046_v14  ;;  %v2256_v22 = vpop.f32.mrb[107].mxu0  ;;  %2917 = vmatmul.mubr.bf16.gmra.mrb[164].mxu1 %v2679_v37  ;;  %v2557_v8 = vmax.f32 %v5306_v23, 0.0 }
 0x2d7   :  { %v5309_v7 = vadd.f32 %v2256_v22, %v7050_v58  ;;  %v2558_v61 = vmax.f32 %v5307_v3, 0.0  ;;  %5075 = vmatpush3.bf16.msra.mxu1 %v5691_v42 }
 0x2d8   :  { %v2559_v15 = vmax.f32 %v5308_v53, 0.0  ;;  %2519 = vmatmul.mubr.bf16.gmra.mrb[212].mxu0 %v6991_v49 }
 0x2d9   :  { %v2560_v11 = vmax.f32 %v5309_v7, 0.0  ;;  %2528 = vmatprep.mubr.bf16.mxu0 %v7003_v2 }
 0x2da   :  { %v2681_v20 = vpack.c.bf16 %v2559_v15, %v2557_v8 }
 0x2db   :  { %v2682_v44 = vpack.c.bf16 %v2560_v11, %v2558_v61  ;;  %v2260_v9 = vpop.f32.mrb[108].mxu0 }
 0x2dc   :  { %v5310_v48 = vadd.f32 %v2260_v9, %v7046_v14  ;;  %v2262_v41 = vpop.f32.mrb[109].mxu0 }
 0x2dd   :  { %v5311_v32 = vadd.f32 %v2262_v41, %v7050_v58  ;;  %v2264_v27 = vpop.f32.mrb[110].mxu0  ;;  %2924 = vmatprep.mubr.bf16.mxu1 %v2682_v44 }
 0x2de   :  { %v5312_v13 = vadd.f32 %v2264_v27, %v7046_v14  ;;  %v2266_v40 = vpop.f32.mrb[111].mxu0  ;;  %2925 = vmatmul.mubr.bf16.gmra.mrb[168].mxu1 %v2681_v20  ;;  %v2561_v33 = vmax.f32 %v5310_v48, 0.0 }
 0x2df   :  { %v5313_v49 = vadd.f32 %v2266_v40, %v7050_v58  ;;  %v2562_v2 = vmax.f32 %v5311_v32, 0.0 }
 0x2e0   :  { %v2563_v5 = vmax.f32 %v5312_v13, 0.0  ;;  %2529 = vmatmul.mubr.bf16.gmra.mrb[216].mxu0 %v7001_v39 }
 0x2e1   :  { %v2564_v57 = vmax.f32 %v5313_v49, 0.0  ;;  %2538 = vmatprep.mubr.bf16.mxu0 %v7013_v31 }
 0x2e2   :  { %v2683_v35 = vpack.c.bf16 %v2563_v5, %v2561_v33 }
 0x2e3   :  { %v2684_v21 = vpack.c.bf16 %v2564_v57, %v2562_v2  ;;  %v2270_v25 = vpop.f32.mrb[112].mxu0 }
 0x2e4   :  { %v5314_v24 = vadd.f32 %v2270_v25, %v7046_v14  ;;  %v2272_v51 = vpop.f32.mrb[113].mxu0 }
 0x2e5   :  { %v5315_v34 = vadd.f32 %v2272_v51, %v7050_v58  ;;  %v2274_v16 = vpop.f32.mrb[114].mxu0  ;;  %2932 = vmatprep.mubr.bf16.mxu1 %v2684_v21 }
 0x2e6   :  { %v5316_v52 = vadd.f32 %v2274_v16, %v7046_v14  ;;  %v2276_v28 = vpop.f32.mrb[115].mxu0  ;;  %2933 = vmatmul.mubr.bf16.gmra.mrb[172].mxu1 %v2683_v35  ;;  %v2565_v29 = vmax.f32 %v5314_v24, 0.0 }
 0x2e7   :  { %v5317_v39 = vadd.f32 %v2276_v28, %v7050_v58  ;;  %v2566_v31 = vmax.f32 %v5315_v34, 0.0 }
 0x2e8   :  { %v2567_v12 = vmax.f32 %v5316_v52, 0.0  ;;  %2539 = vmatmul.mubr.bf16.gmra.mrb[220].mxu0 %v7011_v18 }
 0x2e9   :  { %v2568_v19 = vmax.f32 %v5317_v39, 0.0 }
 0x2ea   :  { %v2685_v60 = vpack.c.bf16 %v2567_v12, %v2565_v29 }
 0x2eb   :  { %v2686_v50 = vpack.c.bf16 %v2568_v19, %v2566_v31  ;;  %v2280_v38 = vpop.f32.mrb[116].mxu0  ;;  %v5692_v31 = vld [vmem:[%s7836_s7 + $0x18] sm:$0xff]  }
 0x2ec   :  { %v5318_v55 = vadd.f32 %v2280_v38, %v7046_v14  ;;  %v2282_v46 = vpop.f32.mrb[117].mxu0  ;;  %5076 = vmatprep.subr.bf16.mxu1 %v5692_v31 }
 0x2ed   :  { %v5319_v0 = vadd.f32 %v2282_v46, %v7050_v58  ;;  %v2284_v10 = vpop.f32.mrb[118].mxu0  ;;  %2940 = vmatprep.mubr.bf16.mxu1 %v2686_v50  ;;  %5077 = vmatpush3.bf16.msra.mxu1 %v5692_v31 }
 0x2ee   :  { %v5320_v36 = vadd.f32 %v2284_v10, %v7046_v14  ;;  %v2286_v18 = vpop.f32.mrb[119].mxu0  ;;  %2941 = vmatmul.mubr.bf16.gmra.mrb[176].mxu1 %v2685_v60  ;;  %v2569_v4 = vmax.f32 %v5318_v55, 0.0 }
 0x2ef   :  { %v5321_v26 = vadd.f32 %v2286_v18, %v7050_v58  ;;  %v2570_v63 = vmax.f32 %v5319_v0, 0.0 }
 0x2f0   :  { %v2571_v45 = vmax.f32 %v5320_v36, 0.0 }
 0x2f1   :  { %v2572_v62 = vmax.f32 %v5321_v26, 0.0 }
 0x2f2   :  { %v2687_v43 = vpack.c.bf16 %v2571_v45, %v2569_v4 }
 0x2f3   :  { %v2688_v1 = vpack.c.bf16 %v2572_v62, %v2570_v63  ;;  %v2290_v6 = vpop.f32.mrb[120].mxu0 }
 0x2f4   :  { %v5322_v59 = vadd.f32 %v2290_v6, %v7046_v14  ;;  %v2292_v54 = vpop.f32.mrb[121].mxu0 }
 0x2f5   :  { %v5323_v37 = vadd.f32 %v2292_v54, %v7050_v58  ;;  %v2294_v47 = vpop.f32.mrb[122].mxu0  ;;  %2948 = vmatprep.mubr.bf16.mxu1 %v2688_v1 }
 0x2f6   :  { %v5324_v17 = vadd.f32 %v2294_v47, %v7046_v14  ;;  %v2296_v23 = vpop.f32.mrb[123].mxu0  ;;  %2949 = vmatmul.mubr.bf16.gmra.mrb[180].mxu1 %v2687_v43  ;;  %v2573_v3 = vmax.f32 %v5322_v59, 0.0 }
 0x2f7   :  { %v5325_v30 = vadd.f32 %v2296_v23, %v7050_v58  ;;  %v2574_v53 = vmax.f32 %v5323_v37, 0.0 }
 0x2f8   :  { %v2575_v56 = vmax.f32 %v5324_v17, 0.0 }
 0x2f9   :  { %v2576_v22 = vmax.f32 %v5325_v30, 0.0 }
 0x2fa   :  { %v2689_v7 = vpack.c.bf16 %v2575_v56, %v2573_v3 }
 0x2fb   :  { %v2690_v8 = vpack.c.bf16 %v2576_v22, %v2574_v53  ;;  %v2300_v15 = vpop.f32.mrb[124].mxu0 }
 0x2fc   :  { %v5326_v61 = vadd.f32 %v2300_v15, %v7046_v14  ;;  %v2302_v11 = vpop.f32.mrb[125].mxu0 }
 0x2fd   :  { %v5327_v20 = vadd.f32 %v2302_v11, %v7050_v58  ;;  %v2304_v44 = vpop.f32.mrb[126].mxu0  ;;  %2956 = vmatprep.mubr.bf16.mxu1 %v2690_v8 }
 0x2fe   :  { %v5328_v9 = vadd.f32 %v2304_v44, %v7046_v14  ;;  %v2306_v48 = vpop.f32.mrb[127].mxu0  ;;  %2957 = vmatmul.mubr.bf16.gmra.mrb[184].mxu1 %v2689_v7  ;;  %v2577_v32 = vmax.f32 %v5326_v61, 0.0 }
 0x2ff   :  { %v5329_v41 = vadd.f32 %v2306_v48, %v7050_v58  ;;  %v2578_v13 = vmax.f32 %v5327_v20, 0.0 }
 0x300   :  { %v2579_v27 = vmax.f32 %v5328_v9, 0.0 }
 0x301   :  { %v2580_v40 = vmax.f32 %v5329_v41, 0.0 }
 0x302   :  { %v2691_v49 = vpack.c.bf16 %v2579_v27, %v2577_v32 }
 0x303   :  { %v2692_v33 = vpack.c.bf16 %v2580_v40, %v2578_v13  ;;  %v2310_v5 = vpop.f32.mrb[128].mxu0 }
 0x304   :  { %v5330_v2 = vadd.f32 %v2310_v5, %v7046_v14  ;;  %v2312_v57 = vpop.f32.mrb[129].mxu0 }
 0x305   :  { %v5331_v35 = vadd.f32 %v2312_v57, %v7050_v58  ;;  %v2314_v21 = vpop.f32.mrb[130].mxu0  ;;  %2964 = vmatprep.mubr.bf16.mxu1 %v2692_v33 }
 0x306   :  { %v5332_v25 = vadd.f32 %v2314_v21, %v7046_v14  ;;  %v2316_v24 = vpop.f32.mrb[131].mxu0  ;;  %2965 = vmatmul.mubr.bf16.gmra.mrb[188].mxu1 %v2691_v49  ;;  %v2581_v34 = vmax.f32 %v5330_v2, 0.0 }
 0x307   :  { %v5333_v51 = vadd.f32 %v2316_v24, %v7050_v58  ;;  %v2582_v52 = vmax.f32 %v5331_v35, 0.0 }
 0x308   :  { %v2583_v16 = vmax.f32 %v5332_v25, 0.0 }
 0x309   :  { %v2584_v28 = vmax.f32 %v5333_v51, 0.0 }
 0x30a   :  { %v2693_v39 = vpack.c.bf16 %v2583_v16, %v2581_v34 }
 0x30b   :  { %v2694_v29 = vpack.c.bf16 %v2584_v28, %v2582_v52  ;;  %v2320_v12 = vpop.f32.mrb[132].mxu0 }
 0x30c   :  { %v5334_v19 = vadd.f32 %v2320_v12, %v7046_v14  ;;  %v2322_v60 = vpop.f32.mrb[133].mxu0 }
 0x30d   :  { %v5335_v50 = vadd.f32 %v2322_v60, %v7050_v58  ;;  %v2324_v38 = vpop.f32.mrb[134].mxu0  ;;  %2972 = vmatprep.mubr.bf16.mxu1 %v2694_v29 }
 0x30e   :  { %v5336_v42 = vadd.f32 %v2324_v38, %v7046_v14  ;;  %v2326_v55 = vpop.f32.mrb[135].mxu0  ;;  %2973 = vmatmul.mubr.bf16.gmra.mrb[192].mxu1 %v2693_v39  ;;  %v2585_v0 = vmax.f32 %v5334_v19, 0.0  ;;  %v5693_v39 = vld [vmem:[%s7836_s7 + $0x20] sm:$0xff]  }
 0x30f   :  { %v5337_v46 = vadd.f32 %v2326_v55, %v7050_v58  ;;  %v2586_v36 = vmax.f32 %v5335_v50, 0.0  ;;  %5078 = vmatprep.subr.bf16.mxu1 %v5693_v39 }
 0x310   :  { %v2587_v10 = vmax.f32 %v5336_v42, 0.0  ;;  %5079 = vmatpush3.bf16.msra.mxu1 %v5693_v39 }
 0x311   :  { %v2588_v18 = vmax.f32 %v5337_v46, 0.0 }
 0x312   :  { %v2695_v26 = vpack.c.bf16 %v2587_v10, %v2585_v0 }
 0x313   :  { %v2696_v4 = vpack.c.bf16 %v2588_v18, %v2586_v36  ;;  %v2330_v45 = vpop.f32.mrb[136].mxu0 }
 0x314   :  { %v5338_v63 = vadd.f32 %v2330_v45, %v7046_v14  ;;  %v2332_v62 = vpop.f32.mrb[137].mxu0 }
 0x315   :  { %v5339_v43 = vadd.f32 %v2332_v62, %v7050_v58  ;;  %v2334_v1 = vpop.f32.mrb[138].mxu0  ;;  %2980 = vmatprep.mubr.bf16.mxu1 %v2696_v4 }
 0x316   :  { %v5340_v6 = vadd.f32 %v2334_v1, %v7046_v14  ;;  %v2336_v59 = vpop.f32.mrb[139].mxu0  ;;  %2981 = vmatmul.mubr.bf16.gmra.mrb[196].mxu1 %v2695_v26  ;;  %v2589_v37 = vmax.f32 %v5338_v63, 0.0 }
 0x317   :  { %v5341_v54 = vadd.f32 %v2336_v59, %v7050_v58  ;;  %v2590_v17 = vmax.f32 %v5339_v43, 0.0 }
 0x318   :  { %v2591_v47 = vmax.f32 %v5340_v6, 0.0 }
 0x319   :  { %v2592_v23 = vmax.f32 %v5341_v54, 0.0 }
 0x31a   :  { %v2697_v30 = vpack.c.bf16 %v2591_v47, %v2589_v37 }
 0x31b   :  { %v2698_v3 = vpack.c.bf16 %v2592_v23, %v2590_v17  ;;  %v2340_v56 = vpop.f32.mrb[140].mxu0 }
 0x31c   :  { %v5342_v53 = vadd.f32 %v2340_v56, %v7046_v14  ;;  %v2342_v22 = vpop.f32.mrb[141].mxu0 }
 0x31d   :  { %v5343_v7 = vadd.f32 %v2342_v22, %v7050_v58  ;;  %v2344_v8 = vpop.f32.mrb[142].mxu0  ;;  %2988 = vmatprep.mubr.bf16.mxu1 %v2698_v3 }
 0x31e   :  { %v5344_v15 = vadd.f32 %v2344_v8, %v7046_v14  ;;  %v2346_v61 = vpop.f32.mrb[143].mxu0  ;;  %2989 = vmatmul.mubr.bf16.gmra.mrb[200].mxu1 %v2697_v30  ;;  %v2593_v20 = vmax.f32 %v5342_v53, 0.0 }
 0x31f   :  { %v5345_v11 = vadd.f32 %v2346_v61, %v7050_v58  ;;  %v2594_v9 = vmax.f32 %v5343_v7, 0.0 }
 0x320   :  { %v2595_v44 = vmax.f32 %v5344_v15, 0.0  ;;  %v5694_v15 = vld [vmem:[%s7836_s7 + $0x28] sm:$0xff]  }
 0x321   :  { %v2596_v48 = vmax.f32 %v5345_v11, 0.0  ;;  %5080 = vmatprep.subr.bf16.mxu1 %v5694_v15 }
 0x322   :  { %v2699_v41 = vpack.c.bf16 %v2595_v44, %v2593_v20  ;;  %5081 = vmatpush3.bf16.msra.mxu1 %v5694_v15 }
 0x323   :  { %v2700_v32 = vpack.c.bf16 %v2596_v48, %v2594_v9  ;;  %v2350_v27 = vpop.f32.mrb[144].mxu0 }
 0x324   :  { %v5346_v13 = vadd.f32 %v2350_v27, %v7046_v14  ;;  %v2352_v40 = vpop.f32.mrb[145].mxu0 }
 0x325   :  { %v5347_v49 = vadd.f32 %v2352_v40, %v7050_v58  ;;  %v2354_v33 = vpop.f32.mrb[146].mxu0  ;;  %2996 = vmatprep.mubr.bf16.mxu1 %v2700_v32  ;;  %v5695_v32 = vld [vmem:[%s7836_s7 + $0x30] sm:$0xff]  }
 0x326   :  { %v5348_v5 = vadd.f32 %v2354_v33, %v7046_v14  ;;  %v2356_v2 = vpop.f32.mrb[147].mxu0  ;;  %2997 = vmatmul.mubr.bf16.gmra.mrb[204].mxu1 %v2699_v41  ;;  %v2597_v35 = vmax.f32 %v5346_v13, 0.0  ;;  %5082 = vmatprep.subr.bf16.mxu1 %v5695_v32 }
 0x327   :  { %v5349_v57 = vadd.f32 %v2356_v2, %v7050_v58  ;;  %v2598_v25 = vmax.f32 %v5347_v49, 0.0  ;;  %5083 = vmatpush3.bf16.msra.mxu1 %v5695_v32 }
 0x328   :  { %v2599_v21 = vmax.f32 %v5348_v5, 0.0 }
 0x329   :  { %v2600_v24 = vmax.f32 %v5349_v57, 0.0  ;;  %v5696_v57 = vld [vmem:[%s7836_s7 + $0x38] sm:$0xff]  }
 0x32a   :  { %v2701_v51 = vpack.c.bf16 %v2599_v21, %v2597_v35  ;;  %5084 = vmatprep.subr.bf16.mxu1 %v5696_v57 }
 0x32b   :  { %v2702_v34 = vpack.c.bf16 %v2600_v24, %v2598_v25  ;;  %v2360_v16 = vpop.f32.mrb[148].mxu0  ;;  %5085 = vmatpush3.bf16.msra.mxu1 %v5696_v57 }
 0x32c   :  { %v5350_v52 = vadd.f32 %v2360_v16, %v7046_v14  ;;  %v2362_v28 = vpop.f32.mrb[149].mxu0 }
 0x32d   :  { %v5351_v29 = vadd.f32 %v2362_v28, %v7050_v58  ;;  %v2364_v12 = vpop.f32.mrb[150].mxu0  ;;  %3004 = vmatprep.mubr.bf16.mxu1 %v2702_v34 }
 0x32e   :  { %v5352_v31 = vadd.f32 %v2364_v12, %v7046_v14  ;;  %v2366_v19 = vpop.f32.mrb[151].mxu0  ;;  %3005 = vmatmul.mubr.bf16.gmra.mrb[208].mxu1 %v2701_v51  ;;  %v2601_v50 = vmax.f32 %v5350_v52, 0.0 }
 0x32f   :  { %v5353_v60 = vadd.f32 %v2366_v19, %v7050_v58  ;;  %v2602_v42 = vmax.f32 %v5351_v29, 0.0 }
 0x330   :  { %v2603_v38 = vmax.f32 %v5352_v31, 0.0 }
 0x331   :  { %v2604_v55 = vmax.f32 %v5353_v60, 0.0 }
 0x332   :  { %v2703_v46 = vpack.c.bf16 %v2603_v38, %v2601_v50 }
 0x333   :  { %v2704_v0 = vpack.c.bf16 %v2604_v55, %v2602_v42  ;;  %v2370_v10 = vpop.f32.mrb[152].mxu0 }
 0x334   :  { %v5354_v36 = vadd.f32 %v2370_v10, %v7046_v14  ;;  %v2372_v18 = vpop.f32.mrb[153].mxu0 }
 0x335   :  { %v5355_v26 = vadd.f32 %v2372_v18, %v7050_v58  ;;  %v2374_v4 = vpop.f32.mrb[154].mxu0  ;;  %3012 = vmatprep.mubr.bf16.mxu1 %v2704_v0 }
 0x336   :  { %v5356_v45 = vadd.f32 %v2374_v4, %v7046_v14  ;;  %v2376_v63 = vpop.f32.mrb[155].mxu0  ;;  %3013 = vmatmul.mubr.bf16.gmra.mrb[212].mxu1 %v2703_v46  ;;  %v2605_v43 = vmax.f32 %v5354_v36, 0.0 }
 0x337   :  { %v5357_v62 = vadd.f32 %v2376_v63, %v7050_v58  ;;  %v2606_v6 = vmax.f32 %v5355_v26, 0.0 }
 0x338   :  { %v2607_v1 = vmax.f32 %v5356_v45, 0.0 }
 0x339   :  { %v2608_v59 = vmax.f32 %v5357_v62, 0.0 }
 0x33a   :  { %v2705_v54 = vpack.c.bf16 %v2607_v1, %v2605_v43 }
 0x33b   :  { %v2706_v37 = vpack.c.bf16 %v2608_v59, %v2606_v6  ;;  %v2380_v47 = vpop.f32.mrb[156].mxu0 }
 0x33c   :  { %v5358_v17 = vadd.f32 %v2380_v47, %v7046_v14  ;;  %v2382_v23 = vpop.f32.mrb[157].mxu0 }
 0x33d   :  { %v5359_v30 = vadd.f32 %v2382_v23, %v7050_v58  ;;  %v2384_v3 = vpop.f32.mrb[158].mxu0  ;;  %3020 = vmatprep.mubr.bf16.mxu1 %v2706_v37 }
 0x33e   :  { %v5360_v56 = vadd.f32 %v2384_v3, %v7046_v14  ;;  %v2386_v53 = vpop.f32.mrb[159].mxu0  ;;  %3021 = vmatmul.mubr.bf16.gmra.mrb[216].mxu1 %v2705_v54  ;;  %v2609_v7 = vmax.f32 %v5358_v17, 0.0 }
 0x33f   :  { %v5361_v22 = vadd.f32 %v2386_v53, %v7050_v58  ;;  %v2610_v61 = vmax.f32 %v5359_v30, 0.0 }
 0x340   :  { %v2611_v8 = vmax.f32 %v5360_v56, 0.0 }
 0x341   :  { %v2612_v11 = vmax.f32 %v5361_v22, 0.0 }
 0x342   :  { %v2707_v20 = vpack.c.bf16 %v2611_v8, %v2609_v7 }
 0x343   :  { %v2708_v44 = vpack.c.bf16 %v2612_v11, %v2610_v61  ;;  %v2390_v9 = vpop.f32.mrb[160].mxu0 }
 0x344   :  { %v5362_v48 = vadd.f32 %v2390_v9, %v7046_v14  ;;  %v2392_v41 = vpop.f32.mrb[161].mxu0 }
 0x345   :  { %v5363_v27 = vadd.f32 %v2392_v41, %v7050_v58  ;;  %v2394_v13 = vpop.f32.mrb[162].mxu0  ;;  %3028 = vmatprep.mubr.bf16.mxu1 %v2708_v44 }
 0x346   :  { %v5364_v40 = vadd.f32 %v2394_v13, %v7046_v14  ;;  %v2396_v49 = vpop.f32.mrb[163].mxu0  ;;  %3029 = vmatmul.mubr.bf16.gmra.mrb[220].mxu1 %v2707_v20  ;;  %v2613_v5 = vmax.f32 %v5362_v48, 0.0 }
 0x347   :  { %v5365_v33 = vadd.f32 %v2396_v49, %v7050_v58  ;;  %v2614_v35 = vmax.f32 %v5363_v27, 0.0 }
 0x348   :  { %v2615_v2 = vmax.f32 %v5364_v40, 0.0 }
 0x349   :  { %v2616_v21 = vmax.f32 %v5365_v33, 0.0 }
 0x34a   :  { %v2709_v25 = vpack.c.bf16 %v2615_v2, %v2613_v5 }
 0x34b   :  { %v2710_v24 = vpack.c.bf16 %v2616_v21, %v2614_v35  ;;  %v2400_v51 = vpop.f32.mrb[164].mxu0 }
 0x34c   :  { %v5366_v34 = vadd.f32 %v2400_v51, %v7046_v14  ;;  %v2402_v16 = vpop.f32.mrb[165].mxu0 }
 0x34d   :  { %v5367_v52 = vadd.f32 %v2402_v16, %v7050_v58  ;;  %v2404_v28 = vpop.f32.mrb[166].mxu0  ;;  %3036 = vmatprep.mubr.bf16.mxu1 %v2710_v24 }
 0x34e   :  { %v5368_v39 = vadd.f32 %v2404_v28, %v7046_v14  ;;  %v2406_v29 = vpop.f32.mrb[167].mxu0  ;;  %3037 = vmatmul.mubr.bf16.gmra.mrb[224].mxu1 %v2709_v25  ;;  %v2617_v31 = vmax.f32 %v5366_v34, 0.0 }
 0x34f   :  { %v5369_v12 = vadd.f32 %v2406_v29, %v7050_v58  ;;  %v2618_v60 = vmax.f32 %v5367_v52, 0.0 }
 0x350   :  { %v2619_v19 = vmax.f32 %v5368_v39, 0.0 }
 0x351   :  { %v2620_v50 = vmax.f32 %v5369_v12, 0.0 }
 0x352   :  { %v2711_v38 = vpack.c.bf16 %v2619_v19, %v2617_v31 }
 0x353   :  { %v2712_v42 = vpack.c.bf16 %v2620_v50, %v2618_v60  ;;  %v2410_v55 = vpop.f32.mrb[168].mxu0 }
 0x354   :  { %v5370_v46 = vadd.f32 %v2410_v55, %v7046_v14  ;;  %v2412_v0 = vpop.f32.mrb[169].mxu0 }
 0x355   :  { %v5371_v10 = vadd.f32 %v2412_v0, %v7050_v58  ;;  %v2414_v36 = vpop.f32.mrb[170].mxu0  ;;  %3044 = vmatprep.mubr.bf16.mxu1 %v2712_v42 }
 0x356   :  { %v5372_v18 = vadd.f32 %v2414_v36, %v7046_v14  ;;  %v2416_v26 = vpop.f32.mrb[171].mxu0  ;;  %3045 = vmatmul.mubr.bf16.gmra.mrb[228].mxu1 %v2711_v38  ;;  %v2621_v45 = vmax.f32 %v5370_v46, 0.0 }
 0x357   :  { %v5373_v4 = vadd.f32 %v2416_v26, %v7050_v58  ;;  %v2622_v62 = vmax.f32 %v5371_v10, 0.0 }
 0x358   :  { %v2623_v63 = vmax.f32 %v5372_v18, 0.0 }
 0x359   :  { %v2624_v43 = vmax.f32 %v5373_v4, 0.0 }
 0x35a   :  { %v2713_v1 = vpack.c.bf16 %v2623_v63, %v2621_v45 }
 0x35b   :  { %v2714_v6 = vpack.c.bf16 %v2624_v43, %v2622_v62  ;;  %v2420_v59 = vpop.f32.mrb[172].mxu0 }
 0x35c   :  { %v5374_v54 = vadd.f32 %v2420_v59, %v7046_v14  ;;  %v2422_v37 = vpop.f32.mrb[173].mxu0 }
 0x35d   :  { %v5375_v47 = vadd.f32 %v2422_v37, %v7050_v58  ;;  %v2424_v17 = vpop.f32.mrb[174].mxu0  ;;  %3052 = vmatprep.mubr.bf16.mxu1 %v2714_v6 }
 0x35e   :  { %v5376_v23 = vadd.f32 %v2424_v17, %v7046_v14  ;;  %v2426_v30 = vpop.f32.mrb[175].mxu0  ;;  %3053 = vmatmul.mubr.bf16.gmra.mrb[232].mxu1 %v2713_v1  ;;  %v2625_v56 = vmax.f32 %v5374_v54, 0.0 }
 0x35f   :  { %v5377_v3 = vadd.f32 %v2426_v30, %v7050_v58  ;;  %v2626_v22 = vmax.f32 %v5375_v47, 0.0 }
 0x360   :  { %v2627_v53 = vmax.f32 %v5376_v23, 0.0 }
 0x361   :  { %v2628_v7 = vmax.f32 %v5377_v3, 0.0 }
 0x362   :  { %v2715_v8 = vpack.c.bf16 %v2627_v53, %v2625_v56 }
 0x363   :  { %v2716_v15 = vpack.c.bf16 %v2628_v7, %v2626_v22  ;;  %v2430_v61 = vpop.f32.mrb[176].mxu0 }
 0x364   :  { %v5378_v11 = vadd.f32 %v2430_v61, %v7046_v14  ;;  %v2432_v20 = vpop.f32.mrb[177].mxu0 }
 0x365   :  { %v5379_v44 = vadd.f32 %v2432_v20, %v7050_v58  ;;  %v2434_v9 = vpop.f32.mrb[178].mxu0  ;;  %3060 = vmatprep.mubr.bf16.mxu1 %v2716_v15 }
 0x366   :  { %v5380_v48 = vadd.f32 %v2434_v9, %v7046_v14  ;;  %v2436_v41 = vpop.f32.mrb[179].mxu0  ;;  %3061 = vmatmul.mubr.bf16.gmra.mrb[236].mxu1 %v2715_v8  ;;  %v2629_v27 = vmax.f32 %v5378_v11, 0.0 }
 0x367   :  { %v5381_v32 = vadd.f32 %v2436_v41, %v7050_v58  ;;  %v2630_v40 = vmax.f32 %v5379_v44, 0.0 }
 0x368   :  { %v2631_v13 = vmax.f32 %v5380_v48, 0.0 }
 0x369   :  { %v2632_v49 = vmax.f32 %v5381_v32, 0.0 }
 0x36a   :  { %v2717_v33 = vpack.c.bf16 %v2631_v13, %v2629_v27 }
 0x36b   :  { %v2718_v5 = vpack.c.bf16 %v2632_v49, %v2630_v40  ;;  %v2440_v2 = vpop.f32.mrb[180].mxu0 }
 0x36c   :  { %v5382_v57 = vadd.f32 %v2440_v2, %v7046_v14  ;;  %v2442_v35 = vpop.f32.mrb[181].mxu0 }
 0x36d   :  { %v5383_v21 = vadd.f32 %v2442_v35, %v7050_v58  ;;  %v2444_v25 = vpop.f32.mrb[182].mxu0  ;;  %3068 = vmatprep.mubr.bf16.mxu1 %v2718_v5 }
 0x36e   :  { %v5384_v24 = vadd.f32 %v2444_v25, %v7046_v14  ;;  %v2446_v51 = vpop.f32.mrb[183].mxu0  ;;  %3069 = vmatmul.mubr.bf16.gmra.mrb[240].mxu1 %v2717_v33  ;;  %v2633_v16 = vmax.f32 %v5382_v57, 0.0 }
 0x36f   :  { %v5385_v34 = vadd.f32 %v2446_v51, %v7050_v58  ;;  %v2634_v28 = vmax.f32 %v5383_v21, 0.0 }
 0x370   :  { %v2635_v52 = vmax.f32 %v5384_v24, 0.0 }
 0x371   :  { %v2636_v39 = vmax.f32 %v5385_v34, 0.0 }
 0x372   :  { %v2719_v29 = vpack.c.bf16 %v2635_v52, %v2633_v16 }
 0x373   :  { %v2720_v12 = vpack.c.bf16 %v2636_v39, %v2634_v28  ;;  %v2450_v31 = vpop.f32.mrb[184].mxu0 }
 0x374   :  { %v5386_v19 = vadd.f32 %v2450_v31, %v7046_v14  ;;  %v2452_v60 = vpop.f32.mrb[185].mxu0 }
 0x375   :  { %v5387_v50 = vadd.f32 %v2452_v60, %v7050_v58  ;;  %v2454_v38 = vpop.f32.mrb[186].mxu0  ;;  %3076 = vmatprep.mubr.bf16.mxu1 %v2720_v12 }
 0x376   :  { %v5388_v42 = vadd.f32 %v2454_v38, %v7046_v14  ;;  %v2456_v55 = vpop.f32.mrb[187].mxu0  ;;  %3077 = vmatmul.mubr.bf16.gmra.mrb[244].mxu1 %v2719_v29  ;;  %v2637_v0 = vmax.f32 %v5386_v19, 0.0 }
 0x377   :  { %v5389_v46 = vadd.f32 %v2456_v55, %v7050_v58  ;;  %v2638_v36 = vmax.f32 %v5387_v50, 0.0 }
 0x378   :  { %v2639_v10 = vmax.f32 %v5388_v42, 0.0 }
 0x379   :  { %v2640_v18 = vmax.f32 %v5389_v46, 0.0 }
 0x37a   :  { %v2721_v26 = vpack.c.bf16 %v2639_v10, %v2637_v0 }
 0x37b   :  { %v2722_v4 = vpack.c.bf16 %v2640_v18, %v2638_v36  ;;  %v2460_v45 = vpop.f32.mrb[188].mxu0 }
 0x37c   :  { %v5390_v63 = vadd.f32 %v2460_v45, %v7046_v14  ;;  %v2462_v62 = vpop.f32.mrb[189].mxu0 }
 0x37d   :  { %v5391_v43 = vadd.f32 %v2462_v62, %v7050_v58  ;;  %v2464_v1 = vpop.f32.mrb[190].mxu0  ;;  %3084 = vmatprep.mubr.bf16.mxu1 %v2722_v4  ;;  %v7198_v62 = vld [vmem:[%s7838_s6] ss:$0 sm:$0xff] }
 0x37e   :  { %v5392_v6 = vadd.f32 %v2464_v1, %v7046_v14  ;;  %v2466_v59 = vpop.f32.mrb[191].mxu0  ;;  %3085 = vmatmul.mubr.bf16.gmra.mrb[248].mxu1 %v2721_v26  ;;  %v2641_v37 = vmax.f32 %v5390_v63, 0.0 }
 0x37f   :  { %v5393_v54 = vadd.f32 %v2466_v59, %v7050_v58  ;;  %v2642_v17 = vmax.f32 %v5391_v43, 0.0 }
 0x380   :  { %v2643_v47 = vmax.f32 %v5392_v6, 0.0 }
 0x381   :  { %v2644_v23 = vmax.f32 %v5393_v54, 0.0 }
 0x382   :  { %v2723_v30 = vpack.c.bf16 %v2643_v47, %v2641_v37 }
 0x383   :  { %v2724_v3 = vpack.c.bf16 %v2644_v23, %v2642_v17  ;;  %v2470_v56 = vpop.f32.mrb[192].mxu0 }
 0x384   :  { %v5394_v53 = vadd.f32 %v2470_v56, %v7046_v14  ;;  %v2472_v22 = vpop.f32.mrb[193].mxu0 }
 0x385   :  { %v5395_v7 = vadd.f32 %v2472_v22, %v7050_v58  ;;  %v2474_v8 = vpop.f32.mrb[194].mxu0  ;;  %3092 = vmatprep.mubr.bf16.mxu1 %v2724_v3 }
 0x386   :  { %v5396_v15 = vadd.f32 %v2474_v8, %v7046_v14  ;;  %v2476_v61 = vpop.f32.mrb[195].mxu0  ;;  %3093 = vmatmul.mubr.bf16.gmra.mrb[252].mxu1 %v2723_v30  ;;  %v2645_v20 = vmax.f32 %v5394_v53, 0.0 }
 0x387   :  { %v5397_v11 = vadd.f32 %v2476_v61, %v7050_v58  ;;  %v2646_v9 = vmax.f32 %v5395_v7, 0.0 }
 0x388   :  { %v2647_v44 = vmax.f32 %v5396_v15, 0.0 }
 0x389   :  { %v2648_v48 = vmax.f32 %v5397_v11, 0.0 }
 0x38a   :  { %v2725_v41 = vpack.c.bf16 %v2647_v44, %v2645_v20 }
 0x38b   :  { %v2726_v32 = vpack.c.bf16 %v2648_v48, %v2646_v9  ;;  %v2480_v27 = vpop.f32.mrb[196].mxu0 }
 0x38c   :  { %v5398_v13 = vadd.f32 %v2480_v27, %v7046_v14  ;;  %v2482_v40 = vpop.f32.mrb[197].mxu0 }
 0x38d   :  { %v5399_v49 = vadd.f32 %v2482_v40, %v7050_v58  ;;  %v2484_v33 = vpop.f32.mrb[198].mxu0  ;;  %3100 = vmatprep.mubr.bf16.mxu1 %v2726_v32 }
 0x38e   :  { %v5400_v5 = vadd.f32 %v2484_v33, %v7046_v14  ;;  %v2486_v2 = vpop.f32.mrb[199].mxu0  ;;  %3101 = vmatmul.mubr.bf16.gmra.mrb[0].mxu1 %v2725_v41  ;;  %v2649_v35 = vmax.f32 %v5398_v13, 0.0 }
 0x38f   :  { %v5401_v57 = vadd.f32 %v2486_v2, %v7050_v58  ;;  %v2650_v25 = vmax.f32 %v5399_v49, 0.0 }
 0x390   :  { %v2651_v21 = vmax.f32 %v5400_v5, 0.0 }
 0x391   :  { %v2652_v24 = vmax.f32 %v5401_v57, 0.0 }
 0x392   :  { %v2727_v51 = vpack.c.bf16 %v2651_v21, %v2649_v35 }
 0x393   :  { %v2728_v34 = vpack.c.bf16 %v2652_v24, %v2650_v25  ;;  %v2490_v16 = vpop.f32.mrb[200].mxu0 }
 0x394   :  { %v5402_v52 = vadd.f32 %v2490_v16, %v7046_v14  ;;  %v2492_v28 = vpop.f32.mrb[201].mxu0 }
 0x395   :  { %v5403_v39 = vadd.f32 %v2492_v28, %v7050_v58  ;;  %v2494_v29 = vpop.f32.mrb[202].mxu0  ;;  %3108 = vmatprep.mubr.bf16.mxu1 %v2728_v34 }
 0x396   :  { %v5404_v12 = vadd.f32 %v2494_v29, %v7046_v14  ;;  %v2496_v31 = vpop.f32.mrb[203].mxu0  ;;  %3109 = vmatmul.mubr.bf16.gmra.mrb[4].mxu1 %v2727_v51  ;;  %v2653_v60 = vmax.f32 %v5402_v52, 0.0 }
 0x397   :  { %v5405_v19 = vadd.f32 %v2496_v31, %v7050_v58  ;;  %v2654_v38 = vmax.f32 %v5403_v39, 0.0 }
 0x398   :  { %v2655_v50 = vmax.f32 %v5404_v12, 0.0 }
 0x399   :  { %v2656_v42 = vmax.f32 %v5405_v19, 0.0 }
 0x39a   :  { %v2729_v55 = vpack.c.bf16 %v2655_v50, %v2653_v60 }
 0x39b   :  { %v2730_v46 = vpack.c.bf16 %v2656_v42, %v2654_v38  ;;  %v2500_v0 = vpop.f32.mrb[204].mxu0 }
 0x39c   :  { %v5406_v10 = vadd.f32 %v2500_v0, %v7046_v14  ;;  %v2502_v36 = vpop.f32.mrb[205].mxu0 }
 0x39d   :  { %v5407_v18 = vadd.f32 %v2502_v36, %v7050_v58  ;;  %v2504_v26 = vpop.f32.mrb[206].mxu0  ;;  %3116 = vmatprep.mubr.bf16.mxu1 %v2730_v46 }
 0x39e   :  { %v5408_v4 = vadd.f32 %v2504_v26, %v7046_v14  ;;  %v2506_v45 = vpop.f32.mrb[207].mxu0  ;;  %3117 = vmatmul.mubr.bf16.gmra.mrb[8].mxu1 %v2729_v55  ;;  %v2657_v43 = vmax.f32 %v5406_v10, 0.0 }
 0x39f   :  { %v5409_v63 = vadd.f32 %v2506_v45, %v7050_v58  ;;  %v2658_v6 = vmax.f32 %v5407_v18, 0.0 }
 0x3a0   :  { %v2659_v1 = vmax.f32 %v5408_v4, 0.0 }
 0x3a1   :  { %v2660_v59 = vmax.f32 %v5409_v63, 0.0  ;;  %v2910_v54 = vpop.f32.mrb[160].mxu1 }
 0x3a2   :  { %v2731_v37 = vpack.c.bf16 %v2659_v1, %v2657_v43  ;;  %v2911_v47 = vadd.f32 %v7198_v62, %v2910_v54  ;;  %v2912_v17 = vpop.f32.mrb[161].mxu1 }
 0x3a3   :  { %v2732_v23 = vpack.c.bf16 %v2660_v59, %v2658_v6  ;;  %v2510_v30 = vpop.f32.mrb[208].mxu0  ;;  %v2913_v3 = vpop.f32.mrb[162].mxu1 }
 0x3a4   :  { %v5410_v56 = vadd.f32 %v2510_v30, %v7046_v14  ;;  %v2914_v53 = vadd.f32 %v7198_v62, %v2913_v3  ;;  %v2512_v22 = vpop.f32.mrb[209].mxu0  ;;  %v2915_v7 = vpop.f32.mrb[163].mxu1  ;;  %v3165_v61 = vmax.f32 %v2911_v47, 0.0 }
 0x3a5   :  { %v5411_v8 = vadd.f32 %v2512_v22, %v7050_v58  ;;  %v2514_v15 = vpop.f32.mrb[210].mxu0  ;;  %3124 = vmatprep.mubr.bf16.mxu1 %v2732_v23 }
 0x3a6   :  { %v3166_v11 = vmax.f32 %v2914_v53, 0.0  ;;  %v5412_v20 = vadd.f32 %v2514_v15, %v7046_v14  ;;  %v2516_v44 = vpop.f32.mrb[211].mxu0  ;;  %3125 = vmatmul.mubr.bf16.gmra.mrb[12].mxu1 %v2731_v37  ;;  %v2661_v48 = vmax.f32 %v5410_v56, 0.0 }
 0x3a7   :  { %v5413_v9 = vadd.f32 %v2516_v44, %v7050_v58  ;;  %v2662_v27 = vmax.f32 %v5411_v8, 0.0 }
 0x3a8   :  { %v7206_v41 = vpack.c.bf16 %v3166_v11, %v3165_v61  ;;  %v2663_v32 = vmax.f32 %v5412_v20, 0.0 }
 0x3a9   :  { %v2664_v13 = vmax.f32 %v5413_v9, 0.0  ;;  %v2918_v40 = vpop.f32.mrb[164].mxu1 }
 0x3aa   :  { %v2733_v49 = vpack.c.bf16 %v2663_v32, %v2661_v48  ;;  %v2919_v33 = vadd.f32 %v7198_v62, %v2918_v40  ;;  %v2920_v5 = vpop.f32.mrb[165].mxu1 }
 0x3ab   :  { %v2734_v2 = vpack.c.bf16 %v2664_v13, %v2662_v27  ;;  %v2520_v57 = vpop.f32.mrb[212].mxu0  ;;  %v2921_v35 = vpop.f32.mrb[166].mxu1 }
 0x3ac   :  { %v5414_v21 = vadd.f32 %v2520_v57, %v7046_v14  ;;  %v2922_v25 = vadd.f32 %v7198_v62, %v2921_v35  ;;  %v2522_v24 = vpop.f32.mrb[213].mxu0  ;;  %v2923_v51 = vpop.f32.mrb[167].mxu1  ;;  %v3167_v52 = vmax.f32 %v2919_v33, 0.0 }
 0x3ad   :  { %v5415_v34 = vadd.f32 %v2522_v24, %v7050_v58  ;;  %v2524_v16 = vpop.f32.mrb[214].mxu0  ;;  %3132 = vmatprep.mubr.bf16.mxu1 %v2734_v2 }
 0x3ae   :  { %v3168_v28 = vmax.f32 %v2922_v25, 0.0  ;;  %v5416_v39 = vadd.f32 %v2524_v16, %v7046_v14  ;;  %v2526_v29 = vpop.f32.mrb[215].mxu0  ;;  %3133 = vmatmul.mubr.bf16.gmra.mrb[16].mxu1 %v2733_v49  ;;  %v2665_v31 = vmax.f32 %v5414_v21, 0.0 }
 0x3af   :  { %v5417_v12 = vadd.f32 %v2526_v29, %v7050_v58  ;;  %v2666_v50 = vmax.f32 %v5415_v34, 0.0 }
 0x3b0   :  { %v7214_v19 = vpack.c.bf16 %v3168_v28, %v3167_v52  ;;  %v2667_v60 = vmax.f32 %v5416_v39, 0.0 }
 0x3b1   :  { %v2668_v38 = vmax.f32 %v5417_v12, 0.0  ;;  %v2926_v42 = vpop.f32.mrb[168].mxu1 }
 0x3b2   :  { %v2735_v55 = vpack.c.bf16 %v2667_v60, %v2665_v31  ;;  %v2927_v46 = vadd.f32 %v7198_v62, %v2926_v42  ;;  %v2928_v0 = vpop.f32.mrb[169].mxu1 }
 0x3b3   :  { %v2736_v10 = vpack.c.bf16 %v2668_v38, %v2666_v50  ;;  %v2530_v36 = vpop.f32.mrb[216].mxu0  ;;  %v2929_v18 = vpop.f32.mrb[170].mxu1 }
 0x3b4   :  { %v5418_v26 = vadd.f32 %v2530_v36, %v7046_v14  ;;  %v2930_v4 = vadd.f32 %v7198_v62, %v2929_v18  ;;  %v2532_v45 = vpop.f32.mrb[217].mxu0  ;;  %v2931_v63 = vpop.f32.mrb[171].mxu1  ;;  %v3169_v6 = vmax.f32 %v2927_v46, 0.0 }
 0x3b5   :  { %v5419_v43 = vadd.f32 %v2532_v45, %v7050_v58  ;;  %v2534_v1 = vpop.f32.mrb[218].mxu0  ;;  %3140 = vmatprep.mubr.bf16.mxu1 %v2736_v10 }
 0x3b6   :  { %v3170_v59 = vmax.f32 %v2930_v4, 0.0  ;;  %v5420_v54 = vadd.f32 %v2534_v1, %v7046_v14  ;;  %v2536_v37 = vpop.f32.mrb[219].mxu0  ;;  %3141 = vmatmul.mubr.bf16.gmra.mrb[20].mxu1 %v2735_v55  ;;  %v2669_v17 = vmax.f32 %v5418_v26, 0.0 }
 0x3b7   :  { %v5421_v47 = vadd.f32 %v2536_v37, %v7050_v58  ;;  %v2670_v3 = vmax.f32 %v5419_v43, 0.0 }
 0x3b8   :  { %v3231_v23 = vpack.c.bf16 %v3170_v59, %v3169_v6  ;;  %v2671_v30 = vmax.f32 %v5420_v54, 0.0 }
 0x3b9   :  { %v2672_v56 = vmax.f32 %v5421_v47, 0.0  ;;  %v2934_v53 = vpop.f32.mrb[172].mxu1 }
 0x3ba   :  { %v2737_v22 = vpack.c.bf16 %v2671_v30, %v2669_v17  ;;  %v2935_v7 = vadd.f32 %v7198_v62, %v2934_v53  ;;  %v2936_v8 = vpop.f32.mrb[173].mxu1 }
 0x3bb   :  { %v2738_v15 = vpack.c.bf16 %v2672_v56, %v2670_v3  ;;  %v2540_v61 = vpop.f32.mrb[220].mxu0  ;;  %v2937_v11 = vpop.f32.mrb[174].mxu1 }
 0x3bc   :  { %v5422_v20 = vadd.f32 %v2540_v61, %v7046_v14  ;;  %v2938_v44 = vadd.f32 %v7198_v62, %v2937_v11  ;;  %v2542_v9 = vpop.f32.mrb[221].mxu0  ;;  %v2939_v48 = vpop.f32.mrb[175].mxu1  ;;  %v3171_v13 = vmax.f32 %v2935_v7, 0.0 }
 0x3bd   :  { %v5423_v32 = vadd.f32 %v2542_v9, %v7050_v58  ;;  %v2544_v27 = vpop.f32.mrb[222].mxu0  ;;  %3148 = vmatprep.mubr.bf16.mxu1 %v2738_v15 }
 0x3be   :  { %v3172_v40 = vmax.f32 %v2938_v44, 0.0  ;;  %v5424_v49 = vadd.f32 %v2544_v27, %v7046_v14  ;;  %v2546_v33 = vpop.f32.mrb[223].mxu0  ;;  %3149 = vmatmul.mubr.bf16.gmra.mrb[24].mxu1 %v2737_v22  ;;  %v2673_v2 = vmax.f32 %v5422_v20, 0.0 }
 0x3bf   :  { %v5425_v5 = vadd.f32 %v2546_v33, %v7050_v58  ;;  %v2674_v21 = vmax.f32 %v5423_v32, 0.0 }
 0x3c0   :  { %v3232_v57 = vpack.c.bf16 %v3172_v40, %v3171_v13  ;;  %v2675_v35 = vmax.f32 %v5424_v49, 0.0 }
 0x3c1   :  { %v2676_v25 = vmax.f32 %v5425_v5, 0.0  ;;  %v2942_v24 = vpop.f32.mrb[176].mxu1 }
 0x3c2   :  { %v2739_v51 = vpack.c.bf16 %v2675_v35, %v2673_v2  ;;  %v2943_v34 = vadd.f32 %v7198_v62, %v2942_v24  ;;  %v2944_v16 = vpop.f32.mrb[177].mxu1 }
 0x3c3   :  { %v2740_v52 = vpack.c.bf16 %v2676_v25, %v2674_v21  ;;  %v2945_v28 = vpop.f32.mrb[178].mxu1 }
 0x3c4   :  { %v2946_v39 = vadd.f32 %v7198_v62, %v2945_v28  ;;  %v2947_v29 = vpop.f32.mrb[179].mxu1  ;;  %v3173_v14 = vmax.f32 %v2943_v34, 0.0 }
 0x3c5   :  { %3156 = vmatprep.mubr.bf16.mxu1 %v2740_v52 }
 0x3c6   :  { %v3174_v12 = vmax.f32 %v2946_v39, 0.0  ;;  %3157 = vmatmul.mubr.bf16.gmra.mrb[28].mxu1 %v2739_v51 }
 0x3c7   :  { %5086 = vmatprep.mubr.bf16.mxu1 %v7206_v41 }
 0x3c8   :  { %v3233_v58 = vpack.c.bf16 %v3174_v12, %v3173_v14 }
 0x3c9   :  { %v2950_v31 = vpop.f32.mrb[180].mxu1 }
 0x3ca   :  { %v2951_v60 = vadd.f32 %v7198_v62, %v2950_v31  ;;  %v2952_v50 = vpop.f32.mrb[181].mxu1 }
 0x3cb   :  { %v2953_v38 = vpop.f32.mrb[182].mxu1 }
 0x3cc   :  { %v2954_v42 = vadd.f32 %v7198_v62, %v2953_v38  ;;  %v2955_v55 = vpop.f32.mrb[183].mxu1  ;;  %v3175_v46 = vmax.f32 %v2951_v60, 0.0 }
 0x3ce   :  { %v3176_v0 = vmax.f32 %v2954_v42, 0.0  ;;  %5087 = vmatmul.mubr.bf16.vlgmr.msra.gmra.mrb[32].mxu1 %v7214_v19 }
 0x3cf   :  { %5090 = vmatprep.mubr.bf16.mxu1 %v3231_v23 }
 0x3d0   :  { %v3234_v10 = vpack.c.bf16 %v3176_v0, %v3175_v46 }
 0x3d1   :  { %v2958_v36 = vpop.f32.mrb[184].mxu1 }
 0x3d2   :  { %v2959_v18 = vadd.f32 %v7198_v62, %v2958_v36  ;;  %v2960_v26 = vpop.f32.mrb[185].mxu1 }
 0x3d3   :  { %v2961_v41 = vpop.f32.mrb[186].mxu1 }
 0x3d4   :  { %v2962_v4 = vadd.f32 %v7198_v62, %v2961_v41  ;;  %v2963_v45 = vpop.f32.mrb[187].mxu1  ;;  %v3177_v63 = vmax.f32 %v2959_v18, 0.0  ;;  %v5697_v18 = vld [vmem:[%s7839_s9] sm:$0xff]  }
 0x3d5   :  { %5150 = vmatprep.subr.bf16.mxu1 %v5697_v18 }
 0x3d6   :  { %v3178_v43 = vmax.f32 %v2962_v4, 0.0  ;;  %5091 = vmatmul.mubr.bf16.gmra.mrb[36].mxu1 %v3232_v57 }
 0x3d7   :  { %5094 = vmatprep.mubr.bf16.mxu1 %v3233_v58  ;;  %5151 = vmatpush3.bf16.msra.mxu1 %v5697_v18 }
 0x3d8   :  { %v3235_v1 = vpack.c.bf16 %v3178_v43, %v3177_v63 }
 0x3d9   :  { %v2966_v6 = vpop.f32.mrb[188].mxu1 }
 0x3da   :  { %v2967_v59 = vadd.f32 %v7198_v62, %v2966_v6  ;;  %v2968_v54 = vpop.f32.mrb[189].mxu1 }
 0x3db   :  { %v2969_v19 = vpop.f32.mrb[190].mxu1 }
 0x3dc   :  { %v2970_v37 = vadd.f32 %v7198_v62, %v2969_v19  ;;  %v2971_v47 = vpop.f32.mrb[191].mxu1  ;;  %v3179_v17 = vmax.f32 %v2967_v59, 0.0 }
 0x3de   :  { %v3180_v23 = vmax.f32 %v2970_v37, 0.0  ;;  %5095 = vmatmul.mubr.bf16.gmra.mrb[40].mxu1 %v3234_v10 }
 0x3df   :  { %5098 = vmatprep.mubr.bf16.mxu1 %v3235_v1 }
 0x3e0   :  { %v3236_v30 = vpack.c.bf16 %v3180_v23, %v3179_v17 }
 0x3e1   :  { %v2974_v3 = vpop.f32.mrb[192].mxu1 }
 0x3e2   :  { %v2975_v56 = vadd.f32 %v7198_v62, %v2974_v3  ;;  %v2976_v53 = vpop.f32.mrb[193].mxu1 }
 0x3e3   :  { %v2977_v22 = vpop.f32.mrb[194].mxu1 }
 0x3e4   :  { %v2978_v7 = vadd.f32 %v7198_v62, %v2977_v22  ;;  %v2979_v8 = vpop.f32.mrb[195].mxu1  ;;  %v3181_v15 = vmax.f32 %v2975_v56, 0.0 }
 0x3e6   :  { %v3182_v61 = vmax.f32 %v2978_v7, 0.0  ;;  %5099 = vmatmul.mubr.bf16.gmra.mrb[44].mxu1 %v3236_v30 }
 0x3e8   :  { %v3237_v11 = vpack.c.bf16 %v3182_v61, %v3181_v15 }
 0x3e9   :  { %v2982_v20 = vpop.f32.mrb[196].mxu1 }
 0x3ea   :  { %v2983_v44 = vadd.f32 %v7198_v62, %v2982_v20  ;;  %v2984_v9 = vpop.f32.mrb[197].mxu1  ;;  %5102 = vmatprep.mubr.bf16.mxu1 %v3237_v11  ;;  %v5698_v20 = vld [vmem:[%s7839_s9 + $0x8] sm:$0xff]  }
 0x3eb   :  { %v2985_v48 = vpop.f32.mrb[198].mxu1  ;;  %5152 = vmatprep.subr.bf16.mxu1 %v5698_v20 }
 0x3ec   :  { %v2986_v32 = vadd.f32 %v7198_v62, %v2985_v48  ;;  %v2987_v27 = vpop.f32.mrb[199].mxu1  ;;  %v3183_v13 = vmax.f32 %v2983_v44, 0.0  ;;  %5153 = vmatpush3.bf16.msra.mxu1 %v5698_v20 }
 0x3ed   :  { %v5699_v27 = vld [vmem:[%s7839_s9 + $0x10] sm:$0xff]  }
 0x3ee   :  { %v3184_v40 = vmax.f32 %v2986_v32, 0.0  ;;  %5154 = vmatprep.subr.bf16.mxu1 %v5699_v27 }
 0x3f0   :  { %v3238_v49 = vpack.c.bf16 %v3184_v40, %v3183_v13  ;;  %5155 = vmatpush3.bf16.msra.mxu1 %v5699_v27 }
 0x3f1   :  { %v2990_v33 = vpop.f32.mrb[200].mxu1 }
 0x3f2   :  { %v2991_v5 = vadd.f32 %v7198_v62, %v2990_v33  ;;  %v2992_v2 = vpop.f32.mrb[201].mxu1  ;;  %5103 = vmatmul.mubr.bf16.gmra.mrb[48].mxu1 %v3238_v49 }
 0x3f3   :  { %v2993_v57 = vpop.f32.mrb[202].mxu1  ;;  %v5700_v2 = vld [vmem:[%s7839_s9 + $0x18] sm:$0xff]  }
 0x3f4   :  { %v2994_v35 = vadd.f32 %v7198_v62, %v2993_v57  ;;  %v2995_v21 = vpop.f32.mrb[203].mxu1  ;;  %v3185_v25 = vmax.f32 %v2991_v5, 0.0  ;;  %5156 = vmatprep.subr.bf16.mxu1 %v5700_v2 }
 0x3f5   :  { %5157 = vmatpush3.bf16.msra.mxu1 %v5700_v2 }
 0x3f6   :  { %v3186_v24 = vmax.f32 %v2994_v35, 0.0 }
 0x3f8   :  { %v3239_v51 = vpack.c.bf16 %v3186_v24, %v3185_v25 }
 0x3f9   :  { %v2998_v34 = vpop.f32.mrb[204].mxu1 }
 0x3fa   :  { %v2999_v16 = vadd.f32 %v7198_v62, %v2998_v34  ;;  %v3000_v52 = vpop.f32.mrb[205].mxu1  ;;  %5106 = vmatprep.mubr.bf16.mxu1 %v3239_v51 }
 0x3fb   :  { %v3001_v28 = vpop.f32.mrb[206].mxu1 }
 0x3fc   :  { %v3002_v39 = vadd.f32 %v7198_v62, %v3001_v28  ;;  %v3003_v29 = vpop.f32.mrb[207].mxu1  ;;  %v3187_v14 = vmax.f32 %v2999_v16, 0.0 }
 0x3fe   :  { %v3188_v12 = vmax.f32 %v3002_v39, 0.0 }
 0x400   :  { %v3240_v58 = vpack.c.bf16 %v3188_v12, %v3187_v14 }
 0x401   :  { %v3006_v31 = vpop.f32.mrb[208].mxu1 }
 0x402   :  { %v3007_v60 = vadd.f32 %v7198_v62, %v3006_v31  ;;  %v3008_v50 = vpop.f32.mrb[209].mxu1  ;;  %5107 = vmatmul.mubr.bf16.gmra.mrb[52].mxu1 %v3240_v58 }
 0x403   :  { %v3009_v38 = vpop.f32.mrb[210].mxu1 }
 0x404   :  { %v3010_v42 = vadd.f32 %v7198_v62, %v3009_v38  ;;  %v3011_v55 = vpop.f32.mrb[211].mxu1  ;;  %v3189_v46 = vmax.f32 %v3007_v60, 0.0 }
 0x406   :  { %v3190_v0 = vmax.f32 %v3010_v42, 0.0 }
 0x408   :  { %v3241_v10 = vpack.c.bf16 %v3190_v0, %v3189_v46 }
 0x409   :  { %v3014_v36 = vpop.f32.mrb[212].mxu1 }
 0x40a   :  { %v3015_v26 = vadd.f32 %v7198_v62, %v3014_v36  ;;  %v3016_v41 = vpop.f32.mrb[213].mxu1  ;;  %5110 = vmatprep.mubr.bf16.mxu1 %v3241_v10 }
 0x40b   :  { %v3017_v4 = vpop.f32.mrb[214].mxu1 }
 0x40c   :  { %v3018_v45 = vadd.f32 %v7198_v62, %v3017_v4  ;;  %v3019_v63 = vpop.f32.mrb[215].mxu1  ;;  %v3191_v43 = vmax.f32 %v3015_v26, 0.0 }
 0x40e   :  { %v3192_v1 = vmax.f32 %v3018_v45, 0.0 }
 0x410   :  { %v3242_v6 = vpack.c.bf16 %v3192_v1, %v3191_v43 }
 0x411   :  { %v3022_v59 = vpop.f32.mrb[216].mxu1 }
 0x412   :  { %v3023_v54 = vadd.f32 %v7198_v62, %v3022_v59  ;;  %v3024_v19 = vpop.f32.mrb[217].mxu1  ;;  %5111 = vmatmul.mubr.bf16.gmra.mrb[56].mxu1 %v3242_v6 }
 0x413   :  { %v3025_v37 = vpop.f32.mrb[218].mxu1 }
 0x414   :  { %v3026_v47 = vadd.f32 %v7198_v62, %v3025_v37  ;;  %v3027_v17 = vpop.f32.mrb[219].mxu1  ;;  %v3193_v23 = vmax.f32 %v3023_v54, 0.0 }
 0x416   :  { %v3194_v30 = vmax.f32 %v3026_v47, 0.0 }
 0x418   :  { %v3243_v3 = vpack.c.bf16 %v3194_v30, %v3193_v23 }
 0x419   :  { %v3030_v56 = vpop.f32.mrb[220].mxu1 }
 0x41a   :  { %v3031_v53 = vadd.f32 %v7198_v62, %v3030_v56  ;;  %v3032_v22 = vpop.f32.mrb[221].mxu1  ;;  %5114 = vmatprep.mubr.bf16.mxu1 %v3243_v3 }
 0x41b   :  { %v3033_v7 = vpop.f32.mrb[222].mxu1 }
 0x41c   :  { %v3034_v8 = vadd.f32 %v7198_v62, %v3033_v7  ;;  %v3035_v15 = vpop.f32.mrb[223].mxu1  ;;  %v3195_v61 = vmax.f32 %v3031_v53, 0.0 }
 0x41e   :  { %v3196_v11 = vmax.f32 %v3034_v8, 0.0 }
 0x420   :  { %v3244_v44 = vpack.c.bf16 %v3196_v11, %v3195_v61 }
 0x421   :  { %v3038_v9 = vpop.f32.mrb[224].mxu1 }
 0x422   :  { %v3039_v48 = vadd.f32 %v7198_v62, %v3038_v9  ;;  %v3040_v32 = vpop.f32.mrb[225].mxu1  ;;  %5115 = vmatmul.mubr.bf16.gmra.mrb[60].mxu1 %v3244_v44 }
 0x423   :  { %v3041_v13 = vpop.f32.mrb[226].mxu1 }
 0x424   :  { %v3042_v40 = vadd.f32 %v7198_v62, %v3041_v13  ;;  %v3043_v49 = vpop.f32.mrb[227].mxu1  ;;  %v3197_v33 = vmax.f32 %v3039_v48, 0.0 }
 0x426   :  { %v3198_v5 = vmax.f32 %v3042_v40, 0.0 }
 0x428   :  { %v3245_v57 = vpack.c.bf16 %v3198_v5, %v3197_v33 }
 0x429   :  { %v3046_v35 = vpop.f32.mrb[228].mxu1 }
 0x42a   :  { %v3047_v21 = vadd.f32 %v7198_v62, %v3046_v35  ;;  %v3048_v25 = vpop.f32.mrb[229].mxu1  ;;  %5118 = vmatprep.mubr.bf16.mxu1 %v3245_v57 }
 0x42b   :  { %v3049_v24 = vpop.f32.mrb[230].mxu1 }
 0x42c   :  { %v3050_v51 = vadd.f32 %v7198_v62, %v3049_v24  ;;  %v3051_v34 = vpop.f32.mrb[231].mxu1  ;;  %v3199_v16 = vmax.f32 %v3047_v21, 0.0 }
 0x42e   :  { %v3200_v52 = vmax.f32 %v3050_v51, 0.0 }
 0x430   :  { %v3246_v28 = vpack.c.bf16 %v3200_v52, %v3199_v16 }
 0x431   :  { %v3054_v39 = vpop.f32.mrb[232].mxu1 }
 0x432   :  { %v3055_v29 = vadd.f32 %v7198_v62, %v3054_v39  ;;  %v3056_v14 = vpop.f32.mrb[233].mxu1  ;;  %5119 = vmatmul.mubr.bf16.gmra.mrb[64].mxu1 %v3246_v28 }
 0x433   :  { %v3057_v12 = vpop.f32.mrb[234].mxu1 }
 0x434   :  { %v3058_v58 = vadd.f32 %v7198_v62, %v3057_v12  ;;  %v3059_v31 = vpop.f32.mrb[235].mxu1  ;;  %v3201_v60 = vmax.f32 %v3055_v29, 0.0  ;;  %v5701_v29 = vld [vmem:[%s7840_s11] sm:$0xff]  }
 0x435   :  { %5222 = vmatprep.subr.bf16.mxu0 %v5701_v29 }
 0x436   :  { %v3202_v50 = vmax.f32 %v3058_v58, 0.0  ;;  %5223 = vmatpush3.bf16.msra.mxu0 %v5701_v29 }
 0x438   :  { %v3247_v38 = vpack.c.bf16 %v3202_v50, %v3201_v60 }
 0x439   :  { %v3062_v42 = vpop.f32.mrb[236].mxu1 }
 0x43a   :  { %v3063_v55 = vadd.f32 %v7198_v62, %v3062_v42  ;;  %v3064_v46 = vpop.f32.mrb[237].mxu1  ;;  %5122 = vmatprep.mubr.bf16.mxu1 %v3247_v38 }
 0x43b   :  { %v3065_v0 = vpop.f32.mrb[238].mxu1 }
 0x43c   :  { %v3066_v10 = vadd.f32 %v7198_v62, %v3065_v0  ;;  %v3067_v36 = vpop.f32.mrb[239].mxu1  ;;  %v3203_v18 = vmax.f32 %v3063_v55, 0.0 }
 0x43e   :  { %v3204_v26 = vmax.f32 %v3066_v10, 0.0 }
 0x440   :  { %v3248_v41 = vpack.c.bf16 %v3204_v26, %v3203_v18 }
 0x441   :  { %v3070_v4 = vpop.f32.mrb[240].mxu1 }
 0x442   :  { %v3071_v45 = vadd.f32 %v7198_v62, %v3070_v4  ;;  %v3072_v63 = vpop.f32.mrb[241].mxu1  ;;  %5123 = vmatmul.mubr.bf16.gmra.mrb[68].mxu1 %v3248_v41 }
 0x443   :  { %v3073_v43 = vpop.f32.mrb[242].mxu1 }
 0x444   :  { %v3074_v1 = vadd.f32 %v7198_v62, %v3073_v43  ;;  %v3075_v6 = vpop.f32.mrb[243].mxu1  ;;  %v3205_v59 = vmax.f32 %v3071_v45, 0.0 }
 0x446   :  { %v3206_v54 = vmax.f32 %v3074_v1, 0.0 }
 0x448   :  { %v3249_v19 = vpack.c.bf16 %v3206_v54, %v3205_v59 }
 0x449   :  { %v3078_v37 = vpop.f32.mrb[244].mxu1 }
 0x44a   :  { %v3079_v47 = vadd.f32 %v7198_v62, %v3078_v37  ;;  %v3080_v17 = vpop.f32.mrb[245].mxu1  ;;  %5126 = vmatprep.mubr.bf16.mxu1 %v3249_v19 }
 0x44b   :  { %v3081_v23 = vpop.f32.mrb[246].mxu1 }
 0x44c   :  { %v3082_v30 = vadd.f32 %v7198_v62, %v3081_v23  ;;  %v3083_v3 = vpop.f32.mrb[247].mxu1  ;;  %v3207_v56 = vmax.f32 %v3079_v47, 0.0 }
 0x44e   :  { %v3208_v53 = vmax.f32 %v3082_v30, 0.0 }
 0x450   :  { %v3250_v22 = vpack.c.bf16 %v3208_v53, %v3207_v56 }
 0x451   :  { %v3086_v7 = vpop.f32.mrb[248].mxu1 }
 0x452   :  { %v3087_v8 = vadd.f32 %v7198_v62, %v3086_v7  ;;  %v3088_v15 = vpop.f32.mrb[249].mxu1  ;;  %5127 = vmatmul.mubr.bf16.gmra.mrb[72].mxu1 %v3250_v22 }
 0x453   :  { %v3089_v61 = vpop.f32.mrb[250].mxu1 }
 0x454   :  { %v3090_v11 = vadd.f32 %v7198_v62, %v3089_v61  ;;  %v3091_v20 = vpop.f32.mrb[251].mxu1  ;;  %v3209_v44 = vmax.f32 %v3087_v8, 0.0 }
 0x456   :  { %v3210_v9 = vmax.f32 %v3090_v11, 0.0 }
 0x458   :  { %v3251_v48 = vpack.c.bf16 %v3210_v9, %v3209_v44 }
 0x459   :  { %v3094_v32 = vpop.f32.mrb[252].mxu1 }
 0x45a   :  { %v3095_v27 = vadd.f32 %v7198_v62, %v3094_v32  ;;  %v3096_v13 = vpop.f32.mrb[253].mxu1  ;;  %5130 = vmatprep.mubr.bf16.mxu1 %v3251_v48 }
 0x45b   :  { %v3097_v40 = vpop.f32.mrb[254].mxu1 }
 0x45c   :  { %v3098_v49 = vadd.f32 %v7198_v62, %v3097_v40  ;;  %v3099_v33 = vpop.f32.mrb[255].mxu1  ;;  %v3211_v5 = vmax.f32 %v3095_v27, 0.0 }
 0x45e   :  { %v3212_v2 = vmax.f32 %v3098_v49, 0.0 }
 0x460   :  { %v3252_v57 = vpack.c.bf16 %v3212_v2, %v3211_v5 }
 0x461   :  { %v3102_v35 = vpop.f32.mrb[0].mxu1 }
 0x462   :  { %v3103_v21 = vadd.f32 %v7198_v62, %v3102_v35  ;;  %v3104_v25 = vpop.f32.mrb[1].mxu1  ;;  %5131 = vmatmul.mubr.bf16.gmra.mrb[76].mxu1 %v3252_v57 }
 0x463   :  { %v3105_v24 = vpop.f32.mrb[2].mxu1 }
 0x464   :  { %v3106_v51 = vadd.f32 %v7198_v62, %v3105_v24  ;;  %v3107_v34 = vpop.f32.mrb[3].mxu1  ;;  %v3213_v16 = vmax.f32 %v3103_v21, 0.0 }
 0x466   :  { %v3214_v52 = vmax.f32 %v3106_v51, 0.0 }
 0x468   :  { %v3253_v28 = vpack.c.bf16 %v3214_v52, %v3213_v16 }
 0x469   :  { %v3110_v39 = vpop.f32.mrb[4].mxu1 }
 0x46a   :  { %v3111_v14 = vadd.f32 %v7198_v62, %v3110_v39  ;;  %v3112_v12 = vpop.f32.mrb[5].mxu1  ;;  %5134 = vmatprep.mubr.bf16.mxu1 %v3253_v28  ;;  %v7304_v39 = vld [vmem:[%s7841_s8] ss:$0 sm:$0xff] }
 0x46b   :  { %v3113_v58 = vpop.f32.mrb[6].mxu1 }
 0x46c   :  { %v3114_v31 = vadd.f32 %v7198_v62, %v3113_v58  ;;  %v3115_v60 = vpop.f32.mrb[7].mxu1  ;;  %v3215_v50 = vmax.f32 %v3111_v14, 0.0 }
 0x46e   :  { %v3216_v38 = vmax.f32 %v3114_v31, 0.0 }
 0x470   :  { %v3254_v42 = vpack.c.bf16 %v3216_v38, %v3215_v50 }
 0x471   :  { %v3118_v55 = vpop.f32.mrb[8].mxu1 }
 0x472   :  { %v3119_v46 = vadd.f32 %v7198_v62, %v3118_v55  ;;  %v3120_v0 = vpop.f32.mrb[9].mxu1  ;;  %5135 = vmatmul.mubr.bf16.gmra.mrb[80].mxu1 %v3254_v42 }
 0x473   :  { %v3121_v10 = vpop.f32.mrb[10].mxu1 }
 0x474   :  { %v3122_v36 = vadd.f32 %v7198_v62, %v3121_v10  ;;  %v3123_v18 = vpop.f32.mrb[11].mxu1  ;;  %v3217_v26 = vmax.f32 %v3119_v46, 0.0 }
 0x476   :  { %v3218_v41 = vmax.f32 %v3122_v36, 0.0 }
 0x478   :  { %v3255_v4 = vpack.c.bf16 %v3218_v41, %v3217_v26 }
 0x479   :  { %v3126_v45 = vpop.f32.mrb[12].mxu1 }
 0x47a   :  { %v3127_v63 = vadd.f32 %v7198_v62, %v3126_v45  ;;  %v3128_v43 = vpop.f32.mrb[13].mxu1  ;;  %5138 = vmatprep.mubr.bf16.mxu1 %v3255_v4 }
 0x47b   :  { %v3129_v1 = vpop.f32.mrb[14].mxu1 }
 0x47c   :  { %v3130_v6 = vadd.f32 %v7198_v62, %v3129_v1  ;;  %v3131_v59 = vpop.f32.mrb[15].mxu1  ;;  %v3219_v54 = vmax.f32 %v3127_v63, 0.0 }
 0x47e   :  { %v3220_v19 = vmax.f32 %v3130_v6, 0.0 }
 0x480   :  { %v3256_v37 = vpack.c.bf16 %v3220_v19, %v3219_v54 }
 0x481   :  { %v3134_v47 = vpop.f32.mrb[16].mxu1 }
 0x482   :  { %v3135_v17 = vadd.f32 %v7198_v62, %v3134_v47  ;;  %v3136_v23 = vpop.f32.mrb[17].mxu1  ;;  %5139 = vmatmul.mubr.bf16.gmra.mrb[84].mxu1 %v3256_v37 }
 0x483   :  { %v3137_v30 = vpop.f32.mrb[18].mxu1 }
 0x484   :  { %v3138_v3 = vadd.f32 %v7198_v62, %v3137_v30  ;;  %v3139_v56 = vpop.f32.mrb[19].mxu1  ;;  %v3221_v53 = vmax.f32 %v3135_v17, 0.0 }
 0x486   :  { %v3222_v22 = vmax.f32 %v3138_v3, 0.0 }
 0x488   :  { %v3257_v7 = vpack.c.bf16 %v3222_v22, %v3221_v53 }
 0x489   :  { %v3142_v8 = vpop.f32.mrb[20].mxu1 }
 0x48a   :  { %v3143_v15 = vadd.f32 %v7198_v62, %v3142_v8  ;;  %v3144_v61 = vpop.f32.mrb[21].mxu1  ;;  %5142 = vmatprep.mubr.bf16.mxu1 %v3257_v7 }
 0x48b   :  { %v3145_v11 = vpop.f32.mrb[22].mxu1 }
 0x48c   :  { %v3146_v20 = vadd.f32 %v7198_v62, %v3145_v11  ;;  %v3147_v44 = vpop.f32.mrb[23].mxu1  ;;  %v3223_v9 = vmax.f32 %v3143_v15, 0.0 }
 0x48e   :  { %v3224_v48 = vmax.f32 %v3146_v20, 0.0 }
 0x490   :  { %v3258_v32 = vpack.c.bf16 %v3224_v48, %v3223_v9 }
 0x491   :  { %v3150_v27 = vpop.f32.mrb[24].mxu1 }
 0x492   :  { %v3151_v13 = vadd.f32 %v7198_v62, %v3150_v27  ;;  %v3152_v40 = vpop.f32.mrb[25].mxu1  ;;  %5143 = vmatmul.mubr.bf16.gmra.mrb[88].mxu1 %v3258_v32 }
 0x493   :  { %v3153_v49 = vpop.f32.mrb[26].mxu1 }
 0x494   :  { %v3154_v33 = vadd.f32 %v7198_v62, %v3153_v49  ;;  %v3155_v5 = vpop.f32.mrb[27].mxu1  ;;  %v3225_v2 = vmax.f32 %v3151_v13, 0.0 }
 0x496   :  { %v3226_v57 = vmax.f32 %v3154_v33, 0.0 }
 0x498   :  { %v3259_v35 = vpack.c.bf16 %v3226_v57, %v3225_v2 }
 0x499   :  { %v3158_v21 = vpop.f32.mrb[28].mxu1 }
 0x49a   :  { %v3159_v25 = vadd.f32 %v7198_v62, %v3158_v21  ;;  %v3160_v24 = vpop.f32.mrb[29].mxu1  ;;  %5146 = vmatprep.mubr.bf16.mxu1 %v3259_v35 }
 0x49b   :  { %v3161_v51 = vpop.f32.mrb[30].mxu1 }
 0x49c   :  { %v3162_v34 = vadd.f32 %v7198_v62, %v3161_v51  ;;  %v3163_v16 = vpop.f32.mrb[31].mxu1  ;;  %v3227_v52 = vmax.f32 %v3159_v25, 0.0 }
 0x49e   :  { %v3228_v28 = vmax.f32 %v3162_v34, 0.0 }
 0x4a0   :  { %v3260_v29 = vpack.c.bf16 %v3228_v28, %v3227_v52 }
 0x4a1   :  { %v5088_v14 = vpop.f32.mrb[32].mxu1 }
 0x4a2   :  { %v3375_v12 = vadd.f32 %v5088_v14, %v7304_v39  ;;  %v3366_v58 = vpop.f32.mrb[33].mxu1  ;;  %5147 = vmatmul.mubr.bf16.gmra.mrb[92].mxu1 %v3260_v29 }
 0x4a3   :  { %v3367_v31 = vadd.f32 %v7304_v39, %v3366_v58  ;;  %v5089_v60 = vpop.f32.mrb[34].mxu1 }
 0x4a4   :  { %v3378_v50 = vadd.f32 %v5089_v60, %v7304_v39  ;;  %v3369_v62 = vpop.f32.mrb[35].mxu1  ;;  %v3623_v42 = vmax.f32 %v3375_v12, 0.0 }
 0x4a5   :  { %v3370_v38 = vadd.f32 %v7304_v39, %v3369_v62  ;;  %v3621_v46 = vmax.f32 %v3367_v31, 0.0 }
 0x4a6   :  { %v3624_v55 = vmax.f32 %v3378_v50, 0.0 }
 0x4a7   :  { %v3622_v0 = vmax.f32 %v3370_v38, 0.0 }
 0x4a8   :  { %v3686_v10 = vpack.c.bf16 %v3624_v55, %v3623_v42 }
 0x4a9   :  { %v3685_v36 = vpack.c.bf16 %v3622_v0, %v3621_v46  ;;  %v5092_v18 = vpop.f32.mrb[36].mxu1 }
 0x4aa   :  { %v3391_v26 = vadd.f32 %v5092_v18, %v7304_v39  ;;  %v3382_v41 = vpop.f32.mrb[37].mxu1 }
 0x4ab   :  { %v3383_v4 = vadd.f32 %v7304_v39, %v3382_v41  ;;  %v5093_v45 = vpop.f32.mrb[38].mxu1  ;;  %5158 = vmatprep.mubr.msk.bf16.mxu1 %vm3756_vm2, %v3685_v36 }
 0x4ac   :  { %v3394_v63 = vadd.f32 %v5093_v45, %v7304_v39  ;;  %v3385_v43 = vpop.f32.mrb[39].mxu1  ;;  %5159 = vmatmul.mubr.msk.bf16.vlgmr.msra.gmra.mrb[96].mxu1 %vm3756_vm2, %v3686_v10  ;;  %v3627_v6 = vmax.f32 %v3391_v26, 0.0 }
 0x4ad   :  { %v3386_v1 = vadd.f32 %v7304_v39, %v3385_v43  ;;  %v3625_v54 = vmax.f32 %v3383_v4, 0.0 }
 0x4ae   :  { %v3628_v59 = vmax.f32 %v3394_v63, 0.0 }
 0x4af   :  { %v3626_v19 = vmax.f32 %v3386_v1, 0.0 }
 0x4b0   :  { %v3688_v37 = vpack.c.bf16 %v3628_v59, %v3627_v6 }
 0x4b1   :  { %v3687_v47 = vpack.c.bf16 %v3626_v19, %v3625_v54  ;;  %v5096_v17 = vpop.f32.mrb[40].mxu1 }
 0x4b2   :  { %v3407_v23 = vadd.f32 %v5096_v17, %v7304_v39  ;;  %v3398_v30 = vpop.f32.mrb[41].mxu1  ;;  %v5702_v17 = vld [vmem:[%s7840_s11 + $0x8] sm:$0xff]  }
 0x4b3   :  { %v3399_v3 = vadd.f32 %v7304_v39, %v3398_v30  ;;  %v5097_v56 = vpop.f32.mrb[42].mxu1  ;;  %5162 = vmatprep.mubr.msk.bf16.mxu1 %vm3756_vm2, %v3687_v47  ;;  %5224 = vmatprep.subr.bf16.mxu0 %v5702_v17 }
 0x4b4   :  { %v3410_v53 = vadd.f32 %v5097_v56, %v7304_v39  ;;  %v3401_v22 = vpop.f32.mrb[43].mxu1  ;;  %5163 = vmatmul.mubr.msk.bf16.gmra.mrb[100].mxu1 %vm3756_vm2, %v3688_v37  ;;  %v3631_v8 = vmax.f32 %v3407_v23, 0.0  ;;  %5225 = vmatpush3.bf16.msra.mxu0 %v5702_v17 }
 0x4b5   :  { %v3402_v7 = vadd.f32 %v7304_v39, %v3401_v22  ;;  %v3629_v61 = vmax.f32 %v3399_v3, 0.0 }
 0x4b6   :  { %v3632_v15 = vmax.f32 %v3410_v53, 0.0 }
 0x4b7   :  { %v3630_v11 = vmax.f32 %v3402_v7, 0.0 }
 0x4b8   :  { %v3690_v20 = vpack.c.bf16 %v3632_v15, %v3631_v8 }
 0x4b9   :  { %v3689_v44 = vpack.c.bf16 %v3630_v11, %v3629_v61  ;;  %v5100_v9 = vpop.f32.mrb[44].mxu1 }
 0x4ba   :  { %v3423_v48 = vadd.f32 %v5100_v9, %v7304_v39  ;;  %v3414_v32 = vpop.f32.mrb[45].mxu1 }
 0x4bb   :  { %v3415_v27 = vadd.f32 %v7304_v39, %v3414_v32  ;;  %v5101_v13 = vpop.f32.mrb[46].mxu1  ;;  %5166 = vmatprep.mubr.msk.bf16.mxu1 %vm3756_vm2, %v3689_v44 }
 0x4bc   :  { %v3426_v40 = vadd.f32 %v5101_v13, %v7304_v39  ;;  %v3417_v49 = vpop.f32.mrb[47].mxu1  ;;  %5167 = vmatmul.mubr.msk.bf16.gmra.mrb[104].mxu1 %vm3756_vm2, %v3690_v20  ;;  %v3635_v5 = vmax.f32 %v3423_v48, 0.0 }
 0x4bd   :  { %v3418_v33 = vadd.f32 %v7304_v39, %v3417_v49  ;;  %v3633_v57 = vmax.f32 %v3415_v27, 0.0 }
 0x4be   :  { %v3636_v2 = vmax.f32 %v3426_v40, 0.0 }
 0x4bf   :  { %v3634_v35 = vmax.f32 %v3418_v33, 0.0 }
 0x4c0   :  { %v3692_v21 = vpack.c.bf16 %v3636_v2, %v3635_v5 }
 0x4c1   :  { %v3691_v25 = vpack.c.bf16 %v3634_v35, %v3633_v57 }
 0x4c3   :  { %5170 = vmatprep.mubr.msk.bf16.mxu1 %vm3756_vm2, %v3691_v25 }
 0x4c4   :  { %5171 = vmatmul.mubr.msk.bf16.gmra.mrb[108].mxu1 %vm3756_vm2, %v3692_v21 }
 0x4c5   :  { %v5104_v24 = vpop.f32.mrb[48].mxu1 }
 0x4c6   :  { %v3439_v51 = vadd.f32 %v5104_v24, %v7304_v39  ;;  %v3430_v34 = vpop.f32.mrb[49].mxu1 }
 0x4c7   :  { %v3431_v16 = vadd.f32 %v7304_v39, %v3430_v34  ;;  %v5105_v52 = vpop.f32.mrb[50].mxu1 }
 0x4c8   :  { %v3442_v28 = vadd.f32 %v5105_v52, %v7304_v39  ;;  %v3433_v29 = vpop.f32.mrb[51].mxu1  ;;  %v3639_v12 = vmax.f32 %v3439_v51, 0.0 }
 0x4c9   :  { %v3434_v14 = vadd.f32 %v7304_v39, %v3433_v29  ;;  %v3637_v31 = vmax.f32 %v3431_v16, 0.0 }
 0x4ca   :  { %v3640_v58 = vmax.f32 %v3442_v28, 0.0 }
 0x4cb   :  { %v3638_v60 = vmax.f32 %v3434_v14, 0.0 }
 0x4cc   :  { %v3694_v50 = vpack.c.bf16 %v3640_v58, %v3639_v12 }
 0x4cd   :  { %v3693_v62 = vpack.c.bf16 %v3638_v60, %v3637_v31 }
 0x4cf   :  { %5174 = vmatprep.mubr.msk.bf16.mxu1 %vm3756_vm2, %v3693_v62 }
 0x4d0   :  { %5175 = vmatmul.mubr.msk.bf16.gmra.mrb[112].mxu1 %vm3756_vm2, %v3694_v50 }
 0x4d5   :  { %v5108_v38 = vpop.f32.mrb[52].mxu1 }
 0x4d6   :  { %v3455_v42 = vadd.f32 %v5108_v38, %v7304_v39  ;;  %v3446_v55 = vpop.f32.mrb[53].mxu1 }
 0x4d7   :  { %v3447_v46 = vadd.f32 %v7304_v39, %v3446_v55  ;;  %v5109_v0 = vpop.f32.mrb[54].mxu1 }
 0x4d8   :  { %v3458_v10 = vadd.f32 %v5109_v0, %v7304_v39  ;;  %v3449_v36 = vpop.f32.mrb[55].mxu1  ;;  %v3643_v26 = vmax.f32 %v3455_v42, 0.0 }
 0x4d9   :  { %v3450_v18 = vadd.f32 %v7304_v39, %v3449_v36  ;;  %v3641_v4 = vmax.f32 %v3447_v46, 0.0 }
 0x4da   :  { %v3644_v41 = vmax.f32 %v3458_v10, 0.0 }
 0x4db   :  { %v3642_v45 = vmax.f32 %v3450_v18, 0.0 }
 0x4dc   :  { %v3696_v63 = vpack.c.bf16 %v3644_v41, %v3643_v26 }
 0x4dd   :  { %v3695_v43 = vpack.c.bf16 %v3642_v45, %v3641_v4 }
 0x4df   :  { %5178 = vmatprep.mubr.msk.bf16.mxu1 %vm3756_vm2, %v3695_v43 }
 0x4e0   :  { %5179 = vmatmul.mubr.msk.bf16.gmra.mrb[116].mxu1 %vm3756_vm2, %v3696_v63 }
 0x4e5   :  { %v5112_v1 = vpop.f32.mrb[56].mxu1 }
 0x4e6   :  { %v3471_v6 = vadd.f32 %v5112_v1, %v7304_v39  ;;  %v3462_v59 = vpop.f32.mrb[57].mxu1 }
 0x4e7   :  { %v3463_v54 = vadd.f32 %v7304_v39, %v3462_v59  ;;  %v5113_v19 = vpop.f32.mrb[58].mxu1 }
 0x4e8   :  { %v3474_v37 = vadd.f32 %v5113_v19, %v7304_v39  ;;  %v3465_v47 = vpop.f32.mrb[59].mxu1  ;;  %v3647_v30 = vmax.f32 %v3471_v6, 0.0 }
 0x4e9   :  { %v3466_v23 = vadd.f32 %v7304_v39, %v3465_v47  ;;  %v3645_v56 = vmax.f32 %v3463_v54, 0.0 }
 0x4ea   :  { %v3648_v3 = vmax.f32 %v3474_v37, 0.0 }
 0x4eb   :  { %v3646_v53 = vmax.f32 %v3466_v23, 0.0 }
 0x4ec   :  { %v3698_v22 = vpack.c.bf16 %v3648_v3, %v3647_v30 }
 0x4ed   :  { %v3697_v7 = vpack.c.bf16 %v3646_v53, %v3645_v56 }
 0x4ef   :  { %5182 = vmatprep.mubr.msk.bf16.mxu1 %vm3756_vm2, %v3697_v7 }
 0x4f0   :  { %5183 = vmatmul.mubr.msk.bf16.gmra.mrb[120].mxu1 %vm3756_vm2, %v3698_v22 }
 0x4f5   :  { %v5116_v8 = vpop.f32.mrb[60].mxu1 }
 0x4f6   :  { %v3487_v15 = vadd.f32 %v5116_v8, %v7304_v39  ;;  %v3478_v61 = vpop.f32.mrb[61].mxu1 }
 0x4f7   :  { %v3479_v11 = vadd.f32 %v7304_v39, %v3478_v61  ;;  %v5117_v20 = vpop.f32.mrb[62].mxu1 }
 0x4f8   :  { %v3490_v44 = vadd.f32 %v5117_v20, %v7304_v39  ;;  %v3481_v9 = vpop.f32.mrb[63].mxu1  ;;  %v3651_v32 = vmax.f32 %v3487_v15, 0.0 }
 0x4f9   :  { %v3482_v48 = vadd.f32 %v7304_v39, %v3481_v9  ;;  %v3649_v13 = vmax.f32 %v3479_v11, 0.0 }
 0x4fa   :  { %v3652_v27 = vmax.f32 %v3490_v44, 0.0 }
 0x4fb   :  { %v3650_v40 = vmax.f32 %v3482_v48, 0.0 }
 0x4fc   :  { %v3700_v49 = vpack.c.bf16 %v3652_v27, %v3651_v32 }
 0x4fd   :  { %v3699_v33 = vpack.c.bf16 %v3650_v40, %v3649_v13 }
 0x4ff   :  { %5186 = vmatprep.mubr.msk.bf16.mxu1 %vm3756_vm2, %v3699_v33 }
 0x500   :  { %5187 = vmatmul.mubr.msk.bf16.gmra.mrb[124].mxu1 %vm3756_vm2, %v3700_v49 }
 0x505   :  { %v5120_v5 = vpop.f32.mrb[64].mxu1 }
 0x506   :  { %v3503_v2 = vadd.f32 %v5120_v5, %v7304_v39  ;;  %v3494_v57 = vpop.f32.mrb[65].mxu1 }
 0x507   :  { %v3495_v35 = vadd.f32 %v7304_v39, %v3494_v57  ;;  %v5121_v21 = vpop.f32.mrb[66].mxu1 }
 0x508   :  { %v3506_v25 = vadd.f32 %v5121_v21, %v7304_v39  ;;  %v3497_v24 = vpop.f32.mrb[67].mxu1  ;;  %v3655_v34 = vmax.f32 %v3503_v2, 0.0 }
 0x509   :  { %v3498_v51 = vadd.f32 %v7304_v39, %v3497_v24  ;;  %v3653_v52 = vmax.f32 %v3495_v35, 0.0 }
 0x50a   :  { %v3656_v16 = vmax.f32 %v3506_v25, 0.0 }
 0x50b   :  { %v3654_v28 = vmax.f32 %v3498_v51, 0.0 }
 0x50c   :  { %v3702_v29 = vpack.c.bf16 %v3656_v16, %v3655_v34 }
 0x50d   :  { %v3701_v14 = vpack.c.bf16 %v3654_v28, %v3653_v52 }
 0x50f   :  { %5190 = vmatprep.mubr.msk.bf16.mxu1 %vm3756_vm2, %v3701_v14 }
 0x510   :  { %5191 = vmatmul.mubr.msk.bf16.gmra.mrb[128].mxu1 %vm3756_vm2, %v3702_v29 }
 0x515   :  { %v5124_v12 = vpop.f32.mrb[68].mxu1 }
 0x516   :  { %v3519_v58 = vadd.f32 %v5124_v12, %v7304_v39  ;;  %v3510_v31 = vpop.f32.mrb[69].mxu1 }
 0x517   :  { %v3511_v60 = vadd.f32 %v7304_v39, %v3510_v31  ;;  %v5125_v50 = vpop.f32.mrb[70].mxu1 }
 0x518   :  { %v3522_v62 = vadd.f32 %v5125_v50, %v7304_v39  ;;  %v3513_v38 = vpop.f32.mrb[71].mxu1  ;;  %v3659_v55 = vmax.f32 %v3519_v58, 0.0 }
 0x519   :  { %v3514_v42 = vadd.f32 %v7304_v39, %v3513_v38  ;;  %v3657_v0 = vmax.f32 %v3511_v60, 0.0 }
 0x51a   :  { %v3660_v46 = vmax.f32 %v3522_v62, 0.0 }
 0x51b   :  { %v3658_v10 = vmax.f32 %v3514_v42, 0.0 }
 0x51c   :  { %v3704_v36 = vpack.c.bf16 %v3660_v46, %v3659_v55 }
 0x51d   :  { %v3703_v18 = vpack.c.bf16 %v3658_v10, %v3657_v0 }
 0x51f   :  { %5194 = vmatprep.mubr.msk.bf16.mxu1 %vm3756_vm2, %v3703_v18 }
 0x520   :  { %5195 = vmatmul.mubr.msk.bf16.gmra.mrb[132].mxu1 %vm3756_vm2, %v3704_v36 }
 0x525   :  { %v5128_v26 = vpop.f32.mrb[72].mxu1 }
 0x526   :  { %v3535_v41 = vadd.f32 %v5128_v26, %v7304_v39  ;;  %v3526_v4 = vpop.f32.mrb[73].mxu1 }
 0x527   :  { %v3527_v45 = vadd.f32 %v7304_v39, %v3526_v4  ;;  %v5129_v63 = vpop.f32.mrb[74].mxu1 }
 0x528   :  { %v3538_v43 = vadd.f32 %v5129_v63, %v7304_v39  ;;  %v3529_v1 = vpop.f32.mrb[75].mxu1  ;;  %v3663_v59 = vmax.f32 %v3535_v41, 0.0 }
 0x529   :  { %v3530_v6 = vadd.f32 %v7304_v39, %v3529_v1  ;;  %v3661_v19 = vmax.f32 %v3527_v45, 0.0 }
 0x52a   :  { %v3664_v54 = vmax.f32 %v3538_v43, 0.0 }
 0x52b   :  { %v3662_v37 = vmax.f32 %v3530_v6, 0.0 }
 0x52c   :  { %v3706_v47 = vpack.c.bf16 %v3664_v54, %v3663_v59 }
 0x52d   :  { %v3705_v17 = vpack.c.bf16 %v3662_v37, %v3661_v19 }
 0x52f   :  { %5198 = vmatprep.mubr.msk.bf16.mxu1 %vm3756_vm2, %v3705_v17 }
 0x530   :  { %5199 = vmatmul.mubr.msk.bf16.gmra.mrb[136].mxu1 %vm3756_vm2, %v3706_v47 }
 0x535   :  { %v5132_v23 = vpop.f32.mrb[76].mxu1 }
 0x536   :  { %v3551_v30 = vadd.f32 %v5132_v23, %v7304_v39  ;;  %v3542_v3 = vpop.f32.mrb[77].mxu1 }
 0x537   :  { %v3543_v56 = vadd.f32 %v7304_v39, %v3542_v3  ;;  %v5133_v53 = vpop.f32.mrb[78].mxu1 }
 0x538   :  { %v3554_v22 = vadd.f32 %v5133_v53, %v7304_v39  ;;  %v3545_v7 = vpop.f32.mrb[79].mxu1  ;;  %v3667_v15 = vmax.f32 %v3551_v30, 0.0 }
 0x539   :  { %v3546_v8 = vadd.f32 %v7304_v39, %v3545_v7  ;;  %v3665_v11 = vmax.f32 %v3543_v56, 0.0 }
 0x53a   :  { %v3668_v61 = vmax.f32 %v3554_v22, 0.0 }
 0x53b   :  { %v3666_v20 = vmax.f32 %v3546_v8, 0.0  ;;  %v7406_v8 = vld [vmem:[%s7842_s10] ss:$0 sm:$0xff] }
 0x53c   :  { %v3708_v44 = vpack.c.bf16 %v3668_v61, %v3667_v15 }
 0x53d   :  { %v3707_v9 = vpack.c.bf16 %v3666_v20, %v3665_v11 }
 0x53f   :  { %5202 = vmatprep.mubr.msk.bf16.mxu1 %vm3756_vm2, %v3707_v9 }
 0x540   :  { %5203 = vmatmul.mubr.msk.bf16.gmra.mrb[140].mxu1 %vm3756_vm2, %v3708_v44 }
 0x545   :  { %v5136_v48 = vpop.f32.mrb[80].mxu1 }
 0x546   :  { %v3567_v32 = vadd.f32 %v5136_v48, %v7304_v39  ;;  %v3558_v27 = vpop.f32.mrb[81].mxu1 }
 0x547   :  { %v3559_v13 = vadd.f32 %v7304_v39, %v3558_v27  ;;  %v5137_v40 = vpop.f32.mrb[82].mxu1 }
 0x548   :  { %v3570_v49 = vadd.f32 %v5137_v40, %v7304_v39  ;;  %v3561_v33 = vpop.f32.mrb[83].mxu1  ;;  %v3671_v2 = vmax.f32 %v3567_v32, 0.0 }
 0x549   :  { %v3562_v5 = vadd.f32 %v7304_v39, %v3561_v33  ;;  %v3669_v35 = vmax.f32 %v3559_v13, 0.0 }
 0x54a   :  { %v3672_v57 = vmax.f32 %v3570_v49, 0.0 }
 0x54b   :  { %v3670_v21 = vmax.f32 %v3562_v5, 0.0 }
 0x54c   :  { %v3710_v25 = vpack.c.bf16 %v3672_v57, %v3671_v2 }
 0x54d   :  { %v3709_v24 = vpack.c.bf16 %v3670_v21, %v3669_v35 }
 0x54f   :  { %5206 = vmatprep.mubr.msk.bf16.mxu1 %vm3756_vm2, %v3709_v24 }
 0x550   :  { %5207 = vmatmul.mubr.msk.bf16.gmra.mrb[144].mxu1 %vm3756_vm2, %v3710_v25 }
 0x555   :  { %v5140_v51 = vpop.f32.mrb[84].mxu1 }
 0x556   :  { %v3583_v34 = vadd.f32 %v5140_v51, %v7304_v39  ;;  %v3574_v16 = vpop.f32.mrb[85].mxu1 }
 0x557   :  { %v3575_v52 = vadd.f32 %v7304_v39, %v3574_v16  ;;  %v5141_v28 = vpop.f32.mrb[86].mxu1 }
 0x558   :  { %v3586_v29 = vadd.f32 %v5141_v28, %v7304_v39  ;;  %v3577_v14 = vpop.f32.mrb[87].mxu1  ;;  %v3675_v58 = vmax.f32 %v3583_v34, 0.0 }
 0x559   :  { %v3578_v12 = vadd.f32 %v7304_v39, %v3577_v14  ;;  %v3673_v60 = vmax.f32 %v3575_v52, 0.0 }
 0x55a   :  { %v3676_v31 = vmax.f32 %v3586_v29, 0.0 }
 0x55b   :  { %v3674_v50 = vmax.f32 %v3578_v12, 0.0 }
 0x55c   :  { %v3712_v62 = vpack.c.bf16 %v3676_v31, %v3675_v58 }
 0x55d   :  { %v3711_v38 = vpack.c.bf16 %v3674_v50, %v3673_v60 }
 0x55f   :  { %5210 = vmatprep.mubr.msk.bf16.mxu1 %vm3756_vm2, %v3711_v38 }
 0x560   :  { %5211 = vmatmul.mubr.msk.bf16.gmra.mrb[148].mxu1 %vm3756_vm2, %v3712_v62 }
 0x565   :  { %v5144_v42 = vpop.f32.mrb[88].mxu1 }
 0x566   :  { %v3599_v55 = vadd.f32 %v5144_v42, %v7304_v39  ;;  %v3590_v46 = vpop.f32.mrb[89].mxu1 }
 0x567   :  { %v3591_v0 = vadd.f32 %v7304_v39, %v3590_v46  ;;  %v5145_v10 = vpop.f32.mrb[90].mxu1 }
 0x568   :  { %v3602_v36 = vadd.f32 %v5145_v10, %v7304_v39  ;;  %v3593_v18 = vpop.f32.mrb[91].mxu1  ;;  %v3679_v41 = vmax.f32 %v3599_v55, 0.0 }
 0x569   :  { %v3594_v26 = vadd.f32 %v7304_v39, %v3593_v18  ;;  %v3677_v45 = vmax.f32 %v3591_v0, 0.0 }
 0x56a   :  { %v3680_v4 = vmax.f32 %v3602_v36, 0.0 }
 0x56b   :  { %v3678_v63 = vmax.f32 %v3594_v26, 0.0 }
 0x56c   :  { %v3714_v43 = vpack.c.bf16 %v3680_v4, %v3679_v41 }
 0x56d   :  { %v3713_v1 = vpack.c.bf16 %v3678_v63, %v3677_v45 }
 0x56f   :  { %5214 = vmatprep.mubr.msk.bf16.mxu1 %vm3756_vm2, %v3713_v1 }
 0x570   :  { %5215 = vmatmul.mubr.msk.bf16.gmra.mrb[152].mxu1 %vm3756_vm2, %v3714_v43 }
 0x575   :  { %v5148_v6 = vpop.f32.mrb[92].mxu1 }
 0x576   :  { %v3615_v59 = vadd.f32 %v5148_v6, %v7304_v39  ;;  %v3606_v54 = vpop.f32.mrb[93].mxu1 }
 0x577   :  { %v3607_v19 = vadd.f32 %v7304_v39, %v3606_v54  ;;  %v5149_v37 = vpop.f32.mrb[94].mxu1 }
 0x578   :  { %v3618_v47 = vadd.f32 %v5149_v37, %v7304_v39  ;;  %v3609_v17 = vpop.f32.mrb[95].mxu1  ;;  %v3683_v30 = vmax.f32 %v3615_v59, 0.0 }
 0x579   :  { %v3610_v23 = vadd.f32 %v7304_v39, %v3609_v17  ;;  %v3681_v56 = vmax.f32 %v3607_v19, 0.0 }
 0x57a   :  { %v3684_v3 = vmax.f32 %v3618_v47, 0.0 }
 0x57b   :  { %v3682_v53 = vmax.f32 %v3610_v23, 0.0 }
 0x57c   :  { %v3716_v22 = vpack.c.bf16 %v3684_v3, %v3683_v30 }
 0x57d   :  { %v3715_v7 = vpack.c.bf16 %v3682_v53, %v3681_v56 }
 0x57f   :  { %v5160_v15 = vpop.f32.mrb[96].mxu1  ;;  %5218 = vmatprep.mubr.msk.bf16.mxu1 %vm3756_vm2, %v3715_v7 }
 0x580   :  { %v3896_v61 = vadd.f32 %v5160_v15, %v7406_v8  ;;  %v3887_v11 = vpop.f32.mrb[97].mxu1  ;;  %5219 = vmatmul.mubr.msk.bf16.gmra.mrb[156].mxu1 %vm3756_vm2, %v3716_v22 }
 0x581   :  { %v3888_v39 = vadd.f32 %v7406_v8, %v3887_v11  ;;  %v5161_v20 = vpop.f32.mrb[98].mxu1 }
 0x582   :  { %v3899_v44 = vadd.f32 %v5161_v20, %v7406_v8  ;;  %v3890_v9 = vpop.f32.mrb[99].mxu1  ;;  %v4144_v32 = vmax.f32 %v3896_v61, 0.0 }
 0x583   :  { %v3891_v48 = vadd.f32 %v7406_v8, %v3890_v9  ;;  %v4142_v13 = vmax.f32 %v3888_v39, 0.0 }
 0x584   :  { %v4145_v27 = vmax.f32 %v3899_v44, 0.0 }
 0x585   :  { %v4143_v40 = vmax.f32 %v3891_v48, 0.0 }
 0x586   :  { %v4207_v49 = vpack.c.bf16 %v4145_v27, %v4144_v32 }
 0x587   :  { %v4206_v33 = vpack.c.bf16 %v4143_v40, %v4142_v13  ;;  %v5164_v5 = vpop.f32.mrb[100].mxu1 }
 0x588   :  { %v3912_v2 = vadd.f32 %v5164_v5, %v7406_v8  ;;  %v3903_v57 = vpop.f32.mrb[101].mxu1 }
 0x589   :  { %v3904_v35 = vadd.f32 %v7406_v8, %v3903_v57  ;;  %v5165_v21 = vpop.f32.mrb[102].mxu1  ;;  %5226 = vmatprep.mubr.msk.bf16.mxu0 %vm4261_vm3, %v4206_v33 }
 0x58a   :  { %v3915_v25 = vadd.f32 %v5165_v21, %v7406_v8  ;;  %v3906_v24 = vpop.f32.mrb[103].mxu1  ;;  %5227 = vmatmul.mubr.msk.bf16.vlgmr.msra.gmra.mrb[224].mxu0 %vm4261_vm3, %v4207_v49  ;;  %v4148_v34 = vmax.f32 %v3912_v2, 0.0 }
 0x58b   :  { %v3907_v51 = vadd.f32 %v7406_v8, %v3906_v24  ;;  %v4146_v52 = vmax.f32 %v3904_v35, 0.0 }
 0x58c   :  { %v4149_v16 = vmax.f32 %v3915_v25, 0.0 }
 0x58d   :  { %v4147_v28 = vmax.f32 %v3907_v51, 0.0 }
 0x58e   :  { %v4209_v29 = vpack.c.bf16 %v4149_v16, %v4148_v34 }
 0x58f   :  { %v4208_v14 = vpack.c.bf16 %v4147_v28, %v4146_v52  ;;  %v5168_v12 = vpop.f32.mrb[104].mxu1 }
 0x590   :  { %v3928_v58 = vadd.f32 %v5168_v12, %v7406_v8  ;;  %v3919_v31 = vpop.f32.mrb[105].mxu1 }
 0x591   :  { %v3920_v60 = vadd.f32 %v7406_v8, %v3919_v31  ;;  %v5169_v50 = vpop.f32.mrb[106].mxu1  ;;  %5230 = vmatprep.mubr.msk.bf16.mxu0 %vm4261_vm3, %v4208_v14 }
 0x592   :  { %v3931_v62 = vadd.f32 %v5169_v50, %v7406_v8  ;;  %v3922_v38 = vpop.f32.mrb[107].mxu1  ;;  %5231 = vmatmul.mubr.msk.bf16.gmra.mrb[228].mxu0 %vm4261_vm3, %v4209_v29  ;;  %v4152_v55 = vmax.f32 %v3928_v58, 0.0 }
 0x593   :  { %v3923_v42 = vadd.f32 %v7406_v8, %v3922_v38  ;;  %v4150_v0 = vmax.f32 %v3920_v60, 0.0 }
 0x594   :  { %v4153_v46 = vmax.f32 %v3931_v62, 0.0 }
 0x595   :  { %v4151_v10 = vmax.f32 %v3923_v42, 0.0 }
 0x596   :  { %v4211_v36 = vpack.c.bf16 %v4153_v46, %v4152_v55 }
 0x597   :  { %v4210_v18 = vpack.c.bf16 %v4151_v10, %v4150_v0  ;;  %v5172_v26 = vpop.f32.mrb[108].mxu1 }
 0x598   :  { %v3944_v41 = vadd.f32 %v5172_v26, %v7406_v8  ;;  %v3935_v4 = vpop.f32.mrb[109].mxu1 }
 0x599   :  { %v3936_v45 = vadd.f32 %v7406_v8, %v3935_v4  ;;  %v5173_v63 = vpop.f32.mrb[110].mxu1  ;;  %5234 = vmatprep.mubr.msk.bf16.mxu0 %vm4261_vm3, %v4210_v18 }
 0x59a   :  { %v3947_v43 = vadd.f32 %v5173_v63, %v7406_v8  ;;  %v3938_v1 = vpop.f32.mrb[111].mxu1  ;;  %5235 = vmatmul.mubr.msk.bf16.gmra.mrb[232].mxu0 %vm4261_vm3, %v4211_v36  ;;  %v4156_v59 = vmax.f32 %v3944_v41, 0.0 }
 0x59b   :  { %v3939_v6 = vadd.f32 %v7406_v8, %v3938_v1  ;;  %v4154_v19 = vmax.f32 %v3936_v45, 0.0 }
 0x59c   :  { %v4157_v54 = vmax.f32 %v3947_v43, 0.0 }
 0x59d   :  { %v4155_v37 = vmax.f32 %v3939_v6, 0.0 }
 0x59e   :  { %v4213_v47 = vpack.c.bf16 %v4157_v54, %v4156_v59 }
 0x59f   :  { %v4212_v17 = vpack.c.bf16 %v4155_v37, %v4154_v19 }
 0x5a1   :  { %5238 = vmatprep.mubr.msk.bf16.mxu0 %vm4261_vm3, %v4212_v17 }
 0x5a2   :  { %5239 = vmatmul.mubr.msk.bf16.gmra.mrb[236].mxu0 %vm4261_vm3, %v4213_v47 }
 0x5a3   :  { %v5176_v23 = vpop.f32.mrb[112].mxu1 }
 0x5a4   :  { %v3960_v30 = vadd.f32 %v5176_v23, %v7406_v8  ;;  %v3951_v3 = vpop.f32.mrb[113].mxu1 }
 0x5a5   :  { %v3952_v56 = vadd.f32 %v7406_v8, %v3951_v3  ;;  %v5177_v53 = vpop.f32.mrb[114].mxu1 }
 0x5a6   :  { %v3963_v22 = vadd.f32 %v5177_v53, %v7406_v8  ;;  %v3954_v7 = vpop.f32.mrb[115].mxu1  ;;  %v4160_v61 = vmax.f32 %v3960_v30, 0.0 }
 0x5a7   :  { %v3955_v15 = vadd.f32 %v7406_v8, %v3954_v7  ;;  %v4158_v39 = vmax.f32 %v3952_v56, 0.0 }
 0x5a8   :  { %v4161_v11 = vmax.f32 %v3963_v22, 0.0 }
 0x5a9   :  { %v4159_v20 = vmax.f32 %v3955_v15, 0.0 }
 0x5aa   :  { %v4215_v44 = vpack.c.bf16 %v4161_v11, %v4160_v61 }
 0x5ab   :  { %v4214_v9 = vpack.c.bf16 %v4159_v20, %v4158_v39 }
 0x5ad   :  { %5242 = vmatprep.mubr.msk.bf16.mxu0 %vm4261_vm3, %v4214_v9 }
 0x5ae   :  { %5243 = vmatmul.mubr.msk.bf16.gmra.mrb[240].mxu0 %vm4261_vm3, %v4215_v44 }
 0x5b3   :  { %v5180_v48 = vpop.f32.mrb[116].mxu1 }
 0x5b4   :  { %v3976_v32 = vadd.f32 %v5180_v48, %v7406_v8  ;;  %v3967_v27 = vpop.f32.mrb[117].mxu1 }
 0x5b5   :  { %v3968_v13 = vadd.f32 %v7406_v8, %v3967_v27  ;;  %v5181_v40 = vpop.f32.mrb[118].mxu1 }
 0x5b6   :  { %v3979_v49 = vadd.f32 %v5181_v40, %v7406_v8  ;;  %v3970_v33 = vpop.f32.mrb[119].mxu1  ;;  %v4164_v2 = vmax.f32 %v3976_v32, 0.0 }
 0x5b7   :  { %v3971_v5 = vadd.f32 %v7406_v8, %v3970_v33  ;;  %v4162_v35 = vmax.f32 %v3968_v13, 0.0 }
 0x5b8   :  { %v4165_v57 = vmax.f32 %v3979_v49, 0.0 }
 0x5b9   :  { %v4163_v21 = vmax.f32 %v3971_v5, 0.0 }
 0x5ba   :  { %v4217_v25 = vpack.c.bf16 %v4165_v57, %v4164_v2 }
 0x5bb   :  { %v4216_v24 = vpack.c.bf16 %v4163_v21, %v4162_v35 }
 0x5bd   :  { %5246 = vmatprep.mubr.msk.bf16.mxu0 %vm4261_vm3, %v4216_v24 }
 0x5be   :  { %5247 = vmatmul.mubr.msk.bf16.gmra.mrb[244].mxu0 %vm4261_vm3, %v4217_v25 }
 0x5c3   :  { %v5184_v51 = vpop.f32.mrb[120].mxu1 }
 0x5c4   :  { %v3992_v34 = vadd.f32 %v5184_v51, %v7406_v8  ;;  %v3983_v16 = vpop.f32.mrb[121].mxu1 }
 0x5c5   :  { %v3984_v52 = vadd.f32 %v7406_v8, %v3983_v16  ;;  %v5185_v28 = vpop.f32.mrb[122].mxu1 }
 0x5c6   :  { %v3995_v29 = vadd.f32 %v5185_v28, %v7406_v8  ;;  %v3986_v14 = vpop.f32.mrb[123].mxu1  ;;  %v4168_v58 = vmax.f32 %v3992_v34, 0.0 }
 0x5c7   :  { %v3987_v12 = vadd.f32 %v7406_v8, %v3986_v14  ;;  %v4166_v60 = vmax.f32 %v3984_v52, 0.0 }
 0x5c8   :  { %v4169_v31 = vmax.f32 %v3995_v29, 0.0 }
 0x5c9   :  { %v4167_v50 = vmax.f32 %v3987_v12, 0.0 }
 0x5ca   :  { %v4219_v62 = vpack.c.bf16 %v4169_v31, %v4168_v58 }
 0x5cb   :  { %v4218_v38 = vpack.c.bf16 %v4167_v50, %v4166_v60 }
 0x5cd   :  { %5250 = vmatprep.mubr.msk.bf16.mxu0 %vm4261_vm3, %v4218_v38 }
 0x5ce   :  { %5251 = vmatmul.mubr.msk.bf16.gmra.mrb[248].mxu0 %vm4261_vm3, %v4219_v62 }
 0x5d3   :  { %v5188_v42 = vpop.f32.mrb[124].mxu1 }
 0x5d4   :  { %v4008_v55 = vadd.f32 %v5188_v42, %v7406_v8  ;;  %v3999_v46 = vpop.f32.mrb[125].mxu1 }
 0x5d5   :  { %v4000_v0 = vadd.f32 %v7406_v8, %v3999_v46  ;;  %v5189_v10 = vpop.f32.mrb[126].mxu1 }
 0x5d6   :  { %v4011_v36 = vadd.f32 %v5189_v10, %v7406_v8  ;;  %v4002_v18 = vpop.f32.mrb[127].mxu1  ;;  %v4172_v41 = vmax.f32 %v4008_v55, 0.0 }
 0x5d7   :  { %v4003_v26 = vadd.f32 %v7406_v8, %v4002_v18  ;;  %v4170_v45 = vmax.f32 %v4000_v0, 0.0 }
 0x5d8   :  { %v4173_v4 = vmax.f32 %v4011_v36, 0.0 }
 0x5d9   :  { %v4171_v63 = vmax.f32 %v4003_v26, 0.0 }
 0x5da   :  { %v4221_v43 = vpack.c.bf16 %v4173_v4, %v4172_v41 }
 0x5db   :  { %v4220_v1 = vpack.c.bf16 %v4171_v63, %v4170_v45 }
 0x5dd   :  { %5254 = vmatprep.mubr.msk.bf16.mxu0 %vm4261_vm3, %v4220_v1 }
 0x5de   :  { %5255 = vmatmul.mubr.msk.bf16.gmra.mrb[252].mxu0 %vm4261_vm3, %v4221_v43 }
 0x5e3   :  { %v5192_v6 = vpop.f32.mrb[128].mxu1 }
 0x5e4   :  { %v4024_v59 = vadd.f32 %v5192_v6, %v7406_v8  ;;  %v4015_v54 = vpop.f32.mrb[129].mxu1 }
 0x5e5   :  { %v4016_v19 = vadd.f32 %v7406_v8, %v4015_v54  ;;  %v5193_v37 = vpop.f32.mrb[130].mxu1 }
 0x5e6   :  { %v4027_v47 = vadd.f32 %v5193_v37, %v7406_v8  ;;  %v4018_v17 = vpop.f32.mrb[131].mxu1  ;;  %v4176_v30 = vmax.f32 %v4024_v59, 0.0 }
 0x5e7   :  { %v4019_v23 = vadd.f32 %v7406_v8, %v4018_v17  ;;  %v4174_v56 = vmax.f32 %v4016_v19, 0.0 }
 0x5e8   :  { %v4177_v3 = vmax.f32 %v4027_v47, 0.0 }
 0x5e9   :  { %v4175_v53 = vmax.f32 %v4019_v23, 0.0 }
 0x5ea   :  { %v4223_v22 = vpack.c.bf16 %v4177_v3, %v4176_v30 }
 0x5eb   :  { %v4222_v7 = vpack.c.bf16 %v4175_v53, %v4174_v56 }
 0x5ed   :  { %5258 = vmatprep.mubr.msk.bf16.mxu0 %vm4261_vm3, %v4222_v7 }
 0x5ee   :  { %5259 = vmatmul.mubr.msk.bf16.gmra.mrb[0].mxu0 %vm4261_vm3, %v4223_v22 }
 0x5f3   :  { %v5196_v15 = vpop.f32.mrb[132].mxu1 }
 0x5f4   :  { %v4040_v61 = vadd.f32 %v5196_v15, %v7406_v8  ;;  %v4031_v11 = vpop.f32.mrb[133].mxu1 }
 0x5f5   :  { %v4032_v39 = vadd.f32 %v7406_v8, %v4031_v11  ;;  %v5197_v20 = vpop.f32.mrb[134].mxu1 }
 0x5f6   :  { %v4043_v44 = vadd.f32 %v5197_v20, %v7406_v8  ;;  %v4034_v9 = vpop.f32.mrb[135].mxu1  ;;  %v4180_v32 = vmax.f32 %v4040_v61, 0.0 }
 0x5f7   :  { %v4035_v48 = vadd.f32 %v7406_v8, %v4034_v9  ;;  %v4178_v13 = vmax.f32 %v4032_v39, 0.0 }
 0x5f8   :  { %v4181_v27 = vmax.f32 %v4043_v44, 0.0 }
 0x5f9   :  { %v4179_v40 = vmax.f32 %v4035_v48, 0.0 }
 0x5fa   :  { %v4225_v49 = vpack.c.bf16 %v4181_v27, %v4180_v32 }
 0x5fb   :  { %v4224_v33 = vpack.c.bf16 %v4179_v40, %v4178_v13 }
 0x5fd   :  { %5262 = vmatprep.mubr.msk.bf16.mxu0 %vm4261_vm3, %v4224_v33 }
 0x5fe   :  { %5263 = vmatmul.mubr.msk.bf16.gmra.mrb[4].mxu0 %vm4261_vm3, %v4225_v49 }
 0x603   :  { %v5200_v5 = vpop.f32.mrb[136].mxu1 }
 0x604   :  { %v4056_v2 = vadd.f32 %v5200_v5, %v7406_v8  ;;  %v4047_v57 = vpop.f32.mrb[137].mxu1 }
 0x605   :  { %v4048_v35 = vadd.f32 %v7406_v8, %v4047_v57  ;;  %v5201_v21 = vpop.f32.mrb[138].mxu1 }
 0x606   :  { %v4059_v25 = vadd.f32 %v5201_v21, %v7406_v8  ;;  %v4050_v24 = vpop.f32.mrb[139].mxu1  ;;  %v4184_v34 = vmax.f32 %v4056_v2, 0.0 }
 0x607   :  { %v4051_v51 = vadd.f32 %v7406_v8, %v4050_v24  ;;  %v4182_v52 = vmax.f32 %v4048_v35, 0.0 }
 0x608   :  { %v4185_v16 = vmax.f32 %v4059_v25, 0.0 }
 0x609   :  { %v4183_v28 = vmax.f32 %v4051_v51, 0.0 }
 0x60a   :  { %v4227_v29 = vpack.c.bf16 %v4185_v16, %v4184_v34 }
 0x60b   :  { %v4226_v14 = vpack.c.bf16 %v4183_v28, %v4182_v52 }
 0x60d   :  { %5266 = vmatprep.mubr.msk.bf16.mxu0 %vm4261_vm3, %v4226_v14 }
 0x60e   :  { %5267 = vmatmul.mubr.msk.bf16.gmra.mrb[8].mxu0 %vm4261_vm3, %v4227_v29 }
 0x613   :  { %v5204_v12 = vpop.f32.mrb[140].mxu1 }
 0x614   :  { %v4072_v58 = vadd.f32 %v5204_v12, %v7406_v8  ;;  %v4063_v31 = vpop.f32.mrb[141].mxu1 }
 0x615   :  { %v4064_v60 = vadd.f32 %v7406_v8, %v4063_v31  ;;  %v5205_v50 = vpop.f32.mrb[142].mxu1 }
 0x616   :  { %v4075_v62 = vadd.f32 %v5205_v50, %v7406_v8  ;;  %v4066_v38 = vpop.f32.mrb[143].mxu1  ;;  %v4188_v55 = vmax.f32 %v4072_v58, 0.0 }
 0x617   :  { %v4067_v42 = vadd.f32 %v7406_v8, %v4066_v38  ;;  %v4186_v0 = vmax.f32 %v4064_v60, 0.0 }
 0x618   :  { %v4189_v46 = vmax.f32 %v4075_v62, 0.0 }
 0x619   :  { %v4187_v10 = vmax.f32 %v4067_v42, 0.0  ;;  %v7507_v42 = vld [vmem:[%s7843_s12] ss:$0 sm:$0xff] }
 0x61a   :  { %v4229_v36 = vpack.c.bf16 %v4189_v46, %v4188_v55 }
 0x61b   :  { %v4228_v18 = vpack.c.bf16 %v4187_v10, %v4186_v0 }
 0x61d   :  { %5270 = vmatprep.mubr.msk.bf16.mxu0 %vm4261_vm3, %v4228_v18 }
 0x61e   :  { %5271 = vmatmul.mubr.msk.bf16.gmra.mrb[12].mxu0 %vm4261_vm3, %v4229_v36 }
 0x623   :  { %v5208_v26 = vpop.f32.mrb[144].mxu1 }
 0x624   :  { %v4088_v41 = vadd.f32 %v5208_v26, %v7406_v8  ;;  %v4079_v4 = vpop.f32.mrb[145].mxu1 }
 0x625   :  { %v4080_v45 = vadd.f32 %v7406_v8, %v4079_v4  ;;  %v5209_v63 = vpop.f32.mrb[146].mxu1 }
 0x626   :  { %v4091_v43 = vadd.f32 %v5209_v63, %v7406_v8  ;;  %v4082_v1 = vpop.f32.mrb[147].mxu1  ;;  %v4192_v59 = vmax.f32 %v4088_v41, 0.0 }
 0x627   :  { %v4083_v6 = vadd.f32 %v7406_v8, %v4082_v1  ;;  %v4190_v19 = vmax.f32 %v4080_v45, 0.0 }
 0x628   :  { %v4193_v54 = vmax.f32 %v4091_v43, 0.0 }
 0x629   :  { %v4191_v37 = vmax.f32 %v4083_v6, 0.0 }
 0x62a   :  { %v4231_v47 = vpack.c.bf16 %v4193_v54, %v4192_v59 }
 0x62b   :  { %v4230_v17 = vpack.c.bf16 %v4191_v37, %v4190_v19 }
 0x62d   :  { %5274 = vmatprep.mubr.msk.bf16.mxu0 %vm4261_vm3, %v4230_v17 }
 0x62e   :  { %5275 = vmatmul.mubr.msk.bf16.gmra.mrb[16].mxu0 %vm4261_vm3, %v4231_v47 }
 0x633   :  { %v5212_v23 = vpop.f32.mrb[148].mxu1 }
 0x634   :  { %v4104_v30 = vadd.f32 %v5212_v23, %v7406_v8  ;;  %v4095_v3 = vpop.f32.mrb[149].mxu1 }
 0x635   :  { %v4096_v56 = vadd.f32 %v7406_v8, %v4095_v3  ;;  %v5213_v53 = vpop.f32.mrb[150].mxu1 }
 0x636   :  { %v4107_v22 = vadd.f32 %v5213_v53, %v7406_v8  ;;  %v4098_v7 = vpop.f32.mrb[151].mxu1  ;;  %v4196_v61 = vmax.f32 %v4104_v30, 0.0 }
 0x637   :  { %v4099_v15 = vadd.f32 %v7406_v8, %v4098_v7  ;;  %v4194_v39 = vmax.f32 %v4096_v56, 0.0 }
 0x638   :  { %v4197_v11 = vmax.f32 %v4107_v22, 0.0 }
 0x639   :  { %v4195_v20 = vmax.f32 %v4099_v15, 0.0 }
 0x63a   :  { %v4233_v44 = vpack.c.bf16 %v4197_v11, %v4196_v61 }
 0x63b   :  { %v4232_v9 = vpack.c.bf16 %v4195_v20, %v4194_v39 }
 0x63d   :  { %5278 = vmatprep.mubr.msk.bf16.mxu0 %vm4261_vm3, %v4232_v9 }
 0x63e   :  { %5279 = vmatmul.mubr.msk.bf16.gmra.mrb[20].mxu0 %vm4261_vm3, %v4233_v44 }
 0x643   :  { %v5216_v48 = vpop.f32.mrb[152].mxu1 }
 0x644   :  { %v4120_v32 = vadd.f32 %v5216_v48, %v7406_v8  ;;  %v4111_v27 = vpop.f32.mrb[153].mxu1 }
 0x645   :  { %v4112_v13 = vadd.f32 %v7406_v8, %v4111_v27  ;;  %v5217_v40 = vpop.f32.mrb[154].mxu1 }
 0x646   :  { %v4123_v49 = vadd.f32 %v5217_v40, %v7406_v8  ;;  %v4114_v33 = vpop.f32.mrb[155].mxu1  ;;  %v4200_v2 = vmax.f32 %v4120_v32, 0.0 }
 0x647   :  { %v4115_v5 = vadd.f32 %v7406_v8, %v4114_v33  ;;  %v4198_v35 = vmax.f32 %v4112_v13, 0.0 }
 0x648   :  { %v4201_v57 = vmax.f32 %v4123_v49, 0.0 }
 0x649   :  { %v4199_v21 = vmax.f32 %v4115_v5, 0.0 }
 0x64a   :  { %v4235_v25 = vpack.c.bf16 %v4201_v57, %v4200_v2 }
 0x64b   :  { %v4234_v24 = vpack.c.bf16 %v4199_v21, %v4198_v35 }
 0x64d   :  { %5282 = vmatprep.mubr.msk.bf16.mxu0 %vm4261_vm3, %v4234_v24 }
 0x64e   :  { %5283 = vmatmul.mubr.msk.bf16.gmra.mrb[24].mxu0 %vm4261_vm3, %v4235_v25 }
 0x653   :  { %v5220_v51 = vpop.f32.mrb[156].mxu1 }
 0x654   :  { %v4136_v34 = vadd.f32 %v5220_v51, %v7406_v8  ;;  %v4127_v16 = vpop.f32.mrb[157].mxu1 }
 0x655   :  { %v4128_v52 = vadd.f32 %v7406_v8, %v4127_v16  ;;  %v5221_v28 = vpop.f32.mrb[158].mxu1 }
 0x656   :  { %v4139_v29 = vadd.f32 %v5221_v28, %v7406_v8  ;;  %v4130_v14 = vpop.f32.mrb[159].mxu1  ;;  %v4204_v58 = vmax.f32 %v4136_v34, 0.0 }
 0x657   :  { %v4131_v12 = vadd.f32 %v7406_v8, %v4130_v14  ;;  %v4202_v60 = vmax.f32 %v4128_v52, 0.0 }
 0x658   :  { %v4205_v31 = vmax.f32 %v4139_v29, 0.0 }
 0x659   :  { %v4203_v50 = vmax.f32 %v4131_v12, 0.0 }
 0x65a   :  { %v4237_v62 = vpack.c.bf16 %v4205_v31, %v4204_v58 }
 0x65b   :  { %v4236_v38 = vpack.c.bf16 %v4203_v50, %v4202_v60 }
 0x65d   :  { %v5228_v55 = vpop.f32.mrb[224].mxu0  ;;  %5286 = vmatprep.mubr.msk.bf16.mxu0 %vm4261_vm3, %v4236_v38 }
 0x65e   :  { %v4401_v46 = vadd.f32 %v5228_v55, %v7507_v42  ;;  %v4392_v0 = vpop.f32.mrb[225].mxu0  ;;  %5287 = vmatmul.mubr.msk.bf16.gmra.mrb[28].mxu0 %vm4261_vm3, %v4237_v62 }
 0x65f   :  { %v4393_v8 = vadd.f32 %v7507_v42, %v4392_v0  ;;  %v5229_v10 = vpop.f32.mrb[226].mxu0 }
 0x660   :  { %4650 = vst.msk [vmem:[%s7844_s13 + $0x10] sm:$0xff] %vm4647_vm4, %v4401_v46  ;;  %v4404_v36 = vadd.f32 %v5229_v10, %v7507_v42  ;;  %v4395_v18 = vpop.f32.mrb[227].mxu0 }
 0x661   :  { %4648 = vst.msk [vmem:[%s7844_s13] sm:$0xff] %vm4647_vm4, %v4393_v8  ;;  %v4396_v26 = vadd.f32 %v7507_v42, %v4395_v18 }
 0x662   :  { %4651 = vst.msk [vmem:[%s7844_s13 + $0x18] sm:$0xff] %vm4647_vm4, %v4404_v36 }
 0x663   :  { %4649 = vst.msk [vmem:[%s7844_s13 + $0x8] sm:$0xff] %vm4647_vm4, %v4396_v26 }
 0x665   :  { %v5232_v41 = vpop.f32.mrb[228].mxu0 }
 0x666   :  { %v4417_v4 = vadd.f32 %v5232_v41, %v7507_v42  ;;  %v4408_v45 = vpop.f32.mrb[229].mxu0 }
 0x667   :  { %v4409_v63 = vadd.f32 %v7507_v42, %v4408_v45  ;;  %v5233_v43 = vpop.f32.mrb[230].mxu0 }
 0x668   :  { %4654 = vst.msk [vmem:[%s7844_s13 + $0x30] sm:$0xff] %vm4647_vm4, %v4417_v4  ;;  %v4420_v1 = vadd.f32 %v5233_v43, %v7507_v42  ;;  %v4411_v6 = vpop.f32.mrb[231].mxu0 }
 0x669   :  { %4652 = vst.msk [vmem:[%s7844_s13 + $0x20] sm:$0xff] %vm4647_vm4, %v4409_v63  ;;  %v4412_v59 = vadd.f32 %v7507_v42, %v4411_v6 }
 0x66a   :  { %4655 = vst.msk [vmem:[%s7844_s13 + $0x38] sm:$0xff] %vm4647_vm4, %v4420_v1 }
 0x66b   :  { %4653 = vst.msk [vmem:[%s7844_s13 + $0x28] sm:$0xff] %vm4647_vm4, %v4412_v59 }
 0x66d   :  { %v5236_v54 = vpop.f32.mrb[232].mxu0 }
 0x66e   :  { %v4433_v19 = vadd.f32 %v5236_v54, %v7507_v42  ;;  %v4424_v37 = vpop.f32.mrb[233].mxu0 }
 0x66f   :  { %v4425_v47 = vadd.f32 %v7507_v42, %v4424_v37  ;;  %v5237_v17 = vpop.f32.mrb[234].mxu0 }
 0x670   :  { %4658 = vst.msk [vmem:[%s7844_s13 + $0x50] sm:$0xff] %vm4647_vm4, %v4433_v19  ;;  %v4436_v23 = vadd.f32 %v5237_v17, %v7507_v42  ;;  %v4427_v30 = vpop.f32.mrb[235].mxu0 }
 0x671   :  { %4656 = vst.msk [vmem:[%s7844_s13 + $0x40] sm:$0xff] %vm4647_vm4, %v4425_v47  ;;  %v4428_v3 = vadd.f32 %v7507_v42, %v4427_v30 }
 0x672   :  { %4659 = vst.msk [vmem:[%s7844_s13 + $0x58] sm:$0xff] %vm4647_vm4, %v4436_v23 }
 0x673   :  { %4657 = vst.msk [vmem:[%s7844_s13 + $0x48] sm:$0xff] %vm4647_vm4, %v4428_v3 }
 0x675   :  { %v5240_v56 = vpop.f32.mrb[236].mxu0 }
 0x676   :  { %v4449_v53 = vadd.f32 %v5240_v56, %v7507_v42  ;;  %v4440_v22 = vpop.f32.mrb[237].mxu0 }
 0x677   :  { %v4441_v7 = vadd.f32 %v7507_v42, %v4440_v22  ;;  %v5241_v15 = vpop.f32.mrb[238].mxu0 }
 0x678   :  { %4662 = vst.msk [vmem:[%s7844_s13 + $0x70] sm:$0xff] %vm4647_vm4, %v4449_v53  ;;  %v4452_v61 = vadd.f32 %v5241_v15, %v7507_v42  ;;  %v4443_v11 = vpop.f32.mrb[239].mxu0 }
 0x679   :  { %4660 = vst.msk [vmem:[%s7844_s13 + $0x60] sm:$0xff] %vm4647_vm4, %v4441_v7  ;;  %v4444_v39 = vadd.f32 %v7507_v42, %v4443_v11 }
 0x67a   :  { %4663 = vst.msk [vmem:[%s7844_s13 + $0x78] sm:$0xff] %vm4647_vm4, %v4452_v61 }
 0x67b   :  { %4661 = vst.msk [vmem:[%s7844_s13 + $0x68] sm:$0xff] %vm4647_vm4, %v4444_v39 }
 0x681   :  { %v5244_v20 = vpop.f32.mrb[240].mxu0 }
 0x682   :  { %v4465_v44 = vadd.f32 %v5244_v20, %v7507_v42  ;;  %v4456_v9 = vpop.f32.mrb[241].mxu0 }
 0x683   :  { %v4457_v48 = vadd.f32 %v7507_v42, %v4456_v9  ;;  %v5245_v32 = vpop.f32.mrb[242].mxu0 }
 0x684   :  { %4666 = vst.msk [vmem:[%s7844_s13 + $0x90] sm:$0xff] %vm4647_vm4, %v4465_v44  ;;  %v4468_v27 = vadd.f32 %v5245_v32, %v7507_v42  ;;  %v4459_v13 = vpop.f32.mrb[243].mxu0 }
 0x685   :  { %4664 = vst.msk [vmem:[%s7844_s13 + $0x80] sm:$0xff] %vm4647_vm4, %v4457_v48  ;;  %v4460_v40 = vadd.f32 %v7507_v42, %v4459_v13 }
 0x686   :  { %4667 = vst.msk [vmem:[%s7844_s13 + $0x98] sm:$0xff] %vm4647_vm4, %v4468_v27 }
 0x687   :  { %4665 = vst.msk [vmem:[%s7844_s13 + $0x88] sm:$0xff] %vm4647_vm4, %v4460_v40 }
 0x691   :  { %v5248_v49 = vpop.f32.mrb[244].mxu0 }
 0x692   :  { %v4481_v33 = vadd.f32 %v5248_v49, %v7507_v42  ;;  %v4472_v5 = vpop.f32.mrb[245].mxu0 }
 0x693   :  { %v4473_v2 = vadd.f32 %v7507_v42, %v4472_v5  ;;  %v5249_v57 = vpop.f32.mrb[246].mxu0 }
 0x694   :  { %4670 = vst.msk [vmem:[%s7844_s13 + $0xb0] sm:$0xff] %vm4647_vm4, %v4481_v33  ;;  %v4484_v35 = vadd.f32 %v5249_v57, %v7507_v42  ;;  %v4475_v21 = vpop.f32.mrb[247].mxu0 }
 0x695   :  { %4668 = vst.msk [vmem:[%s7844_s13 + $0xa0] sm:$0xff] %vm4647_vm4, %v4473_v2  ;;  %v4476_v25 = vadd.f32 %v7507_v42, %v4475_v21 }
 0x696   :  { %4671 = vst.msk [vmem:[%s7844_s13 + $0xb8] sm:$0xff] %vm4647_vm4, %v4484_v35 }
 0x697   :  { %4669 = vst.msk [vmem:[%s7844_s13 + $0xa8] sm:$0xff] %vm4647_vm4, %v4476_v25 }
 0x6a1   :  { %v5252_v24 = vpop.f32.mrb[248].mxu0 }
 0x6a2   :  { %v4497_v51 = vadd.f32 %v5252_v24, %v7507_v42  ;;  %v4488_v34 = vpop.f32.mrb[249].mxu0 }
 0x6a3   :  { %v4489_v16 = vadd.f32 %v7507_v42, %v4488_v34  ;;  %v5253_v52 = vpop.f32.mrb[250].mxu0 }
 0x6a4   :  { %4674 = vst.msk [vmem:[%s7844_s13 + $0xd0] sm:$0xff] %vm4647_vm4, %v4497_v51  ;;  %v4500_v28 = vadd.f32 %v5253_v52, %v7507_v42  ;;  %v4491_v29 = vpop.f32.mrb[251].mxu0 }
 0x6a5   :  { %4672 = vst.msk [vmem:[%s7844_s13 + $0xc0] sm:$0xff] %vm4647_vm4, %v4489_v16  ;;  %v4492_v14 = vadd.f32 %v7507_v42, %v4491_v29 }
 0x6a6   :  { %4675 = vst.msk [vmem:[%s7844_s13 + $0xd8] sm:$0xff] %vm4647_vm4, %v4500_v28 }
 0x6a7   :  { %4673 = vst.msk [vmem:[%s7844_s13 + $0xc8] sm:$0xff] %vm4647_vm4, %v4492_v14 }
 0x6b1   :  { %v5256_v12 = vpop.f32.mrb[252].mxu0 }
 0x6b2   :  { %v4513_v58 = vadd.f32 %v5256_v12, %v7507_v42  ;;  %v4504_v31 = vpop.f32.mrb[253].mxu0 }
 0x6b3   :  { %v4505_v60 = vadd.f32 %v7507_v42, %v4504_v31  ;;  %v5257_v50 = vpop.f32.mrb[254].mxu0 }
 0x6b4   :  { %4678 = vst.msk [vmem:[%s7844_s13 + $0xf0] sm:$0xff] %vm4647_vm4, %v4513_v58  ;;  %v4516_v62 = vadd.f32 %v5257_v50, %v7507_v42  ;;  %v4507_v38 = vpop.f32.mrb[255].mxu0 }
 0x6b5   :  { %4676 = vst.msk [vmem:[%s7844_s13 + $0xe0] sm:$0xff] %vm4647_vm4, %v4505_v60  ;;  %v4508_v55 = vadd.f32 %v7507_v42, %v4507_v38 }
 0x6b6   :  { %4679 = vst.msk [vmem:[%s7844_s13 + $0xf8] sm:$0xff] %vm4647_vm4, %v4516_v62 }
 0x6b7   :  { %4677 = vst.msk [vmem:[%s7844_s13 + $0xe8] sm:$0xff] %vm4647_vm4, %v4508_v55 }
 0x6c1   :  { %v5260_v46 = vpop.f32.mrb[0].mxu0 }
 0x6c2   :  { %v4529_v0 = vadd.f32 %v5260_v46, %v7507_v42  ;;  %v4520_v8 = vpop.f32.mrb[1].mxu0 }
 0x6c3   :  { %v4521_v10 = vadd.f32 %v7507_v42, %v4520_v8  ;;  %v5261_v36 = vpop.f32.mrb[2].mxu0 }
 0x6c4   :  { %4682 = vst.msk [vmem:[%s7844_s13 + $0x110] sm:$0xff] %vm4647_vm4, %v4529_v0  ;;  %v4532_v18 = vadd.f32 %v5261_v36, %v7507_v42  ;;  %v4523_v26 = vpop.f32.mrb[3].mxu0 }
 0x6c5   :  { %4680 = vst.msk [vmem:[%s7844_s13 + $0x100] sm:$0xff] %vm4647_vm4, %v4521_v10  ;;  %v4524_v41 = vadd.f32 %v7507_v42, %v4523_v26 }
 0x6c6   :  { %4683 = vst.msk [vmem:[%s7844_s13 + $0x118] sm:$0xff] %vm4647_vm4, %v4532_v18 }
 0x6c7   :  { %4681 = vst.msk [vmem:[%s7844_s13 + $0x108] sm:$0xff] %vm4647_vm4, %v4524_v41 }
 0x6d1   :  { %v5264_v4 = vpop.f32.mrb[4].mxu0 }
 0x6d2   :  { %v4545_v45 = vadd.f32 %v5264_v4, %v7507_v42  ;;  %v4536_v63 = vpop.f32.mrb[5].mxu0 }
 0x6d3   :  { %v4537_v43 = vadd.f32 %v7507_v42, %v4536_v63  ;;  %v5265_v1 = vpop.f32.mrb[6].mxu0 }
 0x6d4   :  { %4686 = vst.msk [vmem:[%s7844_s13 + $0x130] sm:$0xff] %vm4647_vm4, %v4545_v45  ;;  %v4548_v6 = vadd.f32 %v5265_v1, %v7507_v42  ;;  %v4539_v59 = vpop.f32.mrb[7].mxu0 }
 0x6d5   :  { %4684 = vst.msk [vmem:[%s7844_s13 + $0x120] sm:$0xff] %vm4647_vm4, %v4537_v43  ;;  %v4540_v54 = vadd.f32 %v7507_v42, %v4539_v59 }
 0x6d6   :  { %4687 = vst.msk [vmem:[%s7844_s13 + $0x138] sm:$0xff] %vm4647_vm4, %v4548_v6 }
 0x6d7   :  { %4685 = vst.msk [vmem:[%s7844_s13 + $0x128] sm:$0xff] %vm4647_vm4, %v4540_v54 }
 0x6e1   :  { %v5268_v19 = vpop.f32.mrb[8].mxu0 }
 0x6e2   :  { %v4561_v37 = vadd.f32 %v5268_v19, %v7507_v42  ;;  %v4552_v47 = vpop.f32.mrb[9].mxu0 }
 0x6e3   :  { %v4553_v17 = vadd.f32 %v7507_v42, %v4552_v47  ;;  %v5269_v23 = vpop.f32.mrb[10].mxu0 }
 0x6e4   :  { %4690 = vst.msk [vmem:[%s7844_s13 + $0x150] sm:$0xff] %vm4647_vm4, %v4561_v37  ;;  %v4564_v30 = vadd.f32 %v5269_v23, %v7507_v42  ;;  %v4555_v3 = vpop.f32.mrb[11].mxu0 }
 0x6e5   :  { %4688 = vst.msk [vmem:[%s7844_s13 + $0x140] sm:$0xff] %vm4647_vm4, %v4553_v17  ;;  %v4556_v56 = vadd.f32 %v7507_v42, %v4555_v3 }
 0x6e6   :  { %4691 = vst.msk [vmem:[%s7844_s13 + $0x158] sm:$0xff] %vm4647_vm4, %v4564_v30 }
 0x6e7   :  { %4689 = vst.msk [vmem:[%s7844_s13 + $0x148] sm:$0xff] %vm4647_vm4, %v4556_v56 }
 0x6f1   :  { %v5272_v53 = vpop.f32.mrb[12].mxu0 }
 0x6f2   :  { %v4577_v22 = vadd.f32 %v5272_v53, %v7507_v42  ;;  %v4568_v7 = vpop.f32.mrb[13].mxu0 }
 0x6f3   :  { %v4569_v15 = vadd.f32 %v7507_v42, %v4568_v7  ;;  %v5273_v61 = vpop.f32.mrb[14].mxu0 }
 0x6f4   :  { %4694 = vst.msk [vmem:[%s7844_s13 + $0x170] sm:$0xff] %vm4647_vm4, %v4577_v22  ;;  %v4580_v11 = vadd.f32 %v5273_v61, %v7507_v42  ;;  %v4571_v39 = vpop.f32.mrb[15].mxu0 }
 0x6f5   :  { %4692 = vst.msk [vmem:[%s7844_s13 + $0x160] sm:$0xff] %vm4647_vm4, %v4569_v15  ;;  %v4572_v20 = vadd.f32 %v7507_v42, %v4571_v39 }
 0x6f6   :  { %4695 = vst.msk [vmem:[%s7844_s13 + $0x178] sm:$0xff] %vm4647_vm4, %v4580_v11 }
 0x6f7   :  { %4693 = vst.msk [vmem:[%s7844_s13 + $0x168] sm:$0xff] %vm4647_vm4, %v4572_v20 }
 0x701   :  { %v5276_v44 = vpop.f32.mrb[16].mxu0 }
 0x702   :  { %v4593_v9 = vadd.f32 %v5276_v44, %v7507_v42  ;;  %v4584_v48 = vpop.f32.mrb[17].mxu0 }
 0x703   :  { %v4585_v32 = vadd.f32 %v7507_v42, %v4584_v48  ;;  %v5277_v27 = vpop.f32.mrb[18].mxu0 }
 0x704   :  { %4698 = vst.msk [vmem:[%s7844_s13 + $0x190] sm:$0xff] %vm4647_vm4, %v4593_v9  ;;  %v4596_v13 = vadd.f32 %v5277_v27, %v7507_v42  ;;  %v4587_v40 = vpop.f32.mrb[19].mxu0 }
 0x705   :  { %4696 = vst.msk [vmem:[%s7844_s13 + $0x180] sm:$0xff] %vm4647_vm4, %v4585_v32  ;;  %v4588_v49 = vadd.f32 %v7507_v42, %v4587_v40 }
 0x706   :  { %4699 = vst.msk [vmem:[%s7844_s13 + $0x198] sm:$0xff] %vm4647_vm4, %v4596_v13 }
 0x707   :  { %4697 = vst.msk [vmem:[%s7844_s13 + $0x188] sm:$0xff] %vm4647_vm4, %v4588_v49 }
 0x711   :  { %v5280_v33 = vpop.f32.mrb[20].mxu0 }
 0x712   :  { %v4609_v5 = vadd.f32 %v5280_v33, %v7507_v42  ;;  %v4600_v2 = vpop.f32.mrb[21].mxu0 }
 0x713   :  { %v4601_v57 = vadd.f32 %v7507_v42, %v4600_v2  ;;  %v5281_v35 = vpop.f32.mrb[22].mxu0 }
 0x714   :  { %4702 = vst.msk [vmem:[%s7844_s13 + $0x1b0] sm:$0xff] %vm4647_vm4, %v4609_v5  ;;  %v4612_v21 = vadd.f32 %v5281_v35, %v7507_v42  ;;  %v4603_v25 = vpop.f32.mrb[23].mxu0 }
 0x715   :  { %4700 = vst.msk [vmem:[%s7844_s13 + $0x1a0] sm:$0xff] %vm4647_vm4, %v4601_v57  ;;  %v4604_v24 = vadd.f32 %v7507_v42, %v4603_v25 }
 0x716   :  { %4703 = vst.msk [vmem:[%s7844_s13 + $0x1b8] sm:$0xff] %vm4647_vm4, %v4612_v21 }
 0x717   :  { %4701 = vst.msk [vmem:[%s7844_s13 + $0x1a8] sm:$0xff] %vm4647_vm4, %v4604_v24 }
 0x721   :  { %v5284_v51 = vpop.f32.mrb[24].mxu0 }
 0x722   :  { %v4625_v34 = vadd.f32 %v5284_v51, %v7507_v42  ;;  %v4616_v16 = vpop.f32.mrb[25].mxu0 }
 0x723   :  { %v4617_v52 = vadd.f32 %v7507_v42, %v4616_v16  ;;  %v5285_v28 = vpop.f32.mrb[26].mxu0 }
 0x724   :  { %4706 = vst.msk [vmem:[%s7844_s13 + $0x1d0] sm:$0xff] %vm4647_vm4, %v4625_v34  ;;  %v4628_v29 = vadd.f32 %v5285_v28, %v7507_v42  ;;  %v4619_v14 = vpop.f32.mrb[27].mxu0 }
 0x725   :  { %4704 = vst.msk [vmem:[%s7844_s13 + $0x1c0] sm:$0xff] %vm4647_vm4, %v4617_v52  ;;  %v4620_v12 = vadd.f32 %v7507_v42, %v4619_v14 }
 0x726   :  { %4707 = vst.msk [vmem:[%s7844_s13 + $0x1d8] sm:$0xff] %vm4647_vm4, %v4628_v29 }
 0x727   :  { %4705 = vst.msk [vmem:[%s7844_s13 + $0x1c8] sm:$0xff] %vm4647_vm4, %v4620_v12 }
 0x731   :  { %v5288_v58 = vpop.f32.mrb[28].mxu0 }
 0x732   :  { %v4641_v31 = vadd.f32 %v5288_v58, %v7507_v42  ;;  %v4632_v60 = vpop.f32.mrb[29].mxu0 }
 0x733   :  { %v4633_v50 = vadd.f32 %v7507_v42, %v4632_v60  ;;  %v5289_v62 = vpop.f32.mrb[30].mxu0 }
 0x734   :  { %4710 = vst.msk [vmem:[%s7844_s13 + $0x1f0] sm:$0xff] %vm4647_vm4, %v4641_v31  ;;  %v4644_v38 = vadd.f32 %v5289_v62, %v7507_v42  ;;  %v4635_v55 = vpop.f32.mrb[31].mxu0 }
 0x735   :  { %4708 = vst.msk [vmem:[%s7844_s13 + $0x1e0] sm:$0xff] %vm4647_vm4, %v4633_v50  ;;  %v4636_v46 = vadd.f32 %v7507_v42, %v4635_v55 }
 0x736   :  { %4711 = vst.msk [vmem:[%s7844_s13 + $0x1f8] sm:$0xff] %vm4647_vm4, %v4644_v38 }
 0x737   :  { %4709 = vst.msk [vmem:[%s7844_s13 + $0x1e8] sm:$0xff] %vm4647_vm4, %v4636_v46 }

</bundles_post_ra>
